<compile_context>
chip_gen: v6e
topology: v6e:2x2x1
jax: 0.10.0
libtpu: 0.0.40
codegen_flags: <defaults>
</compile_context>

<pallas_src>
import jax
import jax.numpy as jnp
from jax.experimental import pallas as pl
from jax.experimental.pallas import tpu as pltpu


# ---------------------------------------------------------------------------
# Packed-bias layout: each bias starts at a 128-lane-aligned offset so the
# in-kernel static slices are lane-tile aligned.
# ---------------------------------------------------------------------------
def _round_up(x, m=128):
    return ((x + m - 1) // m) * m


def _bias_layout(d_attn, c0, c1, c2, c3):
    widths = (d_attn, d_attn, d_attn, c0, c1, c2, c3)   # bq, bk, bv, b1, b2, b3, b4
    offs, off = [], 0
    for w in widths:
        offs.append(off)
        off += _round_up(w)
    return tuple(offs), off


# ---------------------------------------------------------------------------
# Kernel
# ---------------------------------------------------------------------------
def fusion_head_kernel(
    hr_ref, hk_ref, hph_ref,        # activations (block_b, d) f32
    wq_ref,                         # (d_real, d_attn)        bf16
    wkv_ref,                        # (d_k, 2*d_attn)         bf16  [Wk | Wv]
    w1_ref,                         # (d_attn + d_ph, c0)     bf16  rows: [h_ck | h_ph]
    w2_ref, w3_ref, w4_ref,         # (c0,c1) (c1,c2) (c2,c3) bf16
    bias_ref,                       # (1, bias_pad)           f32   packed biases
    out_ref,                        # (block_b, c3)           f32
):
    d_attn = wq_ref.shape[1]
    c0 = w1_ref.shape[1]
    c1 = w2_ref.shape[1]
    c2 = w3_ref.shape[1]
    c3 = w4_ref.shape[1]
    offs, _ = _bias_layout(d_attn, c0, c1, c2, c3)
    off_q, off_k, off_v, off_1, off_2, off_3, off_4 = offs

    bq = bias_ref[:, off_q:off_q + d_attn]
    bk = bias_ref[:, off_k:off_k + d_attn]
    bv = bias_ref[:, off_v:off_v + d_attn]
    b1 = bias_ref[:, off_1:off_1 + c0]
    b2 = bias_ref[:, off_2:off_2 + c1]
    b3 = bias_ref[:, off_3:off_3 + c2]
    b4 = bias_ref[:, off_4:off_4 + c3]

    # Activations -> bf16 so every matmul is a native bf16 x bf16 MXU op with
    # f32 accumulation.
    hr = hr_ref[...].astype(jnp.bfloat16)
    hk = hk_ref[...].astype(jnp.bfloat16)
    hph = hph_ref[...].astype(jnp.bfloat16)

    # Projections: q separately, k/v fused into a single wide matmul.
    q = jnp.dot(hr, wq_ref[...], preferred_element_type=jnp.float32) + bq
    kv = jnp.dot(hk, wkv_ref[...], preferred_element_type=jnp.float32)
    k = kv[:, :d_attn] + bk
    v = kv[:, d_attn:] + bv

    # attn_weights = sigmoid(sum(q * k, -1, keepdim=True)); h_ck = attn_weights * v
    attn_w = jax.nn.sigmoid(jnp.sum(q * k, axis=-1, keepdims=True))
    h_ck = (attn_w * v).astype(jnp.bfloat16)

    # fused = cat([h_ck, h_ph], -1) @ W1 + b1  -> split-weight matmul (row slices
    # of the packed W1; avoids an in-kernel concat).
    h1 = (jnp.dot(h_ck, w1_ref[:d_attn, :], preferred_element_type=jnp.float32)
          + jnp.dot(hph, w1_ref[d_attn:, :], preferred_element_type=jnp.float32)
          + b1)
    h1 = jnp.maximum(h1, 0.0).astype(jnp.bfloat16)        # ReLU (Dropout = identity)

    h2 = jnp.dot(h1, w2_ref[...], preferred_element_type=jnp.float32) + b2
    h2 = jnp.maximum(h2, 0.0).astype(jnp.bfloat16)         # ReLU (Dropout = identity)

    h3 = jnp.dot(h2, w3_ref[...], preferred_element_type=jnp.float32) + b3
    h3 = jnp.maximum(h3, 0.0).astype(jnp.bfloat16)         # ReLU

    out_ref[...] = (jnp.dot(h3, w4_ref[...], preferred_element_type=jnp.float32)
                    + b4).astype(out_ref.dtype)


# ---------------------------------------------------------------------------
# Parameters (deterministic synthetic).  Weights stored as (in, out) = W_pt.T,
# cast to bf16; biases packed into one f32 buffer at 128-aligned offsets.
# ---------------------------------------------------------------------------
def make_params(key, d_real=512, d_k=512, d_ph=256, d_attn_proj=512,
                classifier_dims=(512, 256, 64, 3), param_dtype=jnp.bfloat16):
    def linear(k, fan_in, fan_out):
        kw, kb = jax.random.split(k)
        w = jax.random.normal(kw, (fan_in, fan_out), jnp.float32) * 0.02
        b = jax.random.normal(kb, (fan_out,), jnp.float32) * 0.01
        return w, b

    c0, c1, c2, c3 = classifier_dims
    ks = jax.random.split(key, 7)
    wq, bq = linear(ks[0], d_real, d_attn_proj)
    wk, bk = linear(ks[1], d_k, d_attn_proj)
    wv, bv = linear(ks[2], d_k, d_attn_proj)
    w1, b1 = linear(ks[3], d_attn_proj + d_ph, c0)
    w2, b2 = linear(ks[4], c0, c1)
    w3, b3 = linear(ks[5], c1, c2)
    w4, b4 = linear(ks[6], c2, c3)

    wkv = jnp.concatenate([wk, wv], axis=1)                 # (d_k, 2*d_attn)

    offs, total = _bias_layout(d_attn_proj, c0, c1, c2, c3)
    bias_packed = jnp.zeros((1, total), jnp.float32)
    for off, b in zip(offs, (bq, bk, bv, b1, b2, b3, b4)):
        bias_packed = bias_packed.at[0, off:off + b.shape[0]].set(b)

    return (wq.astype(param_dtype), wkv.astype(param_dtype),
            w1.astype(param_dtype), w2.astype(param_dtype),
            w3.astype(param_dtype), w4.astype(param_dtype),
            bias_packed)


# ---------------------------------------------------------------------------
# Wrapper
# ---------------------------------------------------------------------------
def fusion_head(h_real, h_kspace, h_ph, params, *, block_b=None):
    wq, wkv, w1, w2, w3, w4, bias_packed = params
    B, d_real = h_real.shape
    d_k = h_kspace.shape[1]
    d_ph = h_ph.shape[1]
    n_classes = w4.shape[1]

    # Batch tiling: one block for small batches; 256-row tiles for large,
    # divisible batches (fills the MXU and engages the 2nd TC on v7x).
    if block_b is None:
        block_b = 256 if (B > 256 and B % 256 == 0) else B
    grid = (pl.cdiv(B, block_b),)

    in_specs = [
        pl.BlockSpec((block_b, d_real), lambda i: (i, 0)),
        pl.BlockSpec((block_b, d_k), lambda i: (i, 0)),
        pl.BlockSpec((block_b, d_ph), lambda i: (i, 0)),
        pl.BlockSpec(wq.shape, lambda i: (0, 0)),
        pl.BlockSpec(wkv.shape, lambda i: (0, 0)),
        pl.BlockSpec(w1.shape, lambda i: (0, 0)),
        pl.BlockSpec(w2.shape, lambda i: (0, 0)),
        pl.BlockSpec(w3.shape, lambda i: (0, 0)),
        pl.BlockSpec(w4.shape, lambda i: (0, 0)),
        pl.BlockSpec(bias_packed.shape, lambda i: (0, 0)),
    ]
    out_specs = pl.BlockSpec((block_b, n_classes), lambda i: (i, 0))

    # Advisory cost estimate (kernel is HBM-DMA bound at small batch).
    flops = 2 * B * (d_real * wq.shape[1] + d_k * wkv.shape[1]
                     + w1.shape[0] * w1.shape[1] + w2.shape[0] * w2.shape[1]
                     + w3.shape[0] * w3.shape[1] + w4.shape[0] * w4.shape[1])
    bytes_accessed = (sum(int(p.size) * p.dtype.itemsize
                          for p in (wq, wkv, w1, w2, w3, w4, bias_packed))
                      + int(h_real.size + h_kspace.size + h_ph.size) * 4
                      + B * n_classes * 4)
    cost = pl.CostEstimate(flops=flops, transcendentals=B,
                           bytes_accessed=bytes_accessed)

    return pl.pallas_call(
        fusion_head_kernel,
        out_shape=jax.ShapeDtypeStruct((B, n_classes), jnp.float32),
        grid=grid,
        in_specs=in_specs,
        out_specs=out_specs,
        compiler_params=pltpu.CompilerParams(
            dimension_semantics=("parallel",),
            vmem_limit_bytes=32 * 1024 * 1024),
        cost_estimate=cost,
    )(h_real, h_kspace, h_ph, wq, wkv, w1, w2, w3, w4, bias_packed)


# ---------------------------------------------------------------------------
# Pure-JAX reference reproducing the kernel's numerics (bf16 matmuls, f32 acc).
# ---------------------------------------------------------------------------
def fusion_head_ref(h_real, h_kspace, h_ph, params):
    wq, wkv, w1, w2, w3, w4, bias = params
    d_attn = wq.shape[1]
    c0, c1, c2, c3 = w1.shape[1], w2.shape[1], w3.shape[1], w4.shape[1]
    offs, _ = _bias_layout(d_attn, c0, c1, c2, c3)
    bq = bias[:, offs[0]:offs[0] + d_attn]
    bk = bias[:, offs[1]:offs[1] + d_attn]
    bv = bias[:, offs[2]:offs[2] + d_attn]
    b1 = bias[:, offs[3]:offs[3] + c0]
    b2 = bias[:, offs[4]:offs[4] + c1]
    b3 = bias[:, offs[5]:offs[5] + c2]
    b4 = bias[:, offs[6]:offs[6] + c3]

    def dot(a, w):
        return jnp.dot(a.astype(jnp.bfloat16), w,
                       preferred_element_type=jnp.float32)

    q = dot(h_real, wq) + bq
    kv = dot(h_kspace, wkv)
    k = kv[:, :d_attn] + bk
    v = kv[:, d_attn:] + bv
    attn_w = jax.nn.sigmoid(jnp.sum(q * k, axis=-1, keepdims=True))
    h_ck = attn_w * v
    h1 = jnp.maximum(dot(h_ck, w1[:d_attn]) + dot(h_ph, w1[d_attn:]) + b1, 0.0)
    h2 = jnp.maximum(dot(h1, w2) + b2, 0.0)
    h3 = jnp.maximum(dot(h2, w3) + b3, 0.0)
    return dot(h3, w4) + b4


if __name__ == "__main__":
    B, d_real, d_k, d_ph = 8, 512, 512, 256

    root = jax.random.PRNGKey(0)
    k_hr, k_hk, k_hp, k_params = jax.random.split(root, 4)

    h_real = jax.random.normal(k_hr, (B, d_real), jnp.float32)
    h_kspace = jax.random.normal(k_hk, (B, d_k), jnp.float32)
    h_ph = jax.random.normal(k_hp, (B, d_ph), jnp.float32)

    params = make_params(k_params, d_real=d_real, d_k=d_k, d_ph=d_ph)

    logits = jax.block_until_ready(fusion_head(h_real, h_kspace, h_ph, params))
    ref = fusion_head_ref(h_real, h_kspace, h_ph, params)

    assert logits.shape == (B, 3), logits.shape
    assert jnp.allclose(logits, ref, atol=2e-2, rtol=2e-2), "mismatch vs. reference"
    print("KERNEL_OK")
</pallas_src>

<mosaic_0001>
module attributes {stable_mosaic.version = 11 : i64} {
  func.func @fusion_head_kernel(%arg0: i32, %arg1: memref<8x512xf32, #tpu.memory_space<vmem>>, %arg2: memref<8x512xf32, #tpu.memory_space<vmem>>, %arg3: memref<8x256xf32, #tpu.memory_space<vmem>>, %arg4: memref<512x512xbf16, #tpu.memory_space<vmem>>, %arg5: memref<512x1024xbf16, #tpu.memory_space<vmem>>, %arg6: memref<768x512xbf16, #tpu.memory_space<vmem>>, %arg7: memref<512x256xbf16, #tpu.memory_space<vmem>>, %arg8: memref<256x64xbf16, #tpu.memory_space<vmem>>, %arg9: memref<64x3xbf16, #tpu.memory_space<vmem>>, %arg10: memref<1x2560xf32, #tpu.memory_space<vmem>>, %arg11: memref<8x3xf32, #tpu.memory_space<vmem>>) attributes {dimension_semantics = [#tpu.dimension_semantics<parallel>], iteration_bounds = array<i64: 1>, scalar_prefetch = 0 : i64, scratch_operands = 0 : i64, tpu.core_type = #tpu.core_type<tc>, window_params = [{transform_indices = @transform_0, window_bounds = array<i64: 8, 512>}, {transform_indices = @transform_1, window_bounds = array<i64: 8, 512>}, {transform_indices = @transform_2, window_bounds = array<i64: 8, 256>}, {pipeline_mode = #tpu.pipeline_mode<synchronous>, transform_indices = @transform_3, window_bounds = array<i64: 512, 512>}, {pipeline_mode = #tpu.pipeline_mode<synchronous>, transform_indices = @transform_4, window_bounds = array<i64: 512, 1024>}, {pipeline_mode = #tpu.pipeline_mode<synchronous>, transform_indices = @transform_5, window_bounds = array<i64: 768, 512>}, {pipeline_mode = #tpu.pipeline_mode<synchronous>, transform_indices = @transform_6, window_bounds = array<i64: 512, 256>}, {pipeline_mode = #tpu.pipeline_mode<synchronous>, transform_indices = @transform_7, window_bounds = array<i64: 256, 64>}, {pipeline_mode = #tpu.pipeline_mode<synchronous>, transform_indices = @transform_8, window_bounds = array<i64: 64, 3>}, {pipeline_mode = #tpu.pipeline_mode<synchronous>, transform_indices = @transform_9, window_bounds = array<i64: 1, 2560>}, {transform_indices = @transform_10, window_bounds = array<i64: 8, 3>}]} {
    %c0 = arith.constant 0 : index
    %c0_0 = arith.constant 0 : index
    %0 = vector.load %arg10[%c0, %c0_0] : memref<1x2560xf32, #tpu.memory_space<vmem>>, vector<1x512xf32>
    %c0_1 = arith.constant 0 : index
    %c512 = arith.constant 512 : index
    %1 = vector.load %arg10[%c0_1, %c512] : memref<1x2560xf32, #tpu.memory_space<vmem>>, vector<1x512xf32>
    %c0_2 = arith.constant 0 : index
    %c1024 = arith.constant 1024 : index
    %2 = vector.load %arg10[%c0_2, %c1024] : memref<1x2560xf32, #tpu.memory_space<vmem>>, vector<1x512xf32>
    %c0_3 = arith.constant 0 : index
    %c1536 = arith.constant 1536 : index
    %3 = vector.load %arg10[%c0_3, %c1536] : memref<1x2560xf32, #tpu.memory_space<vmem>>, vector<1x512xf32>
    %c0_4 = arith.constant 0 : index
    %c2048 = arith.constant 2048 : index
    %4 = vector.load %arg10[%c0_4, %c2048] : memref<1x2560xf32, #tpu.memory_space<vmem>>, vector<1x256xf32>
    %c0_5 = arith.constant 0 : index
    %c2304 = arith.constant 2304 : index
    %5 = vector.load %arg10[%c0_5, %c2304] : memref<1x2560xf32, #tpu.memory_space<vmem>>, vector<1x64xf32>
    %c0_6 = arith.constant 0 : index
    %c2432 = arith.constant 2432 : index
    %6 = vector.load %arg10[%c0_6, %c2432] : memref<1x2560xf32, #tpu.memory_space<vmem>>, vector<1x3xf32>
    %c0_7 = arith.constant 0 : index
    %c0_8 = arith.constant 0 : index
    %7 = vector.load %arg1[%c0_7, %c0_8] : memref<8x512xf32, #tpu.memory_space<vmem>>, vector<8x512xf32>
    %8 = arith.truncf %7 : vector<8x512xf32> to vector<8x512xbf16>
    %c0_9 = arith.constant 0 : index
    %c0_10 = arith.constant 0 : index
    %9 = vector.load %arg2[%c0_9, %c0_10] : memref<8x512xf32, #tpu.memory_space<vmem>>, vector<8x512xf32>
    %10 = arith.truncf %9 : vector<8x512xf32> to vector<8x512xbf16>
    %c0_11 = arith.constant 0 : index
    %c0_12 = arith.constant 0 : index
    %11 = vector.load %arg3[%c0_11, %c0_12] : memref<8x256xf32, #tpu.memory_space<vmem>>, vector<8x256xf32>
    %12 = arith.truncf %11 : vector<8x256xf32> to vector<8x256xbf16>
    %c0_13 = arith.constant 0 : index
    %c0_14 = arith.constant 0 : index
    %13 = vector.load %arg4[%c0_13, %c0_14] : memref<512x512xbf16, #tpu.memory_space<vmem>>, vector<512x512xbf16>
    %cst = arith.constant dense<0.000000e+00> : vector<8x512xf32>
    %14 = tpu.matmul %8, %13, %cst {dimension_numbers = #tpu.dot_dimension_numbers<[1], [0], [0], [1], [0, 0, 1, 1], [], []>} : vector<8x512xbf16>, vector<512x512xbf16>, vector<8x512xf32> -> vector<8x512xf32>
    %15 = vector.broadcast %0 : vector<1x512xf32> to vector<8x512xf32>
    %16 = arith.addf %14, %15 : vector<8x512xf32>
    %c0_15 = arith.constant 0 : index
    %c0_16 = arith.constant 0 : index
    %17 = vector.load %arg5[%c0_15, %c0_16] : memref<512x1024xbf16, #tpu.memory_space<vmem>>, vector<512x1024xbf16>
    %cst_17 = arith.constant dense<0.000000e+00> : vector<8x1024xf32>
    %18 = tpu.matmul %10, %17, %cst_17 {dimension_numbers = #tpu.dot_dimension_numbers<[1], [0], [0], [1], [0, 0, 1, 1], [], []>} : vector<8x512xbf16>, vector<512x1024xbf16>, vector<8x1024xf32> -> vector<8x1024xf32>
    %19 = vector.extract_strided_slice %18 {offsets = [0, 0], sizes = [8, 512], strides = [1, 1]} : vector<8x1024xf32> to vector<8x512xf32>
    %20 = vector.broadcast %1 : vector<1x512xf32> to vector<8x512xf32>
    %21 = arith.addf %19, %20 : vector<8x512xf32>
    %22 = vector.extract_strided_slice %18 {offsets = [0, 512], sizes = [8, 512], strides = [1, 1]} : vector<8x1024xf32> to vector<8x512xf32>
    %23 = vector.broadcast %2 : vector<1x512xf32> to vector<8x512xf32>
    %24 = arith.addf %22, %23 : vector<8x512xf32>
    %25 = arith.mulf %16, %21 : vector<8x512xf32>
    %cst_18 = arith.constant dense<0.000000e+00> : vector<8xf32>
    %26 = vector.multi_reduction <add>, %25, %cst_18 [1] : vector<8x512xf32> to vector<8xf32>
    %27 = vector.shape_cast %26 : vector<8xf32> to vector<8x1xf32>
    %28 = arith.negf %27 : vector<8x1xf32>
    %29 = math.exp %28 : vector<8x1xf32>
    %cst_19 = arith.constant 1.000000e+00 : f32
    %30 = vector.broadcast %cst_19 : f32 to vector<8x1xf32>
    %31 = arith.addf %30, %29 : vector<8x1xf32>
    %32 = arith.divf %30, %31 : vector<8x1xf32>
    %33 = vector.broadcast %32 : vector<8x1xf32> to vector<8x512xf32>
    %34 = arith.mulf %33, %24 : vector<8x512xf32>
    %35 = arith.truncf %34 : vector<8x512xf32> to vector<8x512xbf16>
    %c0_20 = arith.constant 0 : index
    %c0_21 = arith.constant 0 : index
    %36 = vector.load %arg6[%c0_20, %c0_21] : memref<768x512xbf16, #tpu.memory_space<vmem>>, vector<512x512xbf16>
    %cst_22 = arith.constant dense<0.000000e+00> : vector<8x512xf32>
    %37 = tpu.matmul %35, %36, %cst_22 {dimension_numbers = #tpu.dot_dimension_numbers<[1], [0], [0], [1], [0, 0, 1, 1], [], []>} : vector<8x512xbf16>, vector<512x512xbf16>, vector<8x512xf32> -> vector<8x512xf32>
    %c512_23 = arith.constant 512 : index
    %c0_24 = arith.constant 0 : index
    %38 = vector.load %arg6[%c512_23, %c0_24] : memref<768x512xbf16, #tpu.memory_space<vmem>>, vector<256x512xbf16>
    %cst_25 = arith.constant dense<0.000000e+00> : vector<8x512xf32>
    %39 = tpu.matmul %12, %38, %cst_25 {dimension_numbers = #tpu.dot_dimension_numbers<[1], [0], [0], [1], [0, 0, 1, 1], [], []>} : vector<8x256xbf16>, vector<256x512xbf16>, vector<8x512xf32> -> vector<8x512xf32>
    %40 = arith.addf %37, %39 : vector<8x512xf32>
    %41 = vector.broadcast %3 : vector<1x512xf32> to vector<8x512xf32>
    %42 = arith.addf %40, %41 : vector<8x512xf32>
    %cst_26 = arith.constant 0.000000e+00 : f32
    %43 = vector.broadcast %cst_26 : f32 to vector<8x512xf32>
    %44 = arith.maximumf %42, %43 : vector<8x512xf32>
    %45 = arith.truncf %44 : vector<8x512xf32> to vector<8x512xbf16>
    %c0_27 = arith.constant 0 : index
    %c0_28 = arith.constant 0 : index
    %46 = vector.load %arg7[%c0_27, %c0_28] : memref<512x256xbf16, #tpu.memory_space<vmem>>, vector<512x256xbf16>
    %cst_29 = arith.constant dense<0.000000e+00> : vector<8x256xf32>
    %47 = tpu.matmul %45, %46, %cst_29 {dimension_numbers = #tpu.dot_dimension_numbers<[1], [0], [0], [1], [0, 0, 1, 1], [], []>} : vector<8x512xbf16>, vector<512x256xbf16>, vector<8x256xf32> -> vector<8x256xf32>
    %48 = vector.broadcast %4 : vector<1x256xf32> to vector<8x256xf32>
    %49 = arith.addf %47, %48 : vector<8x256xf32>
    %cst_30 = arith.constant 0.000000e+00 : f32
    %50 = vector.broadcast %cst_30 : f32 to vector<8x256xf32>
    %51 = arith.maximumf %49, %50 : vector<8x256xf32>
    %52 = arith.truncf %51 : vector<8x256xf32> to vector<8x256xbf16>
    %c0_31 = arith.constant 0 : index
    %c0_32 = arith.constant 0 : index
    %53 = vector.load %arg8[%c0_31, %c0_32] : memref<256x64xbf16, #tpu.memory_space<vmem>>, vector<256x64xbf16>
    %cst_33 = arith.constant dense<0.000000e+00> : vector<8x64xf32>
    %54 = tpu.matmul %52, %53, %cst_33 {dimension_numbers = #tpu.dot_dimension_numbers<[1], [0], [0], [1], [0, 0, 1, 1], [], []>} : vector<8x256xbf16>, vector<256x64xbf16>, vector<8x64xf32> -> vector<8x64xf32>
    %55 = vector.broadcast %5 : vector<1x64xf32> to vector<8x64xf32>
    %56 = arith.addf %54, %55 : vector<8x64xf32>
    %cst_34 = arith.constant 0.000000e+00 : f32
    %57 = vector.broadcast %cst_34 : f32 to vector<8x64xf32>
    %58 = arith.maximumf %56, %57 : vector<8x64xf32>
    %59 = arith.truncf %58 : vector<8x64xf32> to vector<8x64xbf16>
    %c0_35 = arith.constant 0 : index
    %c0_36 = arith.constant 0 : index
    %60 = vector.load %arg9[%c0_35, %c0_36] : memref<64x3xbf16, #tpu.memory_space<vmem>>, vector<64x3xbf16>
    %cst_37 = arith.constant dense<0.000000e+00> : vector<8x3xf32>
    %61 = tpu.matmul %59, %60, %cst_37 {dimension_numbers = #tpu.dot_dimension_numbers<[1], [0], [0], [1], [0, 0, 1, 1], [], []>} : vector<8x64xbf16>, vector<64x3xbf16>, vector<8x3xf32> -> vector<8x3xf32>
    %62 = vector.broadcast %6 : vector<1x3xf32> to vector<8x3xf32>
    %63 = arith.addf %61, %62 : vector<8x3xf32>
    %c0_38 = arith.constant 0 : index
    %c0_39 = arith.constant 0 : index
    %64 = vector.load %arg11[%c0_38, %c0_39] : memref<8x3xf32, #tpu.memory_space<vmem>>, vector<8x3xf32>
    tpu.vector_store %arg11[%c0_38, %c0_39], %63 {strides = array<i32>} : memref<8x3xf32, #tpu.memory_space<vmem>>, vector<8x3xf32>,
    return
  }
  func.func @transform_0(%arg0: i32) -> (i32, i32) {
    %c0_i32 = arith.constant 0 : i32
    %c0_i32_0 = arith.constant 0 : i32
    return %arg0, %c0_i32 : i32, i32
  }
  func.func @transform_1(%arg0: i32) -> (i32, i32) {
    %c0_i32 = arith.constant 0 : i32
    %c0_i32_0 = arith.constant 0 : i32
    return %arg0, %c0_i32 : i32, i32
  }
  func.func @transform_2(%arg0: i32) -> (i32, i32) {
    %c0_i32 = arith.constant 0 : i32
    %c0_i32_0 = arith.constant 0 : i32
    return %arg0, %c0_i32 : i32, i32
  }
  func.func @transform_3(%arg0: i32) -> (i32, i32) {
    %c0_i32 = arith.constant 0 : i32
    %c0_i32_0 = arith.constant 0 : i32
    %c0_i32_1 = arith.constant 0 : i32
    return %c0_i32, %c0_i32_0 : i32, i32
  }
  func.func @transform_4(%arg0: i32) -> (i32, i32) {
    %c0_i32 = arith.constant 0 : i32
    %c0_i32_0 = arith.constant 0 : i32
    %c0_i32_1 = arith.constant 0 : i32
    return %c0_i32, %c0_i32_0 : i32, i32
  }
  func.func @transform_5(%arg0: i32) -> (i32, i32) {
    %c0_i32 = arith.constant 0 : i32
    %c0_i32_0 = arith.constant 0 : i32
    %c0_i32_1 = arith.constant 0 : i32
    return %c0_i32, %c0_i32_0 : i32, i32
  }
  func.func @transform_6(%arg0: i32) -> (i32, i32) {
    %c0_i32 = arith.constant 0 : i32
    %c0_i32_0 = arith.constant 0 : i32
    %c0_i32_1 = arith.constant 0 : i32
    return %c0_i32, %c0_i32_0 : i32, i32
  }
  func.func @transform_7(%arg0: i32) -> (i32, i32) {
    %c0_i32 = arith.constant 0 : i32
    %c0_i32_0 = arith.constant 0 : i32
    %c0_i32_1 = arith.constant 0 : i32
    return %c0_i32, %c0_i32_0 : i32, i32
  }
  func.func @transform_8(%arg0: i32) -> (i32, i32) {
    %c0_i32 = arith.constant 0 : i32
    %c0_i32_0 = arith.constant 0 : i32
    %c0_i32_1 = arith.constant 0 : i32
    return %c0_i32, %c0_i32_0 : i32, i32
  }
  func.func @transform_9(%arg0: i32) -> (i32, i32) {
    %c0_i32 = arith.constant 0 : i32
    %c0_i32_0 = arith.constant 0 : i32
    %c0_i32_1 = arith.constant 0 : i32
    return %c0_i32, %c0_i32_0 : i32, i32
  }
  func.func @transform_10(%arg0: i32) -> (i32, i32) {
    %c0_i32 = arith.constant 0 : i32
    %c0_i32_0 = arith.constant 0 : i32
    return %arg0, %c0_i32 : i32, i32
  }
}

</mosaic_0001>

<bundles_post_ra>
// kernel: tpu_custom_call.1
= control target key start
LH: loop header
LB: loop body
LE: loop exit
PB: predicated region body
PF: predicated region fallthrough
CT: control target
= control target key end

     0   :  { %15 = vsyncpa [#allocation3], 0  ;;  %s6896_s0 = inlined_call_operand.vmem [shape: f32[8,512], index: 0, kind: input, shape index: {}]   ;;  %s6897_s1 = inlined_call_operand.vmem [shape: f32[8,512], index: 1, kind: input, shape index: {}]   ;;  %s6898_s2 = inlined_call_operand.vmem [shape: f32[8,256], index: 2, kind: input, shape index: {}]   ;;  %s6899_s3 = inlined_call_operand.hbm [shape: bf16[512,512], index: 3, kind: input, shape index: {}]   ;;  %s6900_s4 = inlined_call_operand.hbm [shape: bf16[512,1024], index: 4, kind: input, shape index: {}]   ;;  %s6901_s5 = inlined_call_operand.hbm [shape: bf16[768,512], index: 5, kind: input, shape index: {}]   ;;  %s6902_s6 = inlined_call_operand.hbm [shape: bf16[512,256], index: 6, kind: input, shape index: {}]   ;;  %s6903_s7 = inlined_call_operand.vmem [shape: bf16[256,64], index: 7, kind: input, shape index: {}]   ;;  %s6904_s8 = inlined_call_operand.vmem [shape: bf16[64,3], index: 8, kind: input, shape index: {}]   ;;  %s6905_s9 = inlined_call_operand.vmem [shape: f32[1,2560], index: 9, kind: input, shape index: {}]   ;;  %s6906_s10 = inlined_call_operand.vmem [shape: f32[8,3], index: 10, kind: output, shape index: {}]  }
   0x1   :  { %16 = vsyncpa [#allocation5], 0 }
   0x2   :  { %17 = vsyncpa [#allocation8], 0  ;;  %s6588_s13 = smov [#allocation4]  }
   0x3   :  { %s41_s14 = sshll.u32 %s6588_s13, 4  ;;  %s42_s14 = int_to_ptr.vmem [resolvable:$true] %s41_s14 }
   0x4   :  { %s6510_s15 = scalar_lea.vmem %s42_s14, 32768  ;;  %p6515_p1 = scmp.lt.s32.totalorder %s42_s14, %s42_s14 }
   0x5   :  { %p6511_p0 = scmp.ne.s32.totalorder %s42_s14, %s6510_s15  ;;  %p6516_p2 = scmp.lt.s32.totalorder %s6510_s15, %s6510_s15 }
   0x7   :  { %p6517_p3 = por %p6516_p2, %p6515_p1 }
   0x9   :  { %p6518_p4 = pnand %p6517_p3, %p6511_p0 }
   0xb   :  { %6521 = shalt.err (!%p6518_p4)
}
   0xc   :  { %s6589_s16 = smov 512   ;;  %s6590_s17 = smov 32  }
   0xd   :  { %47 = dma.hbm_to_vmem [thread:$0]  %s6900_s4, 32768, %s42_s14, [#allocation5], %s6589_s16, %s6589_s16, %s6590_s17  }
   0xe   :  { %s6591_s20 = smov [#allocation2]  }
   0xf   :  { %s29_s21 = sshll.u32 %s6591_s20, 4  ;;  %s30_s21 = int_to_ptr.vmem [resolvable:$true] %s29_s21 }
  0x10   :  { %s6530_s22 = scalar_lea.vmem %s30_s21, 16384  ;;  %p6535_p6 = scmp.lt.s32.totalorder %s30_s21, %s30_s21 }
  0x11   :  { %p6531_p5 = scmp.ne.s32.totalorder %s30_s21, %s6530_s22  ;;  %p6536_p7 = scmp.lt.s32.totalorder %s6530_s22, %s6530_s22 }
  0x13   :  { %p6537_p8 = por %p6536_p7, %p6535_p6 }
  0x15   :  { %p6538_p9 = pnand %p6537_p8, %p6531_p5 }
  0x17   :  { %6541 = shalt.err (!%p6538_p9)
}
  0x18   :  { %s6592_s23 = smov 256   ;;  %s6593_s24 = smov 16  }
  0x19   :  { %35 = dma.hbm_to_vmem [thread:$0]  %s6899_s3, 16384, %s30_s21, [#allocation3], %s6592_s23, %s6592_s23, %s6593_s24  }
  0x1a   :  { %s6594_s27 = smov [#allocation6]   ;;  %s6595_s29 = smov [#allocation7]  }
  0x1b   :  { %s53_s28 = sshll.u32 %s6594_s27, 4  ;;  %s65_s4 = sshll.u32 %s6595_s29, 4  ;;  %s54_s28 = int_to_ptr.vmem [resolvable:$true] %s53_s28  ;;  %s66_s4 = int_to_ptr.vmem [resolvable:$true] %s65_s4 }
  0x1c   :  { %s6550_s30 = scalar_lea.vmem %s54_s28, 24576  ;;  %p6555_p11 = scmp.lt.s32.totalorder %s54_s28, %s54_s28 }
  0x1d   :  { %p6551_p10 = scmp.ne.s32.totalorder %s54_s28, %s6550_s30  ;;  %p6556_p12 = scmp.lt.s32.totalorder %s6550_s30, %s6550_s30 }
  0x1f   :  { %p6557_p13 = por %p6556_p12, %p6555_p11 }
  0x21   :  { %p6558_p0 = pnand %p6557_p13, %p6551_p10 }
  0x23   :  { %6561 = shalt.err (!%p6558_p0)
}
  0x24   :  { %59 = dma.hbm_to_vmem [thread:$0]  %s6901_s5, 24576, %s54_s28, [#allocation5], %s6592_s23, %s6592_s23, %s6593_s24  }
  0x25   :  { %s6570_s13 = scalar_lea.vmem %s66_s4, 8192  ;;  %p6575_p2 = scmp.lt.s32.totalorder %s66_s4, %s66_s4 }
  0x26   :  { %p6571_p1 = scmp.ne.s32.totalorder %s66_s4, %s6570_s13  ;;  %p6576_p3 = scmp.lt.s32.totalorder %s6570_s13, %s6570_s13 }
  0x28   :  { %p6577_p4 = por %p6576_p3, %p6575_p2 }
  0x2a   :  { %p6578_p5 = pnand %p6577_p4, %p6571_p1 }
  0x2c   :  { %6581 = shalt.err (!%p6578_p5)
}
  0x2d   :  { %s6596_s3 = smov 128   ;;  %s6597_s14 = smov 8  }
  0x2e   :  { %71 = dma.hbm_to_vmem [thread:$0]  %s6902_s6, 8192, %s66_s4, [#allocation8], %s6596_s3, %s6596_s3, %s6597_s14  }
  0x2f   :  { %6582 = dma.done.wait [#allocation3], 16384  }
  0x30   :  { %6583 = vsyncadd [#allocation3], 4294950912 }
  0x31   :  { %6584 = dma.done.wait [#allocation5], 57344  }
  0x32   :  { %6585 = vsyncadd [#allocation5], 4294909952 }
  0x33   :  { %6586 = dma.done.wait [#allocation8], 8192  }
  0x34   :  { %6587 = vsyncadd [#allocation8], 4294959104  ;;  %v5902_v0 = vld [vmem:[#allocation2 + $0xe4] ss:$16 sps:$4 sm:$0xff]   ;;  %v5906_v2 = vld [vmem:[#allocation2 + $0xe0] ss:$16 sps:$4 sm:$0xff]  }
  0x35   :  { %v5904_v1 = vld [vmem:[#allocation2 + $0x2e4] ss:$16 sps:$4 sm:$0xff]   ;;  %907 = vmatprep.subr.bf16.mxu0 %v5902_v0  ;;  %v5907_v3 = vld [vmem:[#allocation2 + $0x2e0] ss:$16 sps:$4 sm:$0xff]   ;;  %v99_v46 = vld [vmem:[%s6896_s0 + $0x8] sm:$0xff]  ;;  %vm6599_vm0 = vmmov 0  }
  0x36   :  { %948 = vmatprep.subr.bf16.mxu1 %v5904_v1  ;;  %v5908_v4 = vld [vmem:[#allocation2 + $0xc4] ss:$16 sps:$4 sm:$0xff]   ;;  %908 = vmatpush1.bf16.msra.mxu0 %v5906_v2  ;;  %v5912_v6 = vld [vmem:[#allocation2 + $0xc0] ss:$16 sps:$4 sm:$0xff]   ;;  %v6670_v49 = vpack.c.bf16 %v99_v46, %v99_v46  ;;  %v101_v50 = vld [vmem:[%s6896_s0 + $0x18] sm:$0xff]  ;;  %vm5134_vm1 = vcmask 523264  }
  0x37   :  { %949 = vmatpush1.bf16.msra.mxu1 %v5907_v3  ;;  %v5910_v5 = vld [vmem:[#allocation2 + $0x2c4] ss:$16 sps:$4 sm:$0xff]   ;;  %909 = vmatprep.subr.bf16.mxu0 %v5908_v4  ;;  %v5913_v7 = vld [vmem:[#allocation2 + $0x2c0] ss:$16 sps:$4 sm:$0xff]   ;;  %v105_v52 = vpack.c.bf16 %v101_v50, %v101_v50  ;;  %v6052_v46 = vld [vmem:[#allocation2 + $0x1c8] ss:$16 sps:$4 sm:$0xff]  }
  0x38   :  { %950 = vmatprep.subr.bf16.mxu1 %v5910_v5  ;;  %v5914_v8 = vld [vmem:[#allocation2 + $0xa4] ss:$16 sps:$4 sm:$0xff]   ;;  %v5918_v10 = vld [vmem:[#allocation2 + $0xa0] ss:$16 sps:$4 sm:$0xff]   ;;  %939 = vmatprep.mubr.bf16.mxu0 %v6670_v49  ;;  %v6058_v50 = vld [vmem:[#allocation2 + $0x1a8] ss:$16 sps:$4 sm:$0xff]  }
  0x39   :  { %v5916_v9 = vld [vmem:[#allocation2 + $0x2a4] ss:$16 sps:$4 sm:$0xff]   ;;  %v5919_v11 = vld [vmem:[#allocation2 + $0x2a0] ss:$16 sps:$4 sm:$0xff]   ;;  %980 = vmatprep.mubr.bf16.mxu1 %v105_v52  ;;  %vm5178_vm2 = vcmask 23552  }
  0x3a   :  { %910 = vmatpush1.bf16.msra.mxu0 %v5912_v6  ;;  %v5920_v12 = vld [vmem:[#allocation2 + $0x84] ss:$16 sps:$4 sm:$0xff]   ;;  %v5924_v14 = vld [vmem:[#allocation2 + $0x80] ss:$16 sps:$4 sm:$0xff]   ;;  %v6000_v6 = vld [vmem:[#allocation2 + $0xec] ss:$16 sps:$4 sm:$0xff]  }
  0x3b   :  { %951 = vmatpush1.bf16.msra.mxu1 %v5913_v7  ;;  %911 = vmatprep.subr.bf16.mxu0 %v5914_v8  ;;  %v5922_v13 = vld [vmem:[#allocation2 + $0x284] ss:$16 sps:$4 sm:$0xff]   ;;  %v5925_v15 = vld [vmem:[#allocation2 + $0x280] ss:$16 sps:$4 sm:$0xff]   ;;  %v6003_v7 = vld [vmem:[#allocation2 + $0x2ec] ss:$16 sps:$4 sm:$0xff]  }
  0x3c   :  { %952 = vmatprep.subr.bf16.mxu1 %v5916_v9  ;;  %v5926_v16 = vld [vmem:[#allocation2 + $0x64] ss:$16 sps:$4 sm:$0xff]   ;;  %v5930_v18 = vld [vmem:[#allocation2 + $0x60] ss:$16 sps:$4 sm:$0xff]  }
  0x3d   :  { %v5928_v17 = vld [vmem:[#allocation2 + $0x264] ss:$16 sps:$4 sm:$0xff]   ;;  %v5931_v19 = vld [vmem:[#allocation2 + $0x260] ss:$16 sps:$4 sm:$0xff]  }
  0x3e   :  { %912 = vmatpush1.bf16.msra.mxu0 %v5918_v10  ;;  %v5932_v20 = vld [vmem:[#allocation2 + $0x44] ss:$16 sps:$4 sm:$0xff]   ;;  %v5936_v22 = vld [vmem:[#allocation2 + $0x40] ss:$16 sps:$4 sm:$0xff]   ;;  %v5998_v10 = vld [vmem:[#allocation2 + $0xe8] ss:$16 sps:$4 sm:$0xff]  }
  0x3f   :  { %953 = vmatpush1.bf16.msra.mxu1 %v5919_v11  ;;  %913 = vmatprep.subr.bf16.mxu0 %v5920_v12  ;;  %v5934_v21 = vld [vmem:[#allocation2 + $0x244] ss:$16 sps:$4 sm:$0xff]   ;;  %v5937_v23 = vld [vmem:[#allocation2 + $0x240] ss:$16 sps:$4 sm:$0xff]   ;;  %v6001_v11 = vld [vmem:[#allocation2 + $0x2e8] ss:$16 sps:$4 sm:$0xff]  }
  0x40   :  { %954 = vmatprep.subr.bf16.mxu1 %v5922_v13  ;;  %v5938_v24 = vld [vmem:[#allocation2 + $0x24] ss:$16 sps:$4 sm:$0xff]   ;;  %v5942_v26 = vld [vmem:[#allocation2 + $0x20] ss:$16 sps:$4 sm:$0xff]   ;;  %v6006_v12 = vld [vmem:[#allocation2 + $0xcc] ss:$16 sps:$4 sm:$0xff]  }
  0x41   :  { %v5940_v25 = vld [vmem:[#allocation2 + $0x224] ss:$16 sps:$4 sm:$0xff]   ;;  %v5943_v27 = vld [vmem:[#allocation2 + $0x220] ss:$16 sps:$4 sm:$0xff]   ;;  %v6009_v13 = vld [vmem:[#allocation2 + $0x2cc] ss:$16 sps:$4 sm:$0xff]  }
  0x42   :  { %914 = vmatpush1.bf16.msra.mxu0 %v5924_v14  ;;  %v5944_v28 = vld [vmem:[#allocation2 + $0x4] ss:$16 sps:$4 sm:$0xff]   ;;  %v5948_v30 = vld [vmem:[#allocation2] ss:$16 sps:$4 sm:$0xff]   ;;  %v6004_v14 = vld [vmem:[#allocation2 + $0xc8] ss:$16 sps:$4 sm:$0xff]  }
  0x43   :  { %955 = vmatpush1.bf16.msra.mxu1 %v5925_v15  ;;  %915 = vmatprep.subr.bf16.mxu0 %v5926_v16  ;;  %v5946_v29 = vld [vmem:[#allocation2 + $0x204] ss:$16 sps:$4 sm:$0xff]   ;;  %v5949_v31 = vld [vmem:[#allocation2 + $0x200] ss:$16 sps:$4 sm:$0xff]   ;;  %v6007_v15 = vld [vmem:[#allocation2 + $0x2c8] ss:$16 sps:$4 sm:$0xff]  }
  0x44   :  { %956 = vmatprep.subr.bf16.mxu1 %v5928_v17  ;;  %v5950_v32 = vld [vmem:[#allocation2 + $0x1e4] ss:$16 sps:$4 sm:$0xff]   ;;  %v5954_v34 = vld [vmem:[#allocation2 + $0x1e0] ss:$16 sps:$4 sm:$0xff]   ;;  %v6012_v16 = vld [vmem:[#allocation2 + $0xac] ss:$16 sps:$4 sm:$0xff]  }
  0x45   :  { %v5952_v33 = vld [vmem:[#allocation2 + $0x3e4] ss:$16 sps:$4 sm:$0xff]   ;;  %v5955_v35 = vld [vmem:[#allocation2 + $0x3e0] ss:$16 sps:$4 sm:$0xff]   ;;  %v6015_v17 = vld [vmem:[#allocation2 + $0x2ac] ss:$16 sps:$4 sm:$0xff]  }
  0x46   :  { %916 = vmatpush1.bf16.msra.mxu0 %v5930_v18  ;;  %v5956_v36 = vld [vmem:[#allocation2 + $0x1c4] ss:$16 sps:$4 sm:$0xff]   ;;  %v5960_v38 = vld [vmem:[#allocation2 + $0x1c0] ss:$16 sps:$4 sm:$0xff]   ;;  %v6010_v18 = vld [vmem:[#allocation2 + $0xa8] ss:$16 sps:$4 sm:$0xff]  }
  0x47   :  { %957 = vmatpush1.bf16.msra.mxu1 %v5931_v19  ;;  %917 = vmatprep.subr.bf16.mxu0 %v5932_v20  ;;  %v5958_v37 = vld [vmem:[#allocation2 + $0x3c4] ss:$16 sps:$4 sm:$0xff]   ;;  %v5961_v39 = vld [vmem:[#allocation2 + $0x3c0] ss:$16 sps:$4 sm:$0xff]   ;;  %v6013_v19 = vld [vmem:[#allocation2 + $0x2a8] ss:$16 sps:$4 sm:$0xff]  }
  0x48   :  { %958 = vmatprep.subr.bf16.mxu1 %v5934_v21  ;;  %v5962_v40 = vld [vmem:[#allocation2 + $0x1a4] ss:$16 sps:$4 sm:$0xff]   ;;  %v5966_v42 = vld [vmem:[#allocation2 + $0x1a0] ss:$16 sps:$4 sm:$0xff]   ;;  %v6018_v20 = vld [vmem:[#allocation2 + $0x8c] ss:$16 sps:$4 sm:$0xff]  }
  0x49   :  { %v5964_v41 = vld [vmem:[#allocation2 + $0x3a4] ss:$16 sps:$4 sm:$0xff]   ;;  %v5967_v43 = vld [vmem:[#allocation2 + $0x3a0] ss:$16 sps:$4 sm:$0xff]   ;;  %v6021_v21 = vld [vmem:[#allocation2 + $0x28c] ss:$16 sps:$4 sm:$0xff]  }
  0x4a   :  { %918 = vmatpush1.bf16.msra.mxu0 %v5936_v22  ;;  %v5968_v44 = vld [vmem:[#allocation2 + $0x184] ss:$16 sps:$4 sm:$0xff]   ;;  %v5972_v47 = vld [vmem:[#allocation2 + $0x180] ss:$16 sps:$4 sm:$0xff]   ;;  %v6016_v22 = vld [vmem:[#allocation2 + $0x88] ss:$16 sps:$4 sm:$0xff]  }
  0x4b   :  { %959 = vmatpush1.bf16.msra.mxu1 %v5937_v23  ;;  %919 = vmatprep.subr.bf16.mxu0 %v5938_v24  ;;  %v5970_v45 = vld [vmem:[#allocation2 + $0x384] ss:$16 sps:$4 sm:$0xff]   ;;  %v5973_v48 = vld [vmem:[#allocation2 + $0x380] ss:$16 sps:$4 sm:$0xff]   ;;  %v6019_v23 = vld [vmem:[#allocation2 + $0x288] ss:$16 sps:$4 sm:$0xff]  }
  0x4c   :  { %960 = vmatprep.subr.bf16.mxu1 %v5940_v25  ;;  %v5974_v51 = vld [vmem:[#allocation2 + $0x164] ss:$16 sps:$4 sm:$0xff]   ;;  %v5978_v54 = vld [vmem:[#allocation2 + $0x160] ss:$16 sps:$4 sm:$0xff]   ;;  %v6024_v24 = vld [vmem:[#allocation2 + $0x6c] ss:$16 sps:$4 sm:$0xff]  }
  0x4d   :  { %v5976_v53 = vld [vmem:[#allocation2 + $0x364] ss:$16 sps:$4 sm:$0xff]   ;;  %v5979_v55 = vld [vmem:[#allocation2 + $0x360] ss:$16 sps:$4 sm:$0xff]   ;;  %v6027_v25 = vld [vmem:[#allocation2 + $0x26c] ss:$16 sps:$4 sm:$0xff]  }
  0x4e   :  { %920 = vmatpush1.bf16.msra.mxu0 %v5942_v26  ;;  %v5980_v56 = vld [vmem:[#allocation2 + $0x144] ss:$16 sps:$4 sm:$0xff]   ;;  %v5984_v58 = vld [vmem:[#allocation2 + $0x140] ss:$16 sps:$4 sm:$0xff]   ;;  %v6022_v26 = vld [vmem:[#allocation2 + $0x68] ss:$16 sps:$4 sm:$0xff]  }
  0x4f   :  { %961 = vmatpush1.bf16.msra.mxu1 %v5943_v27  ;;  %921 = vmatprep.subr.bf16.mxu0 %v5944_v28  ;;  %v5982_v57 = vld [vmem:[#allocation2 + $0x344] ss:$16 sps:$4 sm:$0xff]   ;;  %v5985_v59 = vld [vmem:[#allocation2 + $0x340] ss:$16 sps:$4 sm:$0xff]   ;;  %v6025_v27 = vld [vmem:[#allocation2 + $0x268] ss:$16 sps:$4 sm:$0xff]  }
  0x50   :  { %962 = vmatprep.subr.bf16.mxu1 %v5946_v29  ;;  %v5986_v60 = vld [vmem:[#allocation2 + $0x124] ss:$16 sps:$4 sm:$0xff]   ;;  %v5990_v62 = vld [vmem:[#allocation2 + $0x120] ss:$16 sps:$4 sm:$0xff]   ;;  %v6030_v28 = vld [vmem:[#allocation2 + $0x4c] ss:$16 sps:$4 sm:$0xff]  }
  0x51   :  { %v5988_v61 = vld [vmem:[#allocation2 + $0x324] ss:$16 sps:$4 sm:$0xff]   ;;  %v5991_v63 = vld [vmem:[#allocation2 + $0x320] ss:$16 sps:$4 sm:$0xff]   ;;  %v6033_v29 = vld [vmem:[#allocation2 + $0x24c] ss:$16 sps:$4 sm:$0xff]  }
  0x52   :  { %922 = vmatpush1.bf16.msra.mxu0 %v5948_v30  ;;  %v5992_v0 = vld [vmem:[#allocation2 + $0x104] ss:$16 sps:$4 sm:$0xff]   ;;  %v5996_v2 = vld [vmem:[#allocation2 + $0x100] ss:$16 sps:$4 sm:$0xff]   ;;  %v6028_v30 = vld [vmem:[#allocation2 + $0x48] ss:$16 sps:$4 sm:$0xff]  }
  0x53   :  { %963 = vmatpush1.bf16.msra.mxu1 %v5949_v31  ;;  %923 = vmatprep.subr.bf16.mxu0 %v5950_v32  ;;  %v5994_v1 = vld [vmem:[#allocation2 + $0x304] ss:$16 sps:$4 sm:$0xff]   ;;  %v5997_v3 = vld [vmem:[#allocation2 + $0x300] ss:$16 sps:$4 sm:$0xff]   ;;  %v6031_v31 = vld [vmem:[#allocation2 + $0x248] ss:$16 sps:$4 sm:$0xff]  }
  0x54   :  { %964 = vmatprep.subr.bf16.mxu1 %v5952_v33  ;;  %v98_v4 = vld [vmem:[%s6896_s0] sm:$0xff]  ;;  %v100_v5 = vld [vmem:[%s6896_s0 + $0x10] sm:$0xff]  ;;  %v6036_v32 = vld [vmem:[#allocation2 + $0x2c] ss:$16 sps:$4 sm:$0xff]  }
  0x55   :  { %v6682_v8 = vpack.c.bf16 %v98_v4, %v98_v4  ;;  %v6684_v9 = vpack.c.bf16 %v100_v5, %v100_v5  ;;  %v6039_v33 = vld [vmem:[#allocation2 + $0x22c] ss:$16 sps:$4 sm:$0xff]  }
  0x56   :  { %924 = vmatpush2.bf16.msra.mxu0 %v5954_v34  ;;  %v6034_v34 = vld [vmem:[#allocation2 + $0x28] ss:$16 sps:$4 sm:$0xff]   ;;  %v6090_v4 = vld [vmem:[#allocation2 + $0x10c] ss:$16 sps:$4 sm:$0xff]  }
  0x57   :  { %965 = vmatpush2.bf16.msra.mxu1 %v5955_v35  ;;  %925 = vmatprep.subr.bf16.mxu0 %v5956_v36  ;;  %v6037_v35 = vld [vmem:[#allocation2 + $0x228] ss:$16 sps:$4 sm:$0xff]   ;;  %v6042_v36 = vld [vmem:[#allocation2 + $0xc] ss:$16 sps:$4 sm:$0xff]  }
  0x58   :  { %966 = vmatprep.subr.bf16.mxu1 %v5958_v37  ;;  %v6045_v37 = vld [vmem:[#allocation2 + $0x20c] ss:$16 sps:$4 sm:$0xff]  }
  0x59   :  { %v6093_v5 = vld [vmem:[#allocation2 + $0x30c] ss:$16 sps:$4 sm:$0xff]  }
  0x5a   :  { %926 = vmatpush2.bf16.msra.mxu0 %v5960_v38  ;;  %v6040_v38 = vld [vmem:[#allocation2 + $0x8] ss:$16 sps:$4 sm:$0xff]  }
  0x5b   :  { %967 = vmatpush2.bf16.msra.mxu1 %v5961_v39  ;;  %927 = vmatprep.subr.bf16.mxu0 %v5962_v40  ;;  %v6043_v39 = vld [vmem:[#allocation2 + $0x208] ss:$16 sps:$4 sm:$0xff]   ;;  %v6048_v40 = vld [vmem:[#allocation2 + $0x1ec] ss:$16 sps:$4 sm:$0xff]  }
  0x5c   :  { %968 = vmatprep.subr.bf16.mxu1 %v5964_v41  ;;  %v6051_v41 = vld [vmem:[#allocation2 + $0x3ec] ss:$16 sps:$4 sm:$0xff]  }
  0x5e   :  { %928 = vmatpush2.bf16.msra.mxu0 %v5966_v42  ;;  %v6046_v42 = vld [vmem:[#allocation2 + $0x1e8] ss:$16 sps:$4 sm:$0xff]  }
  0x5f   :  { %969 = vmatpush2.bf16.msra.mxu1 %v5967_v43  ;;  %929 = vmatprep.subr.bf16.mxu0 %v5968_v44  ;;  %v6049_v43 = vld [vmem:[#allocation2 + $0x3e8] ss:$16 sps:$4 sm:$0xff]   ;;  %v6054_v44 = vld [vmem:[#allocation2 + $0x1cc] ss:$16 sps:$4 sm:$0xff]  }
  0x60   :  { %970 = vmatprep.subr.bf16.mxu1 %v5970_v45  ;;  %v6057_v45 = vld [vmem:[#allocation2 + $0x3cc] ss:$16 sps:$4 sm:$0xff]  }
  0x62   :  { %930 = vmatpush2.bf16.msra.mxu0 %v5972_v47  ;;  %v6055_v47 = vld [vmem:[#allocation2 + $0x3c8] ss:$16 sps:$4 sm:$0xff]  }
  0x63   :  { %971 = vmatpush2.bf16.msra.mxu1 %v5973_v48  ;;  %931 = vmatprep.subr.bf16.mxu0 %v5974_v51  ;;  %v6060_v48 = vld [vmem:[#allocation2 + $0x1ac] ss:$16 sps:$4 sm:$0xff]   ;;  %v6061_v51 = vld [vmem:[#allocation2 + $0x3a8] ss:$16 sps:$4 sm:$0xff]  }
  0x64   :  { %972 = vmatprep.subr.bf16.mxu1 %v5976_v53  ;;  %v6069_v53 = vld [vmem:[#allocation2 + $0x38c] ss:$16 sps:$4 sm:$0xff]  }
  0x66   :  { %932 = vmatpush2.bf16.msra.mxu0 %v5978_v54  ;;  %v6064_v54 = vld [vmem:[#allocation2 + $0x188] ss:$16 sps:$4 sm:$0xff]  }
  0x67   :  { %973 = vmatpush2.bf16.msra.mxu1 %v5979_v55  ;;  %933 = vmatprep.subr.bf16.mxu0 %v5980_v56  ;;  %v6067_v55 = vld [vmem:[#allocation2 + $0x388] ss:$16 sps:$4 sm:$0xff]   ;;  %v6072_v56 = vld [vmem:[#allocation2 + $0x16c] ss:$16 sps:$4 sm:$0xff]  }
  0x68   :  { %974 = vmatprep.subr.bf16.mxu1 %v5982_v57  ;;  %v6075_v57 = vld [vmem:[#allocation2 + $0x36c] ss:$16 sps:$4 sm:$0xff]  }
  0x6a   :  { %934 = vmatpush2.bf16.msra.mxu0 %v5984_v58  ;;  %v6070_v58 = vld [vmem:[#allocation2 + $0x168] ss:$16 sps:$4 sm:$0xff]  }
  0x6b   :  { %975 = vmatpush2.bf16.msra.mxu1 %v5985_v59  ;;  %935 = vmatprep.subr.bf16.mxu0 %v5986_v60  ;;  %v6073_v59 = vld [vmem:[#allocation2 + $0x368] ss:$16 sps:$4 sm:$0xff]   ;;  %v6078_v60 = vld [vmem:[#allocation2 + $0x14c] ss:$16 sps:$4 sm:$0xff]  }
  0x6c   :  { %976 = vmatprep.subr.bf16.mxu1 %v5988_v61  ;;  %v6081_v61 = vld [vmem:[#allocation2 + $0x34c] ss:$16 sps:$4 sm:$0xff]  }
  0x6e   :  { %936 = vmatpush2.bf16.msra.mxu0 %v5990_v62  ;;  %v6076_v62 = vld [vmem:[#allocation2 + $0x148] ss:$16 sps:$4 sm:$0xff]  }
  0x6f   :  { %977 = vmatpush2.bf16.msra.mxu1 %v5991_v63  ;;  %937 = vmatprep.subr.bf16.mxu0 %v5992_v0  ;;  %v6079_v63 = vld [vmem:[#allocation2 + $0x348] ss:$16 sps:$4 sm:$0xff]   ;;  %v6084_v0 = vld [vmem:[#allocation2 + $0x12c] ss:$16 sps:$4 sm:$0xff]  }
  0x70   :  { %978 = vmatprep.subr.bf16.mxu1 %v5994_v1  ;;  %v6087_v1 = vld [vmem:[#allocation2 + $0x32c] ss:$16 sps:$4 sm:$0xff]  }
  0x72   :  { %938 = vmatpush2.bf16.msra.mxu0 %v5996_v2  ;;  %v6082_v2 = vld [vmem:[#allocation2 + $0x128] ss:$16 sps:$4 sm:$0xff]  }
  0x73   :  { %979 = vmatpush2.bf16.msra.mxu1 %v5997_v3  ;;  %989 = vmatprep.subr.bf16.mxu0 %v6000_v6  ;;  %v6085_v3 = vld [vmem:[#allocation2 + $0x328] ss:$16 sps:$4 sm:$0xff]   ;;  %v1127_v6 = vld [vmem:[#allocation4 + $0x1c0] sm:$0xff] }
  0x74   :  { %1030 = vmatprep.subr.bf16.mxu1 %v6003_v7  ;;  %v1131_v7 = vld [vmem:[#allocation4 + $0x1e0] sm:$0xff] }
  0x75   :  { %940 = vmatmul.mubr.bf16.vlgmr.msra.gmra.mxu0 %v6682_v8 }
  0x76   :  { %981 = vmatmul.mubr.bf16.vlgmr.msra.gmra.mxu1 %v6684_v9  ;;  %990 = vmatpush1.bf16.msra.mxu0 %v5998_v10  ;;  %v1255_v10 = vld [vmem:[#allocation4 + $0x5c0] sm:$0xff] }
  0x77   :  { %1031 = vmatpush1.bf16.msra.mxu1 %v6001_v11  ;;  %991 = vmatprep.subr.bf16.mxu0 %v6006_v12  ;;  %v1259_v11 = vld [vmem:[#allocation4 + $0x5e0] sm:$0xff]  ;;  %v6088_v12 = vld [vmem:[#allocation2 + $0x108] ss:$16 sps:$4 sm:$0xff]  }
  0x78   :  { %1032 = vmatprep.subr.bf16.mxu1 %v6009_v13  ;;  %1021 = vmatprep.mubr.bf16.mxu0 %v6670_v49  ;;  %v6063_v49 = vld [vmem:[#allocation2 + $0x3ac] ss:$16 sps:$4 sm:$0xff]   ;;  %v6091_v13 = vld [vmem:[#allocation2 + $0x308] ss:$16 sps:$4 sm:$0xff]  }
  0x79   :  { %1062 = vmatprep.mubr.bf16.mxu1 %v105_v52  ;;  %v6066_v52 = vld [vmem:[#allocation2 + $0x18c] ss:$16 sps:$4 sm:$0xff]  }
  0x7a   :  { %992 = vmatpush1.bf16.msra.mxu0 %v6004_v14  ;;  %v5372_v14 = vcombine.high %v1127_v6, %v1131_v7 }
  0x7b   :  { %1033 = vmatpush1.bf16.msra.mxu1 %v6007_v15  ;;  %993 = vmatprep.subr.bf16.mxu0 %v6012_v16  ;;  %v5500_v15 = vcombine.high %v1255_v10, %v1259_v11  ;;  %v1119_v16 = vld [vmem:[#allocation4 + $0x180] sm:$0xff] }
  0x7c   :  { %1034 = vmatprep.subr.bf16.mxu1 %v6015_v17  ;;  %v1123_v17 = vld [vmem:[#allocation4 + $0x1a0] sm:$0xff] }
  0x7e   :  { %994 = vmatpush1.bf16.msra.mxu0 %v6010_v18  ;;  %v1247_v18 = vld [vmem:[#allocation4 + $0x580] sm:$0xff] }
  0x7f   :  { %1035 = vmatpush1.bf16.msra.mxu1 %v6013_v19  ;;  %995 = vmatprep.subr.bf16.mxu0 %v6018_v20  ;;  %v1251_v19 = vld [vmem:[#allocation4 + $0x5a0] sm:$0xff]  ;;  %v107_v20 = vld [vmem:[%s6897_s1 + $0x8] sm:$0xff] }
  0x80   :  { %1036 = vmatprep.subr.bf16.mxu1 %v6021_v21  ;;  %v109_v21 = vld [vmem:[%s6897_s1 + $0x18] sm:$0xff] }
  0x82   :  { %996 = vmatpush1.bf16.msra.mxu0 %v6016_v22  ;;  %v5371_v22 = vcombine.low %v1127_v6, %v1131_v7 }
  0x83   :  { %1037 = vmatpush1.bf16.msra.mxu1 %v6019_v23  ;;  %997 = vmatprep.subr.bf16.mxu0 %v6024_v24  ;;  %v5499_v23 = vcombine.low %v1255_v10, %v1259_v11  ;;  %v5364_v24 = vcombine.high %v1119_v16, %v1123_v17  ;;  %v1191_v10 = vld [vmem:[#allocation4 + $0x3c0] sm:$0xff] }
  0x84   :  { %1038 = vmatprep.subr.bf16.mxu1 %v6027_v25  ;;  %v5492_v25 = vcombine.high %v1247_v18, %v1251_v19  ;;  %v1195_v11 = vld [vmem:[#allocation4 + $0x3e0] sm:$0xff] }
  0x86   :  { %998 = vmatpush1.bf16.msra.mxu0 %v6022_v26  ;;  %v1111_v26 = vld [vmem:[#allocation4 + $0x140] sm:$0xff] }
  0x87   :  { %1039 = vmatpush1.bf16.msra.mxu1 %v6025_v27  ;;  %999 = vmatprep.subr.bf16.mxu0 %v6030_v28  ;;  %v1115_v27 = vld [vmem:[#allocation4 + $0x160] sm:$0xff] }
  0x88   :  { %1040 = vmatprep.subr.bf16.mxu1 %v6033_v29  ;;  %v1239_v28 = vld [vmem:[#allocation4 + $0x540] sm:$0xff] }
  0x89   :  { %v1243_v29 = vld [vmem:[#allocation4 + $0x560] sm:$0xff] }
  0x8a   :  { %1000 = vmatpush1.bf16.msra.mxu0 %v6028_v30  ;;  %v6695_v30 = vpack.c.bf16 %v107_v20, %v107_v20  ;;  %v1311_v20 = vld [vmem:[#allocation4 + $0x780] sm:$0xff] }
  0x8b   :  { %1041 = vmatpush1.bf16.msra.mxu1 %v6031_v31  ;;  %1001 = vmatprep.subr.bf16.mxu0 %v6036_v32  ;;  %v6697_v31 = vpack.c.bf16 %v109_v21, %v109_v21  ;;  %v5363_v32 = vcombine.low %v1119_v16, %v1123_v17  ;;  %v1315_v21 = vld [vmem:[#allocation4 + $0x7a0] sm:$0xff] }
  0x8c   :  { %1042 = vmatprep.subr.bf16.mxu1 %v6039_v33  ;;  %v5491_v33 = vcombine.low %v1247_v18, %v1251_v19  ;;  %v1183_v18 = vld [vmem:[#allocation4 + $0x380] sm:$0xff] }
  0x8d   :  { %v1187_v19 = vld [vmem:[#allocation4 + $0x3a0] sm:$0xff] }
  0x8e   :  { %1002 = vmatpush1.bf16.msra.mxu0 %v6034_v34  ;;  %v1103_v34 = vld [vmem:[#allocation4 + $0x100] sm:$0xff] }
  0x8f   :  { %1043 = vmatpush1.bf16.msra.mxu1 %v6037_v35  ;;  %1003 = vmatprep.subr.bf16.mxu0 %v6042_v36  ;;  %v1107_v35 = vld [vmem:[#allocation4 + $0x120] sm:$0xff] }
  0x90   :  { %1044 = vmatprep.subr.bf16.mxu1 %v6045_v37  ;;  %v1231_v36 = vld [vmem:[#allocation4 + $0x500] sm:$0xff] }
  0x91   :  { %v1235_v37 = vld [vmem:[#allocation4 + $0x520] sm:$0xff] }
  0x92   :  { %1004 = vmatpush1.bf16.msra.mxu0 %v6040_v38  ;;  %v5356_v38 = vcombine.high %v1111_v26, %v1115_v27 }
  0x93   :  { %1045 = vmatpush1.bf16.msra.mxu1 %v6043_v39  ;;  %1005 = vmatprep.subr.bf16.mxu0 %v6048_v40  ;;  %v5484_v39 = vcombine.high %v1239_v28, %v1243_v29  ;;  %v5348_v40 = vcombine.high %v1103_v34, %v1107_v35 }
  0x94   :  { %1046 = vmatprep.subr.bf16.mxu1 %v6051_v41  ;;  %v5476_v41 = vcombine.high %v1231_v36, %v1235_v37 }
  0x96   :  { %1006 = vmatpush2.bf16.msra.mxu0 %v6046_v42  ;;  %v1095_v42 = vld [vmem:[#allocation4 + $0xc0] sm:$0xff] }
  0x97   :  { %1047 = vmatpush2.bf16.msra.mxu1 %v6049_v43  ;;  %1007 = vmatprep.subr.bf16.mxu0 %v6054_v44  ;;  %v1099_v43 = vld [vmem:[#allocation4 + $0xe0] sm:$0xff] }
  0x98   :  { %1048 = vmatprep.subr.bf16.mxu1 %v6057_v45  ;;  %v1223_v44 = vld [vmem:[#allocation4 + $0x4c0] sm:$0xff] }
  0x99   :  { %v1227_v45 = vld [vmem:[#allocation4 + $0x4e0] sm:$0xff] }
  0x9a   :  { %1008 = vmatpush2.bf16.msra.mxu0 %v6052_v46  ;;  %v5347_v46 = vcombine.low %v1103_v34, %v1107_v35  ;;  %v5427_v34 = vcombine.low %v1183_v18, %v1187_v19  ;;  %v5555_v35 = vcombine.low %v1311_v20, %v1315_v21 }
  0x9b   :  { %1049 = vmatpush2.bf16.msra.mxu1 %v6055_v47  ;;  %1009 = vmatprep.subr.bf16.mxu0 %v6060_v48  ;;  %v5475_v47 = vcombine.low %v1231_v36, %v1235_v37  ;;  %v5340_v48 = vcombine.high %v1095_v42, %v1099_v43  ;;  %v1167_v36 = vld [vmem:[#allocation4 + $0x300] sm:$0xff] }
  0x9c   :  { %1050 = vmatprep.subr.bf16.mxu1 %v6063_v49  ;;  %v5468_v49 = vcombine.high %v1223_v44, %v1227_v45  ;;  %v1171_v37 = vld [vmem:[#allocation4 + $0x320] sm:$0xff] }
  0x9e   :  { %1010 = vmatpush2.bf16.msra.mxu0 %v6058_v50  ;;  %v1087_v50 = vld [vmem:[#allocation4 + $0x80] sm:$0xff] }
  0x9f   :  { %1051 = vmatpush2.bf16.msra.mxu1 %v6061_v51  ;;  %1011 = vmatprep.subr.bf16.mxu0 %v6066_v52  ;;  %v1091_v51 = vld [vmem:[#allocation4 + $0xa0] sm:$0xff] }
  0xa0   :  { %1052 = vmatprep.subr.bf16.mxu1 %v6069_v53  ;;  %v1215_v52 = vld [vmem:[#allocation4 + $0x480] sm:$0xff] }
  0xa1   :  { %v1219_v53 = vld [vmem:[#allocation4 + $0x4a0] sm:$0xff] }
  0xa2   :  { %1012 = vmatpush2.bf16.msra.mxu0 %v6064_v54  ;;  %v5339_v54 = vcombine.low %v1095_v42, %v1099_v43  ;;  %v1159_v42 = vld [vmem:[#allocation4 + $0x2c0] sm:$0xff] }
  0xa3   :  { %1053 = vmatpush2.bf16.msra.mxu1 %v6067_v55  ;;  %1013 = vmatprep.subr.bf16.mxu0 %v6072_v56  ;;  %v5467_v55 = vcombine.low %v1223_v44, %v1227_v45  ;;  %v1079_v56 = vld [vmem:[#allocation4 + $0x40] sm:$0xff] }
  0xa4   :  { %1054 = vmatprep.subr.bf16.mxu1 %v6075_v57  ;;  %v1083_v57 = vld [vmem:[#allocation4 + $0x60] sm:$0xff] }
  0xa5   :  { %v5323_v6 = vcombine.low %v1079_v56, %v1083_v57  ;;  %v1163_v43 = vld [vmem:[#allocation4 + $0x2e0] sm:$0xff] }
  0xa6   :  { %1014 = vmatpush2.bf16.msra.mxu0 %v6070_v58  ;;  %v5332_v58 = vcombine.high %v1087_v50, %v1091_v51  ;;  %v1287_v44 = vld [vmem:[#allocation4 + $0x6c0] sm:$0xff] }
  0xa7   :  { %1055 = vmatpush2.bf16.msra.mxu1 %v6073_v59  ;;  %1015 = vmatprep.subr.bf16.mxu0 %v6078_v60  ;;  %v5460_v59 = vcombine.high %v1215_v52, %v1219_v53  ;;  %v1207_v60 = vld [vmem:[#allocation4 + $0x440] sm:$0xff] }
  0xa8   :  { %1056 = vmatprep.subr.bf16.mxu1 %v6081_v61  ;;  %v1211_v61 = vld [vmem:[#allocation4 + $0x460] sm:$0xff] }
  0xa9   :  { %v5451_v7 = vcombine.low %v1207_v60, %v1211_v61  ;;  %v1291_v45 = vld [vmem:[#allocation4 + $0x6e0] sm:$0xff] }
  0xaa   :  { %1016 = vmatpush2.bf16.msra.mxu0 %v6076_v62  ;;  %v5331_v62 = vcombine.low %v1087_v50, %v1091_v51  ;;  %v1151_v50 = vld [vmem:[#allocation4 + $0x280] sm:$0xff] }
  0xab   :  { %1057 = vmatpush2.bf16.msra.mxu1 %v6079_v63  ;;  %1017 = vmatprep.subr.bf16.mxu0 %v6084_v0  ;;  %v5459_v63 = vcombine.low %v1215_v52, %v1219_v53  ;;  %v1071_v0 = vld [vmem:[#allocation4] sm:$0xff] }
  0xac   :  { %1058 = vmatprep.subr.bf16.mxu1 %v6087_v1  ;;  %v1075_v1 = vld [vmem:[#allocation4 + $0x20] sm:$0xff] }
  0xad   :  { %v5315_v16 = vcombine.low %v1071_v0, %v1075_v1  ;;  %v1155_v51 = vld [vmem:[#allocation4 + $0x2a0] sm:$0xff] }
  0xae   :  { %1018 = vmatpush2.bf16.msra.mxu0 %v6082_v2  ;;  %v5324_v2 = vcombine.high %v1079_v56, %v1083_v57  ;;  %v1279_v52 = vld [vmem:[#allocation4 + $0x680] sm:$0xff]  ;;  %v5403_v56 = vcombine.low %v1159_v42, %v1163_v43  ;;  %v5531_v57 = vcombine.low %v1287_v44, %v1291_v45 }
  0xaf   :  { %1059 = vmatpush2.bf16.msra.mxu1 %v6085_v3  ;;  %1019 = vmatprep.subr.bf16.mxu0 %v6090_v4  ;;  %v5452_v3 = vcombine.high %v1207_v60, %v1211_v61  ;;  %v1199_v4 = vld [vmem:[#allocation4 + $0x400] sm:$0xff] }
  0xb0   :  { %1060 = vmatprep.subr.bf16.mxu1 %v6093_v5  ;;  %v1203_v5 = vld [vmem:[#allocation4 + $0x420] sm:$0xff] }
  0xb1   :  { %v5443_v17 = vcombine.low %v1199_v4, %v1203_v5  ;;  %v1283_v53 = vld [vmem:[#allocation4 + $0x6a0] sm:$0xff] }
  0xb2   :  { %1020 = vmatpush2.bf16.msra.mxu0 %v6088_v12  ;;  %v1319_v12 = vld [vmem:[#allocation4 + $0x7c0] sm:$0xff] }
  0xb3   :  { %1061 = vmatpush2.bf16.msra.mxu1 %v6091_v13  ;;  %2607 = vmatprep.subr.bf16.mxu0 %v5372_v14  ;;  %v1323_v13 = vld [vmem:[#allocation4 + $0x7e0] sm:$0xff]  ;;  %v5316_v14 = vcombine.high %v1071_v0, %v1075_v1  ;;  %v5395_v0 = vcombine.low %v1151_v50, %v1155_v51  ;;  %v5523_v1 = vcombine.low %v1279_v52, %v1283_v53 }
  0xb4   :  { %2648 = vmatprep.subr.bf16.mxu1 %v5500_v15  ;;  %v5444_v15 = vcombine.high %v1199_v4, %v1203_v5  ;;  %v1271_v60 = vld [vmem:[#allocation4 + $0x640] sm:$0xff] }
  0xb5   :  { %1022 = vmatmul.mubr.bf16.vlgmr.msra.gmra.mxu0 %v6682_v8  ;;  %v5355_v8 = vcombine.low %v1111_v26, %v1115_v27  ;;  %v1175_v26 = vld [vmem:[#allocation4 + $0x340] sm:$0xff] }
  0xb6   :  { %1063 = vmatmul.mubr.bf16.vlgmr.msra.gmra.mxu1 %v6684_v9  ;;  %2608 = vmatpush1.bf16.msra.mxu0 %v5371_v22  ;;  %v5483_v9 = vcombine.low %v1239_v28, %v1243_v29  ;;  %v5436_v22 = vcombine.high %v1191_v10, %v1195_v11  ;;  %v1179_v27 = vld [vmem:[#allocation4 + $0x360] sm:$0xff] }
  0xb7   :  { %2649 = vmatpush1.bf16.msra.mxu1 %v5499_v23  ;;  %2609 = vmatprep.subr.bf16.mxu0 %v5364_v24  ;;  %v5564_v23 = vcombine.high %v1319_v12, %v1323_v13  ;;  %v5435_v24 = vcombine.low %v1191_v10, %v1195_v11  ;;  %v1303_v28 = vld [vmem:[#allocation4 + $0x740] sm:$0xff] }
  0xb8   :  { %2650 = vmatprep.subr.bf16.mxu1 %v5492_v25  ;;  %2639 = vmatprep.mubr.bf16.mxu0 %v6695_v30  ;;  %v5563_v25 = vcombine.low %v1319_v12, %v1323_v13  ;;  %v1307_v29 = vld [vmem:[#allocation4 + $0x760] sm:$0xff]  ;;  %v1128_v12 = vld [vmem:[#allocation4 + $0x1c8] sm:$0xff] }
  0xb9   :  { %2680 = vmatprep.mubr.bf16.mxu1 %v6697_v31  ;;  %v1275_v61 = vld [vmem:[#allocation4 + $0x660] sm:$0xff]  ;;  %v1132_v13 = vld [vmem:[#allocation4 + $0x1e8] sm:$0xff] }
  0xba   :  { %2610 = vmatpush1.bf16.msra.mxu0 %v5363_v32  ;;  %v5428_v32 = vcombine.high %v1183_v18, %v1187_v19  ;;  %v1263_v4 = vld [vmem:[#allocation4 + $0x600] sm:$0xff]  ;;  %v5515_v11 = vcombine.low %v1271_v60, %v1275_v61  ;;  %v108_v19 = vld [vmem:[%s6897_s1 + $0x10] sm:$0xff] }
  0xbb   :  { %2651 = vmatpush1.bf16.msra.mxu1 %v5491_v33  ;;  %2611 = vmatprep.subr.bf16.mxu0 %v5356_v38  ;;  %v5556_v33 = vcombine.high %v1311_v20, %v1315_v21  ;;  %v1295_v38 = vld [vmem:[#allocation4 + $0x700] sm:$0xff] }
  0xbc   :  { %2652 = vmatprep.subr.bf16.mxu1 %v5484_v39  ;;  %v1299_v39 = vld [vmem:[#allocation4 + $0x720] sm:$0xff] }
  0xbd   :  { %v1267_v5 = vld [vmem:[#allocation4 + $0x620] sm:$0xff] }
  0xbe   :  { %2612 = vmatpush1.bf16.msra.mxu0 %v5355_v8  ;;  %v5420_v8 = vcombine.high %v1175_v26, %v1179_v27  ;;  %v106_v18 = vld [vmem:[%s6897_s1] sm:$0xff]  ;;  %v5507_v21 = vcombine.low %v1263_v4, %v1267_v5 }
  0xbf   :  { %2653 = vmatpush1.bf16.msra.mxu1 %v5483_v9  ;;  %2613 = vmatprep.subr.bf16.mxu0 %v5348_v40  ;;  %v5548_v9 = vcombine.high %v1303_v28, %v1307_v29  ;;  %v5419_v40 = vcombine.low %v1175_v26, %v1179_v27  ;;  %v5374_v26 = vcombine.high %v1128_v12, %v1132_v13 }
  0xc0   :  { %2654 = vmatprep.subr.bf16.mxu1 %v5476_v41  ;;  %v5547_v41 = vcombine.low %v1303_v28, %v1307_v29  ;;  %v6709_v28 = vpack.c.bf16 %v106_v18, %v106_v18  ;;  %v6711_v29 = vpack.c.bf16 %v108_v19, %v108_v19 }
  0xc2   :  { %2614 = vmatpush1.bf16.msra.mxu0 %v5347_v46  ;;  %v5412_v46 = vcombine.high %v1167_v36, %v1171_v37 }
  0xc3   :  { %2655 = vmatpush1.bf16.msra.mxu1 %v5475_v47  ;;  %2615 = vmatprep.subr.bf16.mxu0 %v5340_v48  ;;  %v5540_v47 = vcombine.high %v1295_v38, %v1299_v39  ;;  %v5411_v48 = vcombine.low %v1167_v36, %v1171_v37  ;;  %v1116_v37 = vld [vmem:[#allocation4 + $0x168] sm:$0xff] }
  0xc4   :  { %2656 = vmatprep.subr.bf16.mxu1 %v5468_v49  ;;  %v5539_v49 = vcombine.low %v1295_v38, %v1299_v39  ;;  %v1240_v38 = vld [vmem:[#allocation4 + $0x548] sm:$0xff] }
  0xc5   :  { %v1244_v39 = vld [vmem:[#allocation4 + $0x568] sm:$0xff] }
  0xc6   :  { %2616 = vmatpush1.bf16.msra.mxu0 %v5339_v54  ;;  %v5404_v54 = vcombine.high %v1159_v42, %v1163_v43  ;;  %v5486_v42 = vcombine.high %v1240_v38, %v1244_v39  ;;  %v1108_v43 = vld [vmem:[#allocation4 + $0x128] sm:$0xff] }
  0xc7   :  { %2657 = vmatpush1.bf16.msra.mxu1 %v5467_v55  ;;  %2617 = vmatprep.subr.bf16.mxu0 %v5332_v58  ;;  %v5532_v55 = vcombine.high %v1287_v44, %v1291_v45  ;;  %v1143_v58 = vld [vmem:[#allocation4 + $0x240] sm:$0xff]  ;;  %v1232_v44 = vld [vmem:[#allocation4 + $0x508] sm:$0xff] }
  0xc8   :  { %2658 = vmatprep.subr.bf16.mxu1 %v5460_v59  ;;  %v1147_v59 = vld [vmem:[#allocation4 + $0x260] sm:$0xff]  ;;  %v1236_v45 = vld [vmem:[#allocation4 + $0x528] sm:$0xff] }
  0xc9   :  { %v5387_v10 = vcombine.low %v1143_v58, %v1147_v59 }
  0xca   :  { %2618 = vmatpush1.bf16.msra.mxu0 %v5331_v62  ;;  %v5396_v62 = vcombine.high %v1151_v50, %v1155_v51  ;;  %v1096_v50 = vld [vmem:[#allocation4 + $0xc8] sm:$0xff] }
  0xcb   :  { %2659 = vmatpush1.bf16.msra.mxu1 %v5459_v63  ;;  %2619 = vmatprep.subr.bf16.mxu0 %v5324_v2  ;;  %v5524_v63 = vcombine.high %v1279_v52, %v1283_v53  ;;  %v1135_v2 = vld [vmem:[#allocation4 + $0x200] sm:$0xff]  ;;  %v1100_v51 = vld [vmem:[#allocation4 + $0xe8] sm:$0xff] }
  0xcc   :  { %2660 = vmatprep.subr.bf16.mxu1 %v5452_v3  ;;  %v1139_v3 = vld [vmem:[#allocation4 + $0x220] sm:$0xff]  ;;  %v1224_v52 = vld [vmem:[#allocation4 + $0x4c8] sm:$0xff] }
  0xcd   :  { %v5379_v20 = vcombine.low %v1135_v2, %v1139_v3  ;;  %v1228_v53 = vld [vmem:[#allocation4 + $0x4e8] sm:$0xff] }
  0xce   :  { %2620 = vmatpush1.bf16.msra.mxu0 %v5323_v6  ;;  %v5388_v6 = vcombine.high %v1143_v58, %v1147_v59  ;;  %v1088_v58 = vld [vmem:[#allocation4 + $0x88] sm:$0xff] }
  0xcf   :  { %2661 = vmatpush1.bf16.msra.mxu1 %v5451_v7  ;;  %2621 = vmatprep.subr.bf16.mxu0 %v5316_v14  ;;  %v5516_v7 = vcombine.high %v1271_v60, %v1275_v61  ;;  %v1256_v14 = vld [vmem:[#allocation4 + $0x5c8] sm:$0xff] }
  0xd0   :  { %2662 = vmatprep.subr.bf16.mxu1 %v5444_v15  ;;  %v1260_v15 = vld [vmem:[#allocation4 + $0x5e8] sm:$0xff] }
  0xd1   :  { %v5502_v27 = vcombine.high %v1256_v14, %v1260_v15  ;;  %v1092_v59 = vld [vmem:[#allocation4 + $0xa8] sm:$0xff] }
  0xd2   :  { %2622 = vmatpush1.bf16.msra.mxu0 %v5315_v16  ;;  %v5380_v16 = vcombine.high %v1135_v2, %v1139_v3  ;;  %v1216_v60 = vld [vmem:[#allocation4 + $0x488] sm:$0xff] }
  0xd3   :  { %2663 = vmatpush1.bf16.msra.mxu1 %v5443_v17  ;;  %2623 = vmatprep.subr.bf16.mxu0 %v5436_v22  ;;  %v5508_v17 = vcombine.high %v1263_v4, %v1267_v5  ;;  %v1120_v22 = vld [vmem:[#allocation4 + $0x188] sm:$0xff] }
  0xd4   :  { %2664 = vmatprep.subr.bf16.mxu1 %v5564_v23  ;;  %v1124_v23 = vld [vmem:[#allocation4 + $0x1a8] sm:$0xff] }
  0xd5   :  { %v1220_v61 = vld [vmem:[#allocation4 + $0x4a8] sm:$0xff] }
  0xd6   :  { %2624 = vmatpush2.bf16.msra.mxu0 %v5435_v24  ;;  %v1248_v24 = vld [vmem:[#allocation4 + $0x588] sm:$0xff] }
  0xd7   :  { %2665 = vmatpush2.bf16.msra.mxu1 %v5563_v25  ;;  %2625 = vmatprep.subr.bf16.mxu0 %v5428_v32  ;;  %v1252_v25 = vld [vmem:[#allocation4 + $0x5a8] sm:$0xff]  ;;  %v5373_v32 = vcombine.low %v1128_v12, %v1132_v13 }
  0xd8   :  { %2666 = vmatprep.subr.bf16.mxu1 %v5556_v33  ;;  %v5501_v33 = vcombine.low %v1256_v14, %v1260_v15  ;;  %v5494_v36 = vcombine.high %v1248_v24, %v1252_v25  ;;  %v1080_v2 = vld [vmem:[#allocation4 + $0x48] sm:$0xff] }
  0xd9   :  { %v1084_v3 = vld [vmem:[#allocation4 + $0x68] sm:$0xff] }
  0xda   :  { %2626 = vmatpush2.bf16.msra.mxu0 %v5427_v34  ;;  %v1112_v34 = vld [vmem:[#allocation4 + $0x148] sm:$0xff] }
  0xdb   :  { %2667 = vmatpush2.bf16.msra.mxu1 %v5555_v35  ;;  %2627 = vmatprep.subr.bf16.mxu0 %v5420_v8  ;;  %v5366_v35 = vcombine.high %v1120_v22, %v1124_v23  ;;  %v5365_v8 = vcombine.low %v1120_v22, %v1124_v23  ;;  %v1208_v4 = vld [vmem:[#allocation4 + $0x448] sm:$0xff] }
  0xdc   :  { %2668 = vmatprep.subr.bf16.mxu1 %v5548_v9  ;;  %v5493_v9 = vcombine.low %v1248_v24, %v1252_v25  ;;  %v1212_v5 = vld [vmem:[#allocation4 + $0x468] sm:$0xff] }
  0xdd   :  { %v1072_v12 = vld [vmem:[#allocation4 + $0x8] sm:$0xff] }
  0xde   :  { %2628 = vmatpush2.bf16.msra.mxu0 %v5419_v40  ;;  %v1104_v40 = vld [vmem:[#allocation4 + $0x108] sm:$0xff] }
  0xdf   :  { %2669 = vmatpush2.bf16.msra.mxu1 %v5547_v41  ;;  %2629 = vmatprep.subr.bf16.mxu0 %v5412_v46  ;;  %v5358_v41 = vcombine.high %v1112_v34, %v1116_v37  ;;  %v5357_v46 = vcombine.low %v1112_v34, %v1116_v37  ;;  %v1076_v13 = vld [vmem:[#allocation4 + $0x28] sm:$0xff] }
  0xe0   :  { %2670 = vmatprep.subr.bf16.mxu1 %v5540_v47  ;;  %v5485_v47 = vcombine.low %v1240_v38, %v1244_v39  ;;  %v1200_v14 = vld [vmem:[#allocation4 + $0x408] sm:$0xff]  ;;  %v5318_v18 = vcombine.high %v1072_v12, %v1076_v13  ;;  %v5317_v24 = vcombine.low %v1072_v12, %v1076_v13 }
  0xe1   :  { %v1204_v15 = vld [vmem:[#allocation4 + $0x428] sm:$0xff] }
  0xe2   :  { %2630 = vmatpush2.bf16.msra.mxu0 %v5411_v48  ;;  %v5350_v48 = vcombine.high %v1104_v40, %v1108_v43  ;;  %v5446_v19 = vcombine.high %v1200_v14, %v1204_v15  ;;  %v1320_v22 = vld [vmem:[#allocation4 + $0x7c8] sm:$0xff]  ;;  %v5445_v25 = vcombine.low %v1200_v14, %v1204_v15 }
  0xe3   :  { %2671 = vmatpush2.bf16.msra.mxu1 %v5539_v49  ;;  %2631 = vmatprep.subr.bf16.mxu0 %v5404_v54  ;;  %v5478_v49 = vcombine.high %v1232_v44, %v1236_v45  ;;  %v5349_v54 = vcombine.low %v1104_v40, %v1108_v43  ;;  %v1324_v23 = vld [vmem:[#allocation4 + $0x7e8] sm:$0xff] }
  0xe4   :  { %2672 = vmatprep.subr.bf16.mxu1 %v5532_v55  ;;  %v5477_v55 = vcombine.low %v1232_v44, %v1236_v45  ;;  %v5565_v37 = vcombine.low %v1320_v22, %v1324_v23  ;;  %v1176_v38 = vld [vmem:[#allocation4 + $0x348] sm:$0xff] }
  0xe5   :  { %v1180_v39 = vld [vmem:[#allocation4 + $0x368] sm:$0xff] }
  0xe6   :  { %2632 = vmatpush2.bf16.msra.mxu0 %v5403_v56  ;;  %v5342_v56 = vcombine.high %v1096_v50, %v1100_v51  ;;  %v1168_v44 = vld [vmem:[#allocation4 + $0x308] sm:$0xff] }
  0xe7   :  { %2673 = vmatpush2.bf16.msra.mxu1 %v5531_v57  ;;  %2633 = vmatprep.subr.bf16.mxu0 %v5396_v62  ;;  %v5470_v57 = vcombine.high %v1224_v52, %v1228_v53  ;;  %v5341_v62 = vcombine.low %v1096_v50, %v1100_v51  ;;  %v1172_v45 = vld [vmem:[#allocation4 + $0x328] sm:$0xff]  ;;  %v5421_v50 = vcombine.low %v1176_v38, %v1180_v39 }
  0xe8   :  { %2674 = vmatprep.subr.bf16.mxu1 %v5524_v63  ;;  %v5469_v63 = vcombine.low %v1224_v52, %v1228_v53  ;;  %v1160_v52 = vld [vmem:[#allocation4 + $0x2c8] sm:$0xff] }
  0xe9   :  { %v1164_v53 = vld [vmem:[#allocation4 + $0x2e8] sm:$0xff] }
  0xea   :  { %2634 = vmatpush2.bf16.msra.mxu0 %v5395_v0  ;;  %v5334_v0 = vcombine.high %v1088_v58, %v1092_v59 }
  0xeb   :  { %2675 = vmatpush2.bf16.msra.mxu1 %v5523_v1  ;;  %2635 = vmatprep.subr.bf16.mxu0 %v5388_v6  ;;  %v5462_v1 = vcombine.high %v1216_v60, %v1220_v61  ;;  %v5333_v6 = vcombine.low %v1088_v58, %v1092_v59  ;;  %v5413_v58 = vcombine.low %v1168_v44, %v1172_v45 }
  0xec   :  { %2676 = vmatprep.subr.bf16.mxu1 %v5516_v7  ;;  %v5461_v7 = vcombine.low %v1216_v60, %v1220_v61  ;;  %v1152_v60 = vld [vmem:[#allocation4 + $0x288] sm:$0xff] }
  0xed   :  { %v1156_v61 = vld [vmem:[#allocation4 + $0x2a8] sm:$0xff] }
  0xee   :  { %2636 = vmatpush2.bf16.msra.mxu0 %v5387_v10  ;;  %v5326_v10 = vcombine.high %v1080_v2, %v1084_v3  ;;  %v5397_v14 = vcombine.low %v1152_v60, %v1156_v61 }
  0xef   :  { %2677 = vmatpush2.bf16.msra.mxu1 %v5515_v11  ;;  %2637 = vmatprep.subr.bf16.mxu0 %v5380_v16  ;;  %v5454_v11 = vcombine.high %v1208_v4, %v1212_v5  ;;  %v5325_v16 = vcombine.low %v1080_v2, %v1084_v3  ;;  %v247_v2 = vlaneseq  ;;  %v5405_v3 = vcombine.low %v1160_v52, %v1164_v53 }
  0xf0   :  { %2678 = vmatprep.subr.bf16.mxu1 %v5508_v17  ;;  %v5453_v17 = vcombine.low %v1208_v4, %v1212_v5  ;;  %v1144_v5 = vld [vmem:[#allocation4 + $0x248] sm:$0xff] }
  0xf1   :  { %v6717_v13 = vshrl.u32 %v247_v2, 7  ;;  %v1233_v2 = vld [vmem:[#allocation4 + $0x510] sm:$0xff] }
  0xf2   :  { %2638 = vmatpush2.bf16.msra.mxu0 %v5379_v20  ;;  %v1192_v20 = vld [vmem:[#allocation4 + $0x3c8] sm:$0xff] }
  0xf3   :  { %2679 = vmatpush2.bf16.msra.mxu1 %v5507_v21  ;;  %2689 = vmatprep.subr.bf16.mxu0 %v5374_v26  ;;  %v1196_v21 = vld [vmem:[#allocation4 + $0x3e8] sm:$0xff] }
  0xf4   :  { %2730 = vmatprep.subr.bf16.mxu1 %v5502_v27  ;;  %v1184_v26 = vld [vmem:[#allocation4 + $0x388] sm:$0xff]  ;;  %v5438_v34 = vcombine.high %v1192_v20, %v1196_v21 }
  0xf5   :  { %2640 = vmatmul.mubr.bf16.vlgmr.msra.gmra.mxu0 %v6709_v28  ;;  %v1188_v27 = vld [vmem:[#allocation4 + $0x3a8] sm:$0xff] }
  0xf6   :  { %2681 = vmatmul.mubr.bf16.vlgmr.msra.gmra.mxu1 %v6711_v29  ;;  %2690 = vmatpush1.bf16.msra.mxu0 %v5373_v32  ;;  %v1312_v32 = vld [vmem:[#allocation4 + $0x788] sm:$0xff]  ;;  %v5430_v40 = vcombine.high %v1184_v26, %v1188_v27 }
  0xf7   :  { %2731 = vmatpush1.bf16.msra.mxu1 %v5501_v33  ;;  %2691 = vmatprep.subr.bf16.mxu0 %v5366_v35  ;;  %v1316_v33 = vld [vmem:[#allocation4 + $0x7a8] sm:$0xff]  ;;  %v5566_v35 = vcombine.high %v1320_v22, %v1324_v23  ;;  %v6720_v22 = vsub.s32 0, %v6717_v13  ;;  %v6723_v23 = vsub.s32 1, %v6717_v13 }
  0xf8   :  { %2732 = vmatprep.subr.bf16.mxu1 %v5494_v36  ;;  %2721 = vmatprep.mubr.bf16.mxu0 %v6695_v30  ;;  %v5437_v36 = vcombine.low %v1192_v20, %v1196_v21  ;;  %v5557_v43 = vcombine.low %v1312_v32, %v1316_v33 }
  0xf9   :  { %2762 = vmatprep.mubr.bf16.mxu1 %v6697_v31 }
  0xfa   :  { %2692 = vmatpush1.bf16.msra.mxu0 %v5365_v8  ;;  %v1304_v8 = vld [vmem:[#allocation4 + $0x748] sm:$0xff] }
  0xfb   :  { %2733 = vmatpush1.bf16.msra.mxu1 %v5493_v9  ;;  %2693 = vmatprep.subr.bf16.mxu0 %v5358_v41  ;;  %v1308_v9 = vld [vmem:[#allocation4 + $0x768] sm:$0xff]  ;;  %v5558_v41 = vcombine.high %v1312_v32, %v1316_v33  ;;  %v1257_v32 = vld [vmem:[#allocation4 + $0x5d0] sm:$0xff] }
  0xfc   :  { %2734 = vmatprep.subr.bf16.mxu1 %v5486_v42  ;;  %v5429_v42 = vcombine.low %v1184_v26, %v1188_v27  ;;  %v5549_v51 = vcombine.low %v1304_v8, %v1308_v9  ;;  %v1129_v26 = vld [vmem:[#allocation4 + $0x1d0] sm:$0xff] }
  0xfd   :  { %v1133_v27 = vld [vmem:[#allocation4 + $0x1f0] sm:$0xff] }
  0xfe   :  { %2694 = vmatpush1.bf16.msra.mxu0 %v5357_v46  ;;  %v1296_v46 = vld [vmem:[#allocation4 + $0x708] sm:$0xff]  ;;  %v1261_v33 = vld [vmem:[#allocation4 + $0x5f0] sm:$0xff] }
  0xff   :  { %2735 = vmatpush1.bf16.msra.mxu1 %v5485_v47  ;;  %2695 = vmatprep.subr.bf16.mxu0 %v5350_v48  ;;  %v1300_v47 = vld [vmem:[#allocation4 + $0x728] sm:$0xff]  ;;  %v5422_v48 = vcombine.high %v1176_v38, %v1180_v39  ;;  %v1121_v39 = vld [vmem:[#allocation4 + $0x190] sm:$0xff] }
 0x100   :  { %2736 = vmatprep.subr.bf16.mxu1 %v5478_v49  ;;  %v5550_v49 = vcombine.high %v1304_v8, %v1308_v9  ;;  %v5541_v59 = vcombine.low %v1296_v46, %v1300_v47  ;;  %v1125_v8 = vld [vmem:[#allocation4 + $0x1b0] sm:$0xff] }
 0x101   :  { %v1249_v9 = vld [vmem:[#allocation4 + $0x590] sm:$0xff] }
 0x102   :  { %2696 = vmatpush1.bf16.msra.mxu0 %v5349_v54  ;;  %v1288_v54 = vld [vmem:[#allocation4 + $0x6c8] sm:$0xff] }
 0x103   :  { %2737 = vmatpush1.bf16.msra.mxu1 %v5477_v55  ;;  %2697 = vmatprep.subr.bf16.mxu0 %v5342_v56  ;;  %v1292_v55 = vld [vmem:[#allocation4 + $0x6e8] sm:$0xff]  ;;  %v5414_v56 = vcombine.high %v1168_v44, %v1172_v45  ;;  %v5375_v44 = vcombine.low %v1129_v26, %v1133_v27  ;;  %v5503_v45 = vcombine.low %v1257_v32, %v1261_v33 }
 0x104   :  { %2738 = vmatprep.subr.bf16.mxu1 %v5470_v57  ;;  %v5542_v57 = vcombine.high %v1296_v46, %v1300_v47  ;;  %v5533_v4 = vcombine.low %v1288_v54, %v1292_v55  ;;  %v1113_v46 = vld [vmem:[#allocation4 + $0x150] sm:$0xff]  ;;  %v5368_v47 = vcombine.high %v1121_v39, %v1125_v8 }
 0x106   :  { %2698 = vmatpush1.bf16.msra.mxu0 %v5341_v62  ;;  %v1280_v62 = vld [vmem:[#allocation4 + $0x688] sm:$0xff] }
 0x107   :  { %2739 = vmatpush1.bf16.msra.mxu1 %v5469_v63  ;;  %2699 = vmatprep.subr.bf16.mxu0 %v5334_v0  ;;  %v1284_v63 = vld [vmem:[#allocation4 + $0x6a8] sm:$0xff]  ;;  %v5406_v0 = vcombine.high %v1160_v52, %v1164_v53  ;;  %v1245_v52 = vld [vmem:[#allocation4 + $0x570] sm:$0xff] }
 0x108   :  { %2740 = vmatprep.subr.bf16.mxu1 %v5462_v1  ;;  %v5534_v1 = vcombine.high %v1288_v54, %v1292_v55  ;;  %v5526_v12 = vcombine.high %v1280_v62, %v1284_v63  ;;  %v5525_v15 = vcombine.low %v1280_v62, %v1284_v63  ;;  %v1105_v62 = vld [vmem:[#allocation4 + $0x110] sm:$0xff] }
 0x10a   :  { %2700 = vmatpush1.bf16.msra.mxu0 %v5333_v6  ;;  %v1148_v6 = vld [vmem:[#allocation4 + $0x268] sm:$0xff] }
 0x10b   :  { %2741 = vmatpush1.bf16.msra.mxu1 %v5461_v7  ;;  %2701 = vmatprep.subr.bf16.mxu0 %v5326_v10  ;;  %v1272_v7 = vld [vmem:[#allocation4 + $0x648] sm:$0xff]  ;;  %v5390_v20 = vcombine.high %v1144_v5, %v1148_v6 }
 0x10c   :  { %2742 = vmatprep.subr.bf16.mxu1 %v5454_v11  ;;  %v1276_v10 = vld [vmem:[#allocation4 + $0x668] sm:$0xff]  ;;  %v5398_v11 = vcombine.high %v1152_v60, %v1156_v61 }
 0x10d   :  { %v5518_v21 = vcombine.high %v1272_v7, %v1276_v10 }
 0x10e   :  { %2702 = vmatpush1.bf16.msra.mxu0 %v5325_v16  ;;  %v1136_v16 = vld [vmem:[#allocation4 + $0x208] sm:$0xff] }
 0x10f   :  { %2743 = vmatpush1.bf16.msra.mxu1 %v5453_v17  ;;  %2703 = vmatprep.subr.bf16.mxu0 %v5318_v18  ;;  %v1140_v17 = vld [vmem:[#allocation4 + $0x228] sm:$0xff] }
 0x110   :  { %2744 = vmatprep.subr.bf16.mxu1 %v5446_v19  ;;  %v1264_v18 = vld [vmem:[#allocation4 + $0x608] sm:$0xff] }
 0x111   :  { %v1268_v19 = vld [vmem:[#allocation4 + $0x628] sm:$0xff] }
 0x112   :  { %2704 = vmatpush1.bf16.msra.mxu0 %v5317_v24  ;;  %v5389_v24 = vcombine.low %v1144_v5, %v1148_v6  ;;  %v5509_v38 = vcombine.low %v1264_v18, %v1268_v19 }
 0x113   :  { %2745 = vmatpush1.bf16.msra.mxu1 %v5445_v25  ;;  %2705 = vmatprep.subr.bf16.mxu0 %v5438_v34  ;;  %v5517_v25 = vcombine.low %v1272_v7, %v1276_v10  ;;  %v5382_v34 = vcombine.high %v1136_v16, %v1140_v17 }
 0x114   :  { %2746 = vmatprep.subr.bf16.mxu1 %v5566_v35  ;;  %v5510_v35 = vcombine.high %v1264_v18, %v1268_v19  ;;  %v1225_v18 = vld [vmem:[#allocation4 + $0x4d0] sm:$0xff] }
 0x115   :  { %v1229_v19 = vld [vmem:[#allocation4 + $0x4f0] sm:$0xff] }
 0x116   :  { %2706 = vmatpush2.bf16.msra.mxu0 %v5437_v36  ;;  %v6728_v36 = vld [vmem:[%s6905_s9] sm:$0xf] }
 0x117   :  { %2747 = vmatpush2.bf16.msra.mxu1 %v5565_v37  ;;  %2707 = vmatprep.subr.bf16.mxu0 %v5430_v40  ;;  %v5381_v37 = vcombine.low %v1136_v16, %v1140_v17  ;;  %v1253_v40 = vld [vmem:[#allocation4 + $0x5b0] sm:$0xff] }
 0x118   :  { %2748 = vmatprep.subr.bf16.mxu1 %v5558_v41  ;;  %v5376_v41 = vcombine.high %v1129_v26, %v1133_v27  ;;  %v1097_v16 = vld [vmem:[#allocation4 + $0xd0] sm:$0xff] }
 0x119   :  { %v1101_v17 = vld [vmem:[#allocation4 + $0xf0] sm:$0xff] }
 0x11a   :  { %2708 = vmatpush2.bf16.msra.mxu0 %v5429_v42  ;;  %v5504_v42 = vcombine.high %v1257_v32, %v1261_v33  ;;  %v1089_v26 = vld [vmem:[#allocation4 + $0x90] sm:$0xff] }
 0x11b   :  { %2749 = vmatpush2.bf16.msra.mxu1 %v5557_v43  ;;  %2709 = vmatprep.subr.bf16.mxu0 %v5422_v48  ;;  %v250_v43 = vrot.slane %v6728_v36, %v6720_v22  ;;  %v5496_v48 = vcombine.high %v1249_v9, %v1253_v40  ;;  %v1093_v27 = vld [vmem:[#allocation4 + $0xb0] sm:$0xff] }
 0x11c   :  { %2750 = vmatprep.subr.bf16.mxu1 %v5550_v49  ;;  %v254_v49 = vrot.slane %v6728_v36, %v6723_v23  ;;  %v1217_v32 = vld [vmem:[#allocation4 + $0x490] sm:$0xff] }
 0x11d   :  { %v1221_v33 = vld [vmem:[#allocation4 + $0x4b0] sm:$0xff] }
 0x11e   :  { %2710 = vmatpush2.bf16.msra.mxu0 %v5421_v50  ;;  %v1117_v50 = vld [vmem:[#allocation4 + $0x170] sm:$0xff] }
 0x11f   :  { %2751 = vmatpush2.bf16.msra.mxu1 %v5549_v51  ;;  %2711 = vmatprep.subr.bf16.mxu0 %v5414_v56  ;;  %v1241_v51 = vld [vmem:[#allocation4 + $0x550] sm:$0xff]  ;;  %v5367_v56 = vcombine.low %v1121_v39, %v1125_v8  ;;  %v5360_v60 = vcombine.high %v1113_v46, %v1117_v50  ;;  %v5359_v7 = vcombine.low %v1113_v46, %v1117_v50 }
 0x120   :  { %2752 = vmatprep.subr.bf16.mxu1 %v5542_v57  ;;  %v5495_v57 = vcombine.low %v1249_v9, %v1253_v40  ;;  %v5488_v61 = vcombine.high %v1241_v51, %v1245_v52  ;;  %v5487_v10 = vcombine.low %v1241_v51, %v1245_v52  ;;  %v1081_v39 = vld [vmem:[#allocation4 + $0x50] sm:$0xff] }
 0x121   :  { %v1085_v8 = vld [vmem:[#allocation4 + $0x70] sm:$0xff] }
 0x122   :  { %2712 = vmatpush2.bf16.msra.mxu0 %v5413_v58  ;;  %v1209_v9 = vld [vmem:[#allocation4 + $0x450] sm:$0xff] }
 0x123   :  { %2753 = vmatpush2.bf16.msra.mxu1 %v5541_v59  ;;  %2713 = vmatprep.subr.bf16.mxu0 %v5406_v0  ;;  %v1213_v40 = vld [vmem:[#allocation4 + $0x470] sm:$0xff] }
 0x124   :  { %2754 = vmatprep.subr.bf16.mxu1 %v5534_v1  ;;  %v1109_v1 = vld [vmem:[#allocation4 + $0x130] sm:$0xff]  ;;  %v5455_v50 = vcombine.low %v1209_v9, %v1213_v40 }
 0x125   :  { %v1077_v46 = vld [vmem:[#allocation4 + $0x30] sm:$0xff] }
 0x126   :  { %2714 = vmatpush2.bf16.msra.mxu0 %v5405_v3  ;;  %v1237_v3 = vld [vmem:[#allocation4 + $0x530] sm:$0xff] }
 0x127   :  { %2755 = vmatpush2.bf16.msra.mxu1 %v5533_v4  ;;  %2715 = vmatprep.subr.bf16.mxu0 %v5398_v11 }
 0x128   :  { %2756 = vmatprep.subr.bf16.mxu1 %v5526_v12 }
 0x12a   :  { %2716 = vmatpush2.bf16.msra.mxu0 %v5397_v14  ;;  %v5352_v14 = vcombine.high %v1105_v62, %v1109_v1 }
 0x12b   :  { %2757 = vmatpush2.bf16.msra.mxu1 %v5525_v15  ;;  %2717 = vmatprep.subr.bf16.mxu0 %v5390_v20  ;;  %v5480_v15 = vcombine.high %v1233_v2, %v1237_v3  ;;  %v5351_v20 = vcombine.low %v1105_v62, %v1109_v1  ;;  %v1189_v62 = vld [vmem:[#allocation4 + $0x3b0] sm:$0xff] }
 0x12c   :  { %2758 = vmatprep.subr.bf16.mxu1 %v5518_v21  ;;  %v5479_v21 = vcombine.low %v1233_v2, %v1237_v3  ;;  %v1317_v1 = vld [vmem:[#allocation4 + $0x7b0] sm:$0xff] }
 0x12e   :  { %2718 = vmatpush2.bf16.msra.mxu0 %v5389_v24  ;;  %v5344_v24 = vcombine.high %v1097_v16, %v1101_v17 }
 0x12f   :  { %2759 = vmatpush2.bf16.msra.mxu1 %v5517_v25  ;;  %2719 = vmatprep.subr.bf16.mxu0 %v5382_v34  ;;  %v5472_v25 = vcombine.high %v1225_v18, %v1229_v19  ;;  %v5343_v34 = vcombine.low %v1097_v16, %v1101_v17 }
 0x130   :  { %2760 = vmatprep.subr.bf16.mxu1 %v5510_v35  ;;  %v5471_v35 = vcombine.low %v1225_v18, %v1229_v19  ;;  %v1169_v18 = vld [vmem:[#allocation4 + $0x310] sm:$0xff] }
 0x131   :  { %v1173_v19 = vld [vmem:[#allocation4 + $0x330] sm:$0xff] }
 0x132   :  { %2720 = vmatpush2.bf16.msra.mxu0 %v5381_v37  ;;  %v5336_v37 = vcombine.high %v1089_v26, %v1093_v27 }
 0x133   :  { %2761 = vmatpush2.bf16.msra.mxu1 %v5509_v38  ;;  %2771 = vmatprep.subr.bf16.mxu0 %v5376_v41  ;;  %v5464_v38 = vcombine.high %v1217_v32, %v1221_v33  ;;  %v5335_v41 = vcombine.low %v1089_v26, %v1093_v27  ;;  %v5416_v26 = vcombine.high %v1169_v18, %v1173_v19 }
 0x134   :  { %2812 = vmatprep.subr.bf16.mxu1 %v5504_v42  ;;  %v5463_v42 = vcombine.low %v1217_v32, %v1221_v33  ;;  %v1161_v32 = vld [vmem:[#allocation4 + $0x2d0] sm:$0xff] }
 0x135   :  { %v941_v53 = vpop.f32.mrf.mxu0  ;;  %2722 = vmatmul.mubr.bf16.vlgmr.msra.gmra.mxu0 %v6709_v28  ;;  %v1165_v33 = vld [vmem:[#allocation4 + $0x2f0] sm:$0xff] }
 0x136   :  { %v982_v54 = vpop.f32.mrf.mxu1  ;;  %2763 = vmatmul.mubr.bf16.vlgmr.msra.gmra.mxu1 %v6711_v29  ;;  %v942_v55 = vadd.f32 %v941_v53, %v250_v43  ;;  %2772 = vmatpush1.bf16.msra.mxu0 %v5375_v44  ;;  %v5328_v43 = vcombine.high %v1081_v39, %v1085_v8  ;;  %v5456_v44 = vcombine.high %v1209_v9, %v1213_v40  ;;  %v1193_v53 = vld [vmem:[#allocation4 + $0x3d0] sm:$0xff] }
 0x137   :  { %2813 = vmatpush1.bf16.msra.mxu1 %v5503_v45  ;;  %v943_v58 = vpop.f32.mrf.mxu0  ;;  %2773 = vmatprep.subr.bf16.mxu0 %v5368_v47  ;;  %v1073_v45 = vld [vmem:[#allocation4 + $0x10] sm:$0xff] }
 0x138   :  { %v984_v59 = vpop.f32.mrf.mxu1  ;;  %2814 = vmatprep.subr.bf16.mxu1 %v5496_v48  ;;  %v6736_v63 = vadd.f32 %v982_v54, %v942_v55  ;;  %v944_v0 = vadd.f32 %v943_v58, %v254_v49  ;;  %2803 = vmatprep.mubr.bf16.mxu0 %v6695_v30  ;;  %v1201_v47 = vld [vmem:[#allocation4 + $0x410] sm:$0xff]  ;;  %v5327_v49 = vcombine.low %v1081_v39, %v1085_v8 }
 0x139   :  { %2844 = vmatprep.mubr.bf16.mxu1 %v6697_v31  ;;  %v945_v4 = vpop.f32.mrf.mxu0  ;;  %v1205_v48 = vld [vmem:[#allocation4 + $0x430] sm:$0xff]  ;;  %v5320_v51 = vcombine.high %v1073_v45, %v1077_v46  ;;  %v5408_v39 = vcombine.high %v1161_v32, %v1165_v33 }
 0x13a   :  { %v986_v5 = vpop.f32.mrf.mxu1  ;;  %v6740_v6 = vadd.f32 %v984_v59, %v944_v0  ;;  %2774 = vmatpush1.bf16.msra.mxu0 %v5367_v56  ;;  %v5448_v52 = vcombine.high %v1201_v47, %v1205_v48  ;;  %v1197_v54 = vld [vmem:[#allocation4 + $0x3f0] sm:$0xff]  ;;  %v5447_v58 = vcombine.low %v1201_v47, %v1205_v48 }
 0x13b   :  { %2815 = vmatpush1.bf16.msra.mxu1 %v5495_v57  ;;  %v946_v11 = vpop.f32.mrf.mxu0  ;;  %2775 = vmatprep.subr.bf16.mxu0 %v5360_v60  ;;  %v1321_v55 = vld [vmem:[#allocation4 + $0x7d0] sm:$0xff]  ;;  %v5319_v57 = vcombine.low %v1073_v45, %v1077_v46  ;;  %v5440_v59 = vcombine.high %v1193_v53, %v1197_v54  ;;  %v5439_v2 = vcombine.low %v1193_v53, %v1197_v54 }
 0x13c   :  { %v987_v12 = vpop.f32.mrf.mxu1  ;;  %2816 = vmatprep.subr.bf16.mxu1 %v5488_v61  ;;  %v1325_v56 = vld [vmem:[#allocation4 + $0x7f0] sm:$0xff] }
 0x13d   :  { %v5568_v60 = vcombine.high %v1321_v55, %v1325_v56  ;;  %v1185_v61 = vld [vmem:[#allocation4 + $0x390] sm:$0xff]  ;;  %v5567_v3 = vcombine.low %v1321_v55, %v1325_v56 }
 0x13e   :  { %2776 = vmatpush1.bf16.msra.mxu0 %v5359_v7  ;;  %v1313_v0 = vld [vmem:[#allocation4 + $0x790] sm:$0xff]  ;;  %v5432_v4 = vcombine.high %v1185_v61, %v1189_v62 }
 0x13f   :  { %2817 = vmatpush1.bf16.msra.mxu1 %v5487_v10  ;;  %2777 = vmatprep.subr.bf16.mxu0 %v5352_v14  ;;  %v5560_v5 = vcombine.high %v1313_v0, %v1317_v1  ;;  %v1177_v7 = vld [vmem:[#allocation4 + $0x350] sm:$0xff]  ;;  %v5431_v14 = vcombine.low %v1185_v61, %v1189_v62 }
 0x140   :  { %2818 = vmatprep.subr.bf16.mxu1 %v5480_v15  ;;  %v1181_v10 = vld [vmem:[#allocation4 + $0x370] sm:$0xff]  ;;  %v5559_v15 = vcombine.low %v1313_v0, %v1317_v1  ;;  %v1130_v0 = vld [vmem:[#allocation4 + $0x1d8] sm:$0xff] }
 0x141   :  { %v1305_v11 = vld [vmem:[#allocation4 + $0x750] sm:$0xff]  ;;  %v5424_v16 = vcombine.high %v1177_v7, %v1181_v10  ;;  %v1134_v1 = vld [vmem:[#allocation4 + $0x1f8] sm:$0xff] }
 0x142   :  { %2778 = vmatpush1.bf16.msra.mxu0 %v5351_v20  ;;  %v1309_v12 = vld [vmem:[#allocation4 + $0x770] sm:$0xff] }
 0x143   :  { %2819 = vmatpush1.bf16.msra.mxu1 %v5479_v21  ;;  %2779 = vmatprep.subr.bf16.mxu0 %v5344_v24  ;;  %v5552_v17 = vcombine.high %v1305_v11, %v1309_v12  ;;  %v1297_v20 = vld [vmem:[#allocation4 + $0x710] sm:$0xff]  ;;  %v5423_v24 = vcombine.low %v1177_v7, %v1181_v10  ;;  %v5378_v10 = vcombine.high %v1130_v0, %v1134_v1 }
 0x144   :  { %2820 = vmatprep.subr.bf16.mxu1 %v5472_v25  ;;  %v1301_v21 = vld [vmem:[#allocation4 + $0x730] sm:$0xff]  ;;  %v5551_v25 = vcombine.low %v1305_v11, %v1309_v12  ;;  %v1122_v12 = vld [vmem:[#allocation4 + $0x198] sm:$0xff] }
 0x145   :  { %v5544_v27 = vcombine.high %v1297_v20, %v1301_v21  ;;  %v1153_v9 = vld [vmem:[#allocation4 + $0x290] sm:$0xff] }
 0x146   :  { %2780 = vmatpush1.bf16.msra.mxu0 %v5343_v34  ;;  %v1289_v34 = vld [vmem:[#allocation4 + $0x6d0] sm:$0xff] }
 0x147   :  { %2821 = vmatpush1.bf16.msra.mxu1 %v5471_v35  ;;  %2781 = vmatprep.subr.bf16.mxu0 %v5336_v37  ;;  %v1293_v35 = vld [vmem:[#allocation4 + $0x6f0] sm:$0xff]  ;;  %v5415_v37 = vcombine.low %v1169_v18, %v1173_v19  ;;  %v5377_v19 = vcombine.low %v1130_v0, %v1134_v1  ;;  %v1218_v0 = vld [vmem:[#allocation4 + $0x498] sm:$0xff] }
 0x148   :  { %2822 = vmatprep.subr.bf16.mxu1 %v5464_v38  ;;  %v5543_v38 = vcombine.low %v1297_v20, %v1301_v21  ;;  %v5536_v8 = vcombine.high %v1289_v34, %v1293_v35  ;;  %v1157_v40 = vld [vmem:[#allocation4 + $0x2b0] sm:$0xff]  ;;  %v1222_v1 = vld [vmem:[#allocation4 + $0x4b8] sm:$0xff] }
 0x149   :  { %v5400_v45 = vcombine.high %v1153_v9, %v1157_v40  ;;  %v1145_v47 = vld [vmem:[#allocation4 + $0x250] sm:$0xff] }
 0x14a   :  { %2782 = vmatpush1.bf16.msra.mxu0 %v5335_v41  ;;  %v1281_v41 = vld [vmem:[#allocation4 + $0x690] sm:$0xff] }
 0x14b   :  { %2823 = vmatpush1.bf16.msra.mxu1 %v5463_v42  ;;  %2783 = vmatprep.subr.bf16.mxu0 %v5328_v43  ;;  %v1285_v42 = vld [vmem:[#allocation4 + $0x6b0] sm:$0xff]  ;;  %v5407_v43 = vcombine.low %v1161_v32, %v1165_v33  ;;  %v1246_v32 = vld [vmem:[#allocation4 + $0x578] sm:$0xff] }
 0x14c   :  { %2824 = vmatprep.subr.bf16.mxu1 %v5456_v44  ;;  %v5535_v44 = vcombine.low %v1289_v34, %v1293_v35  ;;  %v5528_v46 = vcombine.high %v1281_v41, %v1285_v42  ;;  %v1149_v48 = vld [vmem:[#allocation4 + $0x270] sm:$0xff] }
 0x14d   :  { %v5392_v53 = vcombine.high %v1145_v47, %v1149_v48  ;;  %v1137_v55 = vld [vmem:[#allocation4 + $0x210] sm:$0xff] }
 0x14e   :  { %2784 = vmatpush1.bf16.msra.mxu0 %v5327_v49  ;;  %v1273_v49 = vld [vmem:[#allocation4 + $0x650] sm:$0xff] }
 0x14f   :  { %2825 = vmatpush1.bf16.msra.mxu1 %v5455_v50  ;;  %2785 = vmatprep.subr.bf16.mxu0 %v5320_v51  ;;  %v1277_v50 = vld [vmem:[#allocation4 + $0x670] sm:$0xff]  ;;  %v5399_v51 = vcombine.low %v1153_v9, %v1157_v40  ;;  %v1106_v40 = vld [vmem:[#allocation4 + $0x118] sm:$0xff] }
 0x150   :  { %2826 = vmatprep.subr.bf16.mxu1 %v5448_v52  ;;  %v5527_v52 = vcombine.low %v1281_v41, %v1285_v42  ;;  %v5520_v54 = vcombine.high %v1273_v49, %v1277_v50  ;;  %v1141_v56 = vld [vmem:[#allocation4 + $0x230] sm:$0xff] }
 0x151   :  { %v5384_v61 = vcombine.high %v1137_v55, %v1141_v56 }
 0x152   :  { %2786 = vmatpush1.bf16.msra.mxu0 %v5319_v57  ;;  %v1265_v57 = vld [vmem:[#allocation4 + $0x610] sm:$0xff] }
 0x153   :  { %2827 = vmatpush1.bf16.msra.mxu1 %v5447_v58  ;;  %2787 = vmatprep.subr.bf16.mxu0 %v5440_v59  ;;  %v1269_v58 = vld [vmem:[#allocation4 + $0x630] sm:$0xff]  ;;  %v5391_v59 = vcombine.low %v1145_v47, %v1149_v48 }
 0x154   :  { %2828 = vmatprep.subr.bf16.mxu1 %v5568_v60  ;;  %v5519_v60 = vcombine.low %v1273_v49, %v1277_v50  ;;  %v5512_v62 = vcombine.high %v1265_v57, %v1269_v58  ;;  %v5511_v7 = vcombine.low %v1265_v57, %v1269_v58  ;;  %v1226_v57 = vld [vmem:[#allocation4 + $0x4d8] sm:$0xff] }
 0x156   :  { %2788 = vmatpush2.bf16.msra.mxu0 %v5439_v2  ;;  %v1258_v2 = vld [vmem:[#allocation4 + $0x5d8] sm:$0xff] }
 0x157   :  { %2829 = vmatpush2.bf16.msra.mxu1 %v5567_v3  ;;  %2789 = vmatprep.subr.bf16.mxu0 %v5432_v4  ;;  %v1262_v3 = vld [vmem:[#allocation4 + $0x5f8] sm:$0xff]  ;;  %v6743_v4 = vsub.s32 2, %v6717_v13 }
 0x158   :  { %2830 = vmatprep.subr.bf16.mxu1 %v5560_v5  ;;  %v5383_v5 = vcombine.low %v1137_v55, %v1141_v56  ;;  %v5506_v11 = vcombine.high %v1258_v2, %v1262_v3  ;;  %v5505_v20 = vcombine.low %v1258_v2, %v1262_v3  ;;  %v1098_v55 = vld [vmem:[#allocation4 + $0xd8] sm:$0xff] }
 0x159   :  { %v258_v18 = vrot.slane %v6728_v36, %v6743_v4  ;;  %v1102_v56 = vld [vmem:[#allocation4 + $0xf8] sm:$0xff] }
 0x15a   :  { %2790 = vmatpush2.bf16.msra.mxu0 %v5431_v14  ;;  %v6746_v14 = vsub.s32 3, %v6717_v13  ;;  %v1118_v13 = vld [vmem:[#allocation4 + $0x178] sm:$0xff]  ;;  %v5345_v2 = vcombine.low %v1098_v55, %v1102_v56 }
 0x15b   :  { %2831 = vmatpush2.bf16.msra.mxu1 %v5559_v15  ;;  %2791 = vmatprep.subr.bf16.mxu0 %v5424_v16  ;;  %v1126_v15 = vld [vmem:[#allocation4 + $0x1b8] sm:$0xff] }
 0x15c   :  { %2832 = vmatprep.subr.bf16.mxu1 %v5552_v17  ;;  %v1250_v16 = vld [vmem:[#allocation4 + $0x598] sm:$0xff]  ;;  %v5370_v21 = vcombine.high %v1122_v12, %v1126_v15 }
 0x15d   :  { %v1254_v17 = vld [vmem:[#allocation4 + $0x5b8] sm:$0xff] }
 0x15e   :  { %2792 = vmatpush2.bf16.msra.mxu0 %v5423_v24  ;;  %v5498_v24 = vcombine.high %v1250_v16, %v1254_v17 }
 0x15f   :  { %2833 = vmatpush2.bf16.msra.mxu1 %v5551_v25  ;;  %2793 = vmatprep.subr.bf16.mxu0 %v5416_v26  ;;  %v1114_v25 = vld [vmem:[#allocation4 + $0x158] sm:$0xff]  ;;  %v262_v26 = vrot.slane %v6728_v36, %v6746_v14 }
 0x160   :  { %2834 = vmatprep.subr.bf16.mxu1 %v5544_v27  ;;  %v1242_v27 = vld [vmem:[#allocation4 + $0x558] sm:$0xff]  ;;  %v5362_v9 = vcombine.high %v1114_v25, %v1118_v13  ;;  %v5361_v49 = vcombine.low %v1114_v25, %v1118_v13 }
 0x161   :  { %v5490_v36 = vcombine.high %v1242_v27, %v1246_v32  ;;  %v5489_v50 = vcombine.low %v1242_v27, %v1246_v32  ;;  %v1206_v25 = vld [vmem:[#allocation4 + $0x438] sm:$0xff] }
 0x162   :  { %2794 = vmatpush2.bf16.msra.mxu0 %v5415_v37  ;;  %v5369_v37 = vcombine.low %v1122_v12, %v1126_v15  ;;  %v1210_v12 = vld [vmem:[#allocation4 + $0x458] sm:$0xff] }
 0x163   :  { %2835 = vmatpush2.bf16.msra.mxu1 %v5543_v38  ;;  %2795 = vmatprep.subr.bf16.mxu0 %v5408_v39  ;;  %v5497_v38 = vcombine.low %v1250_v16, %v1254_v17  ;;  %v1214_v15 = vld [vmem:[#allocation4 + $0x478] sm:$0xff]  ;;  %v5465_v17 = vcombine.low %v1218_v0, %v1222_v1 }
 0x164   :  { %2836 = vmatprep.subr.bf16.mxu1 %v5536_v8  ;;  %v5457_v13 = vcombine.low %v1210_v12, %v1214_v15 }
 0x166   :  { %2796 = vmatpush2.bf16.msra.mxu0 %v5407_v43  ;;  %v1110_v43 = vld [vmem:[#allocation4 + $0x138] sm:$0xff] }
 0x167   :  { %2837 = vmatpush2.bf16.msra.mxu1 %v5535_v44  ;;  %2797 = vmatprep.subr.bf16.mxu0 %v5400_v45  ;;  %v1234_v44 = vld [vmem:[#allocation4 + $0x518] sm:$0xff] }
 0x168   :  { %2838 = vmatprep.subr.bf16.mxu1 %v5528_v46  ;;  %v1238_v45 = vld [vmem:[#allocation4 + $0x538] sm:$0xff] }
 0x169   :  { %v5481_v58 = vcombine.low %v1234_v44, %v1238_v45 }
 0x16a   :  { %2798 = vmatpush2.bf16.msra.mxu0 %v5399_v51 }
 0x16b   :  { %2839 = vmatpush2.bf16.msra.mxu1 %v5527_v52  ;;  %2799 = vmatprep.subr.bf16.mxu0 %v5392_v53  ;;  %v5354_v53 = vcombine.high %v1106_v40, %v1110_v43 }
 0x16c   :  { %2840 = vmatprep.subr.bf16.mxu1 %v5520_v54  ;;  %v5482_v54 = vcombine.high %v1234_v44, %v1238_v45 }
 0x16e   :  { %2800 = vmatpush2.bf16.msra.mxu0 %v5391_v59  ;;  %v5346_v59 = vcombine.high %v1098_v55, %v1102_v56 }
 0x16f   :  { %2841 = vmatpush2.bf16.msra.mxu1 %v5519_v60  ;;  %2801 = vmatprep.subr.bf16.mxu0 %v5384_v61  ;;  %v1090_v61 = vld [vmem:[#allocation4 + $0x98] sm:$0xff] }
 0x170   :  { %2842 = vmatprep.subr.bf16.mxu1 %v5512_v62  ;;  %v1094_v62 = vld [vmem:[#allocation4 + $0xb8] sm:$0xff] }
 0x171   :  { %v5337_v16 = vcombine.low %v1090_v61, %v1094_v62 }
 0x172   :  { %2802 = vmatpush2.bf16.msra.mxu0 %v5383_v5  ;;  %v5338_v5 = vcombine.high %v1090_v61, %v1094_v62 }
 0x173   :  { %2843 = vmatpush2.bf16.msra.mxu1 %v5511_v7  ;;  %2853 = vmatprep.subr.bf16.mxu0 %v5378_v10  ;;  %v5466_v7 = vcombine.high %v1218_v0, %v1222_v1  ;;  %v1082_v10 = vld [vmem:[#allocation4 + $0x58] sm:$0xff] }
 0x174   :  { %2894 = vmatprep.subr.bf16.mxu1 %v5506_v11  ;;  %v1086_v11 = vld [vmem:[#allocation4 + $0x78] sm:$0xff] }
 0x175   :  { %v1023_v33 = vpop.f32.mrf.mxu0  ;;  %2804 = vmatmul.mubr.bf16.vlgmr.msra.gmra.mxu0 %v6709_v28  ;;  %v1162_v0 = vld [vmem:[#allocation4 + $0x2d8] sm:$0xff] }
 0x176   :  { %v1064_v34 = vpop.f32.mrf.mxu1  ;;  %2845 = vmatmul.mubr.bf16.vlgmr.msra.gmra.mxu1 %v6711_v29  ;;  %v1024_v35 = vadd.f32 %v1023_v33, %v258_v18  ;;  %2854 = vmatpush1.bf16.msra.mxu0 %v5377_v19  ;;  %v5330_v18 = vcombine.high %v1082_v10, %v1086_v11  ;;  %v5458_v19 = vcombine.high %v1210_v12, %v1214_v15  ;;  %v1194_v33 = vld [vmem:[#allocation4 + $0x3d8] sm:$0xff] }
 0x177   :  { %2895 = vmatpush1.bf16.msra.mxu1 %v5505_v20  ;;  %v1025_v39 = vpop.f32.mrf.mxu0  ;;  %2855 = vmatprep.subr.bf16.mxu0 %v5370_v21  ;;  %v1074_v20 = vld [vmem:[#allocation4 + $0x18] sm:$0xff] }
 0x178   :  { %v1066_v8 = vpop.f32.mrf.mxu1  ;;  %2896 = vmatprep.subr.bf16.mxu1 %v5498_v24  ;;  %v6754_v41 = vadd.f32 %v1064_v34, %v1024_v35  ;;  %v1026_v42 = vadd.f32 %v1025_v39, %v262_v26  ;;  %2885 = vmatprep.mubr.bf16.mxu0 %v6695_v30  ;;  %v1230_v30 = vld [vmem:[#allocation4 + $0x4f8] sm:$0xff]  ;;  %v5329_v26 = vcombine.low %v1082_v10, %v1086_v11 }
 0x179   :  { %2926 = vmatprep.mubr.bf16.mxu1 %v6697_v31  ;;  %v1027_v46 = vpop.f32.mrf.mxu0  ;;  %v5353_v31 = vcombine.low %v1106_v40, %v1110_v43  ;;  %v5474_v60 = vcombine.high %v1226_v57, %v1230_v30  ;;  %v5473_v3 = vcombine.low %v1226_v57, %v1230_v30  ;;  %v1078_v21 = vld [vmem:[#allocation4 + $0x38] sm:$0xff] }
 0x17a   :  { %v1068_v47 = vpop.f32.mrf.mxu1  ;;  %v6758_v48 = vadd.f32 %v1066_v8, %v1026_v42  ;;  %2856 = vmatpush1.bf16.msra.mxu0 %v5369_v37  ;;  %v1202_v24 = vld [vmem:[#allocation4 + $0x418] sm:$0xff]  ;;  %v5322_v27 = vcombine.high %v1074_v20, %v1078_v21 }
 0x17b   :  { %2897 = vmatpush1.bf16.msra.mxu1 %v5497_v38  ;;  %v1028_v51 = vpop.f32.mrf.mxu0  ;;  %2857 = vmatprep.subr.bf16.mxu0 %v5362_v9  ;;  %v5450_v32 = vcombine.high %v1202_v24, %v1206_v25  ;;  %v1198_v34 = vld [vmem:[#allocation4 + $0x3f8] sm:$0xff]  ;;  %v5321_v38 = vcombine.low %v1074_v20, %v1078_v21  ;;  %v5449_v39 = vcombine.low %v1202_v24, %v1206_v25 }
 0x17c   :  { %v1069_v52 = vpop.f32.mrf.mxu1  ;;  %2898 = vmatprep.subr.bf16.mxu1 %v5490_v36  ;;  %v1322_v35 = vld [vmem:[#allocation4 + $0x7d8] sm:$0xff]  ;;  %v5442_v8 = vcombine.high %v1194_v33, %v1198_v34  ;;  %v5441_v44 = vcombine.low %v1194_v33, %v1198_v34 }
 0x17d   :  { %v1326_v37 = vld [vmem:[#allocation4 + $0x7f8] sm:$0xff] }
 0x17e   :  { %2858 = vmatpush1.bf16.msra.mxu0 %v5361_v49  ;;  %v5570_v9 = vcombine.high %v1322_v35, %v1326_v37  ;;  %v1186_v36 = vld [vmem:[#allocation4 + $0x398] sm:$0xff]  ;;  %v5569_v45 = vcombine.low %v1322_v35, %v1326_v37 }
 0x17f   :  { %2899 = vmatpush1.bf16.msra.mxu1 %v5489_v50  ;;  %2859 = vmatprep.subr.bf16.mxu0 %v5354_v53  ;;  %v1190_v40 = vld [vmem:[#allocation4 + $0x3b8] sm:$0xff] }
 0x180   :  { %2900 = vmatprep.subr.bf16.mxu1 %v5482_v54  ;;  %v1314_v42 = vld [vmem:[#allocation4 + $0x798] sm:$0xff]  ;;  %v5434_v46 = vcombine.high %v1186_v36, %v1190_v40  ;;  %v5433_v53 = vcombine.low %v1186_v36, %v1190_v40 }
 0x181   :  { %v1318_v43 = vld [vmem:[#allocation4 + $0x7b8] sm:$0xff] }
 0x182   :  { %2860 = vmatpush1.bf16.msra.mxu0 %v5353_v31  ;;  %v5562_v47 = vcombine.high %v1314_v42, %v1318_v43  ;;  %v1178_v49 = vld [vmem:[#allocation4 + $0x358] sm:$0xff]  ;;  %v5561_v54 = vcombine.low %v1314_v42, %v1318_v43 }
 0x183   :  { %2901 = vmatpush1.bf16.msra.mxu1 %v5481_v58  ;;  %2861 = vmatprep.subr.bf16.mxu0 %v5346_v59  ;;  %v1182_v50 = vld [vmem:[#allocation4 + $0x378] sm:$0xff] }
 0x184   :  { %2902 = vmatprep.subr.bf16.mxu1 %v5474_v60  ;;  %v1306_v51 = vld [vmem:[#allocation4 + $0x758] sm:$0xff]  ;;  %v5426_v55 = vcombine.high %v1178_v49, %v1182_v50  ;;  %v5425_v59 = vcombine.low %v1178_v49, %v1182_v50  ;;  %v6102_v50 = vld [vmem:[#allocation6 + $0x4c4] ss:$16 sps:$4 sm:$0xff]  }
 0x185   :  { %v1310_v52 = vld [vmem:[#allocation4 + $0x778] sm:$0xff] }
 0x186   :  { %2862 = vmatpush1.bf16.msra.mxu0 %v5345_v2  ;;  %v5554_v56 = vcombine.high %v1306_v51, %v1310_v52  ;;  %v1170_v57 = vld [vmem:[#allocation4 + $0x318] sm:$0xff]  ;;  %v5553_v60 = vcombine.low %v1306_v51, %v1310_v52 }
 0x187   :  { %2903 = vmatpush1.bf16.msra.mxu1 %v5473_v3  ;;  %2863 = vmatprep.subr.bf16.mxu0 %v5338_v5  ;;  %v1174_v30 = vld [vmem:[#allocation4 + $0x338] sm:$0xff] }
 0x188   :  { %2904 = vmatprep.subr.bf16.mxu1 %v5466_v7  ;;  %v1298_v31 = vld [vmem:[#allocation4 + $0x718] sm:$0xff]  ;;  %v5418_v61 = vcombine.high %v1170_v57, %v1174_v30  ;;  %v5417_v5 = vcombine.low %v1170_v57, %v1174_v30  ;;  %v6100_v57 = vld [vmem:[#allocation6 + $0x4c0] ss:$16 sps:$4 sm:$0xff]  }
 0x189   :  { %v1302_v58 = vld [vmem:[#allocation4 + $0x738] sm:$0xff] }
 0x18a   :  { %2864 = vmatpush1.bf16.msra.mxu0 %v5337_v16  ;;  %v5546_v62 = vcombine.high %v1298_v31, %v1302_v58  ;;  %v1166_v1 = vld [vmem:[#allocation4 + $0x2f8] sm:$0xff]  ;;  %v5545_v7 = vcombine.low %v1298_v31, %v1302_v58 }
 0x18b   :  { %2905 = vmatpush1.bf16.msra.mxu1 %v5465_v17  ;;  %2865 = vmatprep.subr.bf16.mxu0 %v5330_v18  ;;  %v1290_v2 = vld [vmem:[#allocation4 + $0x6d8] sm:$0xff]  ;;  %v5410_v10 = vcombine.high %v1162_v0, %v1166_v1  ;;  %v5409_v18 = vcombine.low %v1162_v0, %v1166_v1 }
 0x18c   :  { %2906 = vmatprep.subr.bf16.mxu1 %v5458_v19  ;;  %v1294_v3 = vld [vmem:[#allocation4 + $0x6f8] sm:$0xff] }
 0x18d   :  { %v5538_v11 = vcombine.high %v1290_v2, %v1294_v3  ;;  %v1154_v12 = vld [vmem:[#allocation4 + $0x298] sm:$0xff]  ;;  %v5537_v19 = vcombine.low %v1290_v2, %v1294_v3 }
 0x18e   :  { %2866 = vmatpush1.bf16.msra.mxu0 %v5329_v26  ;;  %v1158_v15 = vld [vmem:[#allocation4 + $0x2b8] sm:$0xff] }
 0x18f   :  { %2907 = vmatpush1.bf16.msra.mxu1 %v5457_v13  ;;  %2867 = vmatprep.subr.bf16.mxu0 %v5322_v27  ;;  %v1282_v16 = vld [vmem:[#allocation4 + $0x698] sm:$0xff]  ;;  %v5402_v20 = vcombine.high %v1154_v12, %v1158_v15  ;;  %v5401_v27 = vcombine.low %v1154_v12, %v1158_v15  ;;  %v115_v15 = vld [vmem:[%s6898_s2 + $0x8] sm:$0xff] }
 0x190   :  { %2908 = vmatprep.subr.bf16.mxu1 %v5450_v32  ;;  %v1286_v17 = vld [vmem:[#allocation4 + $0x6b8] sm:$0xff] }
 0x191   :  { %v5530_v21 = vcombine.high %v1282_v16, %v1286_v17  ;;  %v1146_v24 = vld [vmem:[#allocation4 + $0x258] sm:$0xff]  ;;  %v5529_v32 = vcombine.low %v1282_v16, %v1286_v17  ;;  %v117_v16 = vpack.c.bf16 %v115_v15, %v115_v15  ;;  %v6190_v15 = vld [vmem:[#allocation6 + $0xe0] ss:$16 sps:$4 sm:$0xff]  }
 0x192   :  { %2868 = vmatpush1.bf16.msra.mxu0 %v5321_v38  ;;  %v1150_v25 = vld [vmem:[#allocation4 + $0x278] sm:$0xff] }
 0x193   :  { %2909 = vmatpush1.bf16.msra.mxu1 %v5449_v39  ;;  %2869 = vmatprep.subr.bf16.mxu0 %v5442_v8  ;;  %v1274_v26 = vld [vmem:[#allocation4 + $0x658] sm:$0xff]  ;;  %v5394_v33 = vcombine.high %v1146_v24, %v1150_v25  ;;  %v5393_v8 = vcombine.low %v1146_v24, %v1150_v25  ;;  %v6126_v24 = vld [vmem:[#allocation6 + $0x444] ss:$16 sps:$4 sm:$0xff]  }
 0x194   :  { %2910 = vmatprep.subr.bf16.mxu1 %v5570_v9  ;;  %v1278_v13 = vld [vmem:[#allocation4 + $0x678] sm:$0xff] }
 0x195   :  { %v5522_v34 = vcombine.high %v1274_v26, %v1278_v13  ;;  %v1138_v35 = vld [vmem:[#allocation4 + $0x218] sm:$0xff]  ;;  %v5521_v9 = vcombine.low %v1274_v26, %v1278_v13  ;;  %v6124_v26 = vld [vmem:[#allocation6 + $0x440] ss:$16 sps:$4 sm:$0xff]  }
 0x196   :  { %2870 = vmatpush2.bf16.msra.mxu0 %v5441_v44  ;;  %v1142_v37 = vld [vmem:[#allocation4 + $0x238] sm:$0xff]  ;;  %v6096_v44 = vld [vmem:[#allocation6 + $0x4e4] ss:$16 sps:$4 sm:$0xff]  }
 0x197   :  { %2911 = vmatpush2.bf16.msra.mxu1 %v5569_v45  ;;  %2871 = vmatprep.subr.bf16.mxu0 %v5434_v46  ;;  %v1266_v38 = vld [vmem:[#allocation4 + $0x618] sm:$0xff]  ;;  %v5386_v36 = vcombine.high %v1138_v35, %v1142_v37  ;;  %v5385_v42 = vcombine.low %v1138_v35, %v1142_v37  ;;  %v6763_v46 = vld [vmem:[%s6905_s9 + $0x4] sm:$0xf] }
 0x198   :  { %2912 = vmatprep.subr.bf16.mxu1 %v5562_v47  ;;  %v1270_v39 = vld [vmem:[#allocation4 + $0x638] sm:$0xff]  ;;  %v6094_v47 = vld [vmem:[#allocation6 + $0x4e0] ss:$16 sps:$4 sm:$0xff]   ;;  %v2939_v52 = vrot.slane %v6763_v46, %v6720_v22  ;;  %v6138_v35 = vld [vmem:[#allocation6 + $0x404] ss:$16 sps:$4 sm:$0xff]  }
 0x199   :  { %v5514_v40 = vcombine.high %v1266_v38, %v1270_v39  ;;  %v5513_v43 = vcombine.low %v1266_v38, %v1270_v39  ;;  %v6099_v45 = vld [vmem:[#allocation6 + $0x4ec] ss:$16 sps:$4 sm:$0xff]   ;;  %v6097_v49 = vld [vmem:[#allocation6 + $0x4e8] ss:$16 sps:$4 sm:$0xff]   ;;  %v6136_v38 = vld [vmem:[#allocation6 + $0x400] ss:$16 sps:$4 sm:$0xff]  }
 0x19a   :  { %2872 = vmatpush2.bf16.msra.mxu0 %v5433_v53  ;;  %v6105_v51 = vld [vmem:[#allocation6 + $0x4cc] ss:$16 sps:$4 sm:$0xff]   ;;  %v6103_v30 = vld [vmem:[#allocation6 + $0x4c8] ss:$16 sps:$4 sm:$0xff]  }
 0x19b   :  { %2913 = vmatpush2.bf16.msra.mxu1 %v5561_v54  ;;  %2873 = vmatprep.subr.bf16.mxu0 %v5426_v55  ;;  %v6109_v2 = vld [vmem:[#allocation6 + $0x4a8] ss:$16 sps:$4 sm:$0xff]   ;;  %v6129_v25 = vld [vmem:[#allocation6 + $0x44c] ss:$16 sps:$4 sm:$0xff]  }
 0x19c   :  { %2914 = vmatprep.subr.bf16.mxu1 %v5554_v56  ;;  %v2943_v56 = vrot.slane %v6763_v46, %v6723_v23  ;;  %v6127_v13 = vld [vmem:[#allocation6 + $0x448] ss:$16 sps:$4 sm:$0xff]   ;;  %v6141_v37 = vld [vmem:[#allocation6 + $0x40c] ss:$16 sps:$4 sm:$0xff]  }
 0x19d   :  { %v6139_v39 = vld [vmem:[#allocation6 + $0x408] ss:$16 sps:$4 sm:$0xff]  }
 0x19e   :  { %2874 = vmatpush2.bf16.msra.mxu0 %v5425_v59  ;;  %v6108_v59 = vld [vmem:[#allocation6 + $0x4a4] ss:$16 sps:$4 sm:$0xff]  }
 0x19f   :  { %2915 = vmatpush2.bf16.msra.mxu1 %v5553_v60  ;;  %2875 = vmatprep.subr.bf16.mxu0 %v5418_v61  ;;  %v6111_v60 = vld [vmem:[#allocation6 + $0x4ac] ss:$16 sps:$4 sm:$0xff]  }
 0x1a0   :  { %2916 = vmatprep.subr.bf16.mxu1 %v5546_v62 }
 0x1a2   :  { %2876 = vmatpush2.bf16.msra.mxu0 %v5417_v5 }
 0x1a3   :  { %2917 = vmatpush2.bf16.msra.mxu1 %v5545_v7  ;;  %2877 = vmatprep.subr.bf16.mxu0 %v5410_v10  ;;  %v6114_v7 = vld [vmem:[#allocation6 + $0x484] ss:$16 sps:$4 sm:$0xff]   ;;  %v6117_v10 = vld [vmem:[#allocation6 + $0x48c] ss:$16 sps:$4 sm:$0xff]  }
 0x1a4   :  { %2918 = vmatprep.subr.bf16.mxu1 %v5538_v11 }
 0x1a6   :  { %2878 = vmatpush2.bf16.msra.mxu0 %v5409_v18  ;;  %v6112_v18 = vld [vmem:[#allocation6 + $0x480] ss:$16 sps:$4 sm:$0xff]  }
 0x1a7   :  { %2919 = vmatpush2.bf16.msra.mxu1 %v5537_v19  ;;  %2879 = vmatprep.subr.bf16.mxu0 %v5402_v20  ;;  %v6115_v19 = vld [vmem:[#allocation6 + $0x488] ss:$16 sps:$4 sm:$0xff]   ;;  %v6120_v20 = vld [vmem:[#allocation6 + $0x464] ss:$16 sps:$4 sm:$0xff]  }
 0x1a8   :  { %2920 = vmatprep.subr.bf16.mxu1 %v5530_v21  ;;  %v6123_v21 = vld [vmem:[#allocation6 + $0x46c] ss:$16 sps:$4 sm:$0xff]  }
 0x1aa   :  { %2880 = vmatpush2.bf16.msra.mxu0 %v5401_v27  ;;  %v6132_v27 = vld [vmem:[#allocation6 + $0x424] ss:$16 sps:$4 sm:$0xff]  }
 0x1ab   :  { %2921 = vmatpush2.bf16.msra.mxu1 %v5529_v32  ;;  %2881 = vmatprep.subr.bf16.mxu0 %v5394_v33  ;;  %v6135_v32 = vld [vmem:[#allocation6 + $0x42c] ss:$16 sps:$4 sm:$0xff]   ;;  %v6130_v33 = vld [vmem:[#allocation6 + $0x420] ss:$16 sps:$4 sm:$0xff]  }
 0x1ac   :  { %2922 = vmatprep.subr.bf16.mxu1 %v5522_v34  ;;  %v6133_v34 = vld [vmem:[#allocation6 + $0x428] ss:$16 sps:$4 sm:$0xff]  }
 0x1ae   :  { %2882 = vmatpush2.bf16.msra.mxu0 %v5393_v8  ;;  %v6144_v8 = vld [vmem:[#allocation6 + $0x5e4] ss:$16 sps:$4 sm:$0xff]  }
 0x1af   :  { %2923 = vmatpush2.bf16.msra.mxu1 %v5521_v9  ;;  %2883 = vmatprep.subr.bf16.mxu0 %v5386_v36  ;;  %v6147_v9 = vld [vmem:[#allocation6 + $0x5ec] ss:$16 sps:$4 sm:$0xff]   ;;  %v6142_v36 = vld [vmem:[#allocation6 + $0x5e0] ss:$16 sps:$4 sm:$0xff]  }
 0x1b0   :  { %2924 = vmatprep.subr.bf16.mxu1 %v5514_v40  ;;  %v6145_v40 = vld [vmem:[#allocation6 + $0x5e8] ss:$16 sps:$4 sm:$0xff]  }
 0x1b2   :  { %2884 = vmatpush2.bf16.msra.mxu0 %v5385_v42  ;;  %v6150_v42 = vld [vmem:[#allocation6 + $0x5c4] ss:$16 sps:$4 sm:$0xff]  }
 0x1b3   :  { %2925 = vmatpush2.bf16.msra.mxu1 %v5513_v43  ;;  %3520 = vmatprep.subr.bf16.mxu0 %v6096_v44  ;;  %v6153_v43 = vld [vmem:[#allocation6 + $0x5cc] ss:$16 sps:$4 sm:$0xff]   ;;  %v6148_v44 = vld [vmem:[#allocation6 + $0x5c0] ss:$16 sps:$4 sm:$0xff]  }
 0x1b4   :  { %3561 = vmatprep.subr.bf16.mxu1 %v6099_v45  ;;  %v6151_v45 = vld [vmem:[#allocation6 + $0x5c8] ss:$16 sps:$4 sm:$0xff]  }
 0x1b5   :  { %v2641_v53 = vpop.f32.mrf.mxu0  ;;  %2886 = vmatmul.mubr.bf16.vlgmr.msra.gmra.mxu0 %v6709_v28 }
 0x1b6   :  { %v2682_v54 = vpop.f32.mrf.mxu1  ;;  %2927 = vmatmul.mubr.bf16.vlgmr.msra.gmra.mxu1 %v6711_v29  ;;  %3521 = vmatpush1.bf16.msra.mxu0 %v6094_v47  ;;  %v6106_v29 = vld [vmem:[#allocation6 + $0x4a0] ss:$16 sps:$4 sm:$0xff]   ;;  %v6156_v47 = vld [vmem:[#allocation6 + $0x5a4] ss:$16 sps:$4 sm:$0xff]  }
 0x1b7   :  { %v2683_v55 = vadd.f32 %v2682_v54, %v2641_v53  ;;  %3562 = vmatpush1.bf16.msra.mxu1 %v6097_v49  ;;  %v2643_v31 = vpop.f32.mrf.mxu0  ;;  %3522 = vmatprep.subr.bf16.mxu0 %v6102_v50  ;;  %v6159_v49 = vld [vmem:[#allocation6 + $0x5ac] ss:$16 sps:$4 sm:$0xff]   ;;  %v6154_v50 = vld [vmem:[#allocation6 + $0x5a0] ss:$16 sps:$4 sm:$0xff]  }
 0x1b8   :  { %v2684_v58 = vpop.f32.mrf.mxu1  ;;  %3563 = vmatprep.subr.bf16.mxu1 %v6105_v51  ;;  %3552 = vmatprep.mubr.bf16.mxu0 %v117_v16  ;;  %v6157_v51 = vld [vmem:[#allocation6 + $0x5a8] ss:$16 sps:$4 sm:$0xff]   ;;  %v6165_v53 = vld [vmem:[#allocation6 + $0x58c] ss:$16 sps:$4 sm:$0xff]   ;;  %v6160_v54 = vld [vmem:[#allocation6 + $0x580] ss:$16 sps:$4 sm:$0xff]  }
 0x1b9   :  { %v2956_v61 = vadd.f32 %v2939_v52, %v2683_v55  ;;  %v2685_v62 = vadd.f32 %v2684_v58, %v2643_v31  ;;  %v2645_v0 = vpop.f32.mrf.mxu0  ;;  %3593 = vmatprep.mubr.bf16.mxu1 %v117_v16  ;;  %v6162_v52 = vld [vmem:[#allocation6 + $0x584] ss:$16 sps:$4 sm:$0xff]   ;;  %v6163_v55 = vld [vmem:[#allocation6 + $0x588] ss:$16 sps:$4 sm:$0xff]   ;;  %v6193_v16 = vld [vmem:[#allocation6 + $0x2e0] ss:$16 sps:$4 sm:$0xff]  }
 0x1ba   :  { %v2686_v28 = vpop.f32.mrf.mxu1  ;;  %3523 = vmatpush1.bf16.msra.mxu0 %v6100_v57  ;;  %v6171_v57 = vld [vmem:[#allocation6 + $0x56c] ss:$16 sps:$4 sm:$0xff]   ;;  %v6169_v31 = vld [vmem:[#allocation6 + $0x568] ss:$16 sps:$4 sm:$0xff]   ;;  %v6174_v58 = vld [vmem:[#allocation6 + $0x544] ss:$16 sps:$4 sm:$0xff]  }
 0x1bb   :  { %v2957_v1 = vadd.f32 %v2943_v56, %v2685_v62  ;;  %3564 = vmatpush1.bf16.msra.mxu1 %v6103_v30  ;;  %v2646_v3 = vpop.f32.mrf.mxu0  ;;  %3524 = vmatprep.subr.bf16.mxu0 %v6108_v59  ;;  %v2985_v11 = vmul.f32 %v2956_v61, %v6736_v63  ;;  %v6118_v63 = vld [vmem:[#allocation6 + $0x460] ss:$16 sps:$4 sm:$0xff]   ;;  %v6168_v56 = vld [vmem:[#allocation6 + $0x564] ss:$16 sps:$4 sm:$0xff]   ;;  %v6177_v59 = vld [vmem:[#allocation6 + $0x54c] ss:$16 sps:$4 sm:$0xff]  }
 0x1bc   :  { %v2687_v5 = vpop.f32.mrf.mxu1  ;;  %3565 = vmatprep.subr.bf16.mxu1 %v6111_v60  ;;  %v6166_v30 = vld [vmem:[#allocation6 + $0x560] ss:$16 sps:$4 sm:$0xff]   ;;  %v6175_v61 = vld [vmem:[#allocation6 + $0x548] ss:$16 sps:$4 sm:$0xff]   ;;  %v6180_v62 = vld [vmem:[#allocation6 + $0x524] ss:$16 sps:$4 sm:$0xff]  }
 0x1bd   :  { %v2986_v12 = vmul.f32 %v2957_v1, %v6740_v6  ;;  %v6121_v6 = vld [vmem:[#allocation6 + $0x468] ss:$16 sps:$4 sm:$0xff]   ;;  %v6172_v60 = vld [vmem:[#allocation6 + $0x540] ss:$16 sps:$4 sm:$0xff]   ;;  %v6183_v0 = vld [vmem:[#allocation6 + $0x52c] ss:$16 sps:$4 sm:$0xff]  }
 0x1be   :  { %3525 = vmatpush1.bf16.msra.mxu0 %v6106_v29  ;;  %v6178_v28 = vld [vmem:[#allocation6 + $0x520] ss:$16 sps:$4 sm:$0xff]   ;;  %v6181_v1 = vld [vmem:[#allocation6 + $0x528] ss:$16 sps:$4 sm:$0xff]   ;;  %v6186_v29 = vld [vmem:[#allocation6 + $0x504] ss:$16 sps:$4 sm:$0xff]  }
 0x1bf   :  { %v6776_v17 = vadd.f32 %v2986_v12, %v2985_v11  ;;  %3566 = vmatpush1.bf16.msra.mxu1 %v6109_v2  ;;  %3526 = vmatprep.subr.bf16.mxu0 %v6114_v7  ;;  %v6189_v2 = vld [vmem:[#allocation6 + $0x50c] ss:$16 sps:$4 sm:$0xff]   ;;  %v6184_v3 = vld [vmem:[#allocation6 + $0x500] ss:$16 sps:$4 sm:$0xff]   ;;  %v6187_v5 = vld [vmem:[#allocation6 + $0x508] ss:$16 sps:$4 sm:$0xff]  }
 0x1c0   :  { %3567 = vmatprep.subr.bf16.mxu1 %v6117_v10  ;;  %v114_v7 = vld [vmem:[%s6898_s2] sm:$0xff] }
 0x1c1   :  { %v6192_v10 = vld [vmem:[#allocation6 + $0xe4] ss:$16 sps:$4 sm:$0xff]   ;;  %v116_v12 = vpack.c.bf16 %v114_v7, %v114_v7 }
 0x1c2   :  { %3527 = vmatpush1.bf16.msra.mxu0 %v6112_v18  ;;  %v6195_v11 = vld [vmem:[#allocation6 + $0x2e4] ss:$16 sps:$4 sm:$0xff]  }
 0x1c3   :  { %3568 = vmatpush1.bf16.msra.mxu1 %v6115_v19  ;;  %3528 = vmatprep.subr.bf16.mxu0 %v6120_v20  ;;  %v6198_v18 = vld [vmem:[#allocation6 + $0xc4] ss:$16 sps:$4 sm:$0xff]   ;;  %v2947_v20 = vrot.slane %v6763_v46, %v6743_v4 }
 0x1c4   :  { %3569 = vmatprep.subr.bf16.mxu1 %v6123_v21  ;;  %v6201_v19 = vld [vmem:[#allocation6 + $0x2c4] ss:$16 sps:$4 sm:$0xff]  }
 0x1c5   :  { %v6252_v7 = vld [vmem:[#allocation6 + $0x1a4] ss:$16 sps:$4 sm:$0xff]  }
 0x1c6   :  { %3529 = vmatpush1.bf16.msra.mxu0 %v6118_v63 }
 0x1c7   :  { %3570 = vmatpush1.bf16.msra.mxu1 %v6121_v6  ;;  %3530 = vmatprep.subr.bf16.mxu0 %v6126_v24  ;;  %v2951_v24 = vrot.slane %v6763_v46, %v6746_v14  ;;  %v6202_v46 = vld [vmem:[#allocation6 + $0xa0] ss:$16 sps:$4 sm:$0xff]  }
 0x1c8   :  { %3571 = vmatprep.subr.bf16.mxu1 %v6129_v25  ;;  %v6196_v25 = vld [vmem:[#allocation6 + $0xc0] ss:$16 sps:$4 sm:$0xff]  }
 0x1ca   :  { %3531 = vmatpush1.bf16.msra.mxu0 %v6124_v26  ;;  %v6199_v26 = vld [vmem:[#allocation6 + $0x2c0] ss:$16 sps:$4 sm:$0xff]  }
 0x1cb   :  { %3572 = vmatpush1.bf16.msra.mxu1 %v6127_v13  ;;  %3532 = vmatprep.subr.bf16.mxu0 %v6132_v27 }
 0x1cc   :  { %3573 = vmatprep.subr.bf16.mxu1 %v6135_v32  ;;  %v6204_v32 = vld [vmem:[#allocation6 + $0xa4] ss:$16 sps:$4 sm:$0xff]  }
 0x1ce   :  { %3533 = vmatpush1.bf16.msra.mxu0 %v6130_v33  ;;  %v6207_v33 = vld [vmem:[#allocation6 + $0x2a4] ss:$16 sps:$4 sm:$0xff]  }
 0x1cf   :  { %3574 = vmatpush1.bf16.msra.mxu1 %v6133_v34  ;;  %3534 = vmatprep.subr.bf16.mxu0 %v6138_v35 }
 0x1d0   :  { %3575 = vmatprep.subr.bf16.mxu1 %v6141_v37 }
 0x1d2   :  { %3535 = vmatpush1.bf16.msra.mxu0 %v6136_v38 }
 0x1d3   :  { %3576 = vmatpush1.bf16.msra.mxu1 %v6139_v39  ;;  %3536 = vmatprep.subr.bf16.mxu0 %v6144_v8 }
 0x1d4   :  { %3577 = vmatprep.subr.bf16.mxu1 %v6147_v9  ;;  %v6205_v9 = vld [vmem:[#allocation6 + $0x2a0] ss:$16 sps:$4 sm:$0xff]  }
 0x1d6   :  { %3537 = vmatpush2.bf16.msra.mxu0 %v6142_v36 }
 0x1d7   :  { %3578 = vmatpush2.bf16.msra.mxu1 %v6145_v40  ;;  %3538 = vmatprep.subr.bf16.mxu0 %v6150_v42  ;;  %v6210_v42 = vld [vmem:[#allocation6 + $0x84] ss:$16 sps:$4 sm:$0xff]  }
 0x1d8   :  { %3579 = vmatprep.subr.bf16.mxu1 %v6153_v43  ;;  %v6213_v43 = vld [vmem:[#allocation6 + $0x284] ss:$16 sps:$4 sm:$0xff]  }
 0x1da   :  { %3539 = vmatpush2.bf16.msra.mxu0 %v6148_v44 }
 0x1db   :  { %3580 = vmatpush2.bf16.msra.mxu1 %v6151_v45  ;;  %3540 = vmatprep.subr.bf16.mxu0 %v6156_v47 }
 0x1dc   :  { %3581 = vmatprep.subr.bf16.mxu1 %v6159_v49  ;;  %v6208_v49 = vld [vmem:[#allocation6 + $0x80] ss:$16 sps:$4 sm:$0xff]  }
 0x1de   :  { %3541 = vmatpush2.bf16.msra.mxu0 %v6154_v50  ;;  %v6211_v50 = vld [vmem:[#allocation6 + $0x280] ss:$16 sps:$4 sm:$0xff]  }
 0x1df   :  { %3582 = vmatpush2.bf16.msra.mxu1 %v6157_v51  ;;  %3542 = vmatprep.subr.bf16.mxu0 %v6162_v52  ;;  %v6219_v51 = vld [vmem:[#allocation6 + $0x264] ss:$16 sps:$4 sm:$0xff]   ;;  %v6214_v52 = vld [vmem:[#allocation6 + $0x60] ss:$16 sps:$4 sm:$0xff]  }
 0x1e0   :  { %3583 = vmatprep.subr.bf16.mxu1 %v6165_v53  ;;  %v6217_v53 = vld [vmem:[#allocation6 + $0x260] ss:$16 sps:$4 sm:$0xff]  }
 0x1e2   :  { %3543 = vmatpush2.bf16.msra.mxu0 %v6160_v54  ;;  %v6222_v54 = vld [vmem:[#allocation6 + $0x44] ss:$16 sps:$4 sm:$0xff]  }
 0x1e3   :  { %3584 = vmatpush2.bf16.msra.mxu1 %v6163_v55  ;;  %3544 = vmatprep.subr.bf16.mxu0 %v6168_v56  ;;  %v6223_v55 = vld [vmem:[#allocation6 + $0x240] ss:$16 sps:$4 sm:$0xff]   ;;  %v6228_v56 = vld [vmem:[#allocation6 + $0x24] ss:$16 sps:$4 sm:$0xff]  }
 0x1e4   :  { %3585 = vmatprep.subr.bf16.mxu1 %v6171_v57  ;;  %v6231_v57 = vld [vmem:[#allocation6 + $0x224] ss:$16 sps:$4 sm:$0xff]  }
 0x1e6   :  { %3545 = vmatpush2.bf16.msra.mxu0 %v6166_v30  ;;  %v6226_v30 = vld [vmem:[#allocation6 + $0x20] ss:$16 sps:$4 sm:$0xff]  }
 0x1e7   :  { %3586 = vmatpush2.bf16.msra.mxu1 %v6169_v31  ;;  %3546 = vmatprep.subr.bf16.mxu0 %v6174_v58  ;;  %v6229_v31 = vld [vmem:[#allocation6 + $0x220] ss:$16 sps:$4 sm:$0xff]   ;;  %v6234_v58 = vld [vmem:[#allocation6 + $0x4] ss:$16 sps:$4 sm:$0xff]  }
 0x1e8   :  { %3587 = vmatprep.subr.bf16.mxu1 %v6177_v59  ;;  %v6237_v59 = vld [vmem:[#allocation6 + $0x204] ss:$16 sps:$4 sm:$0xff]  }
 0x1ea   :  { %3547 = vmatpush2.bf16.msra.mxu0 %v6172_v60  ;;  %v6232_v60 = vld [vmem:[#allocation6] ss:$16 sps:$4 sm:$0xff]  }
 0x1eb   :  { %3588 = vmatpush2.bf16.msra.mxu1 %v6175_v61  ;;  %3548 = vmatprep.subr.bf16.mxu0 %v6180_v62  ;;  %v6235_v61 = vld [vmem:[#allocation6 + $0x200] ss:$16 sps:$4 sm:$0xff]   ;;  %v6240_v62 = vld [vmem:[#allocation6 + $0x1e4] ss:$16 sps:$4 sm:$0xff]  }
 0x1ec   :  { %3589 = vmatprep.subr.bf16.mxu1 %v6183_v0  ;;  %v6243_v0 = vld [vmem:[#allocation6 + $0x3e4] ss:$16 sps:$4 sm:$0xff]  }
 0x1ee   :  { %3549 = vmatpush2.bf16.msra.mxu0 %v6178_v28  ;;  %v6238_v28 = vld [vmem:[#allocation6 + $0x1e0] ss:$16 sps:$4 sm:$0xff]  }
 0x1ef   :  { %3590 = vmatpush2.bf16.msra.mxu1 %v6181_v1  ;;  %3550 = vmatprep.subr.bf16.mxu0 %v6186_v29  ;;  %v6241_v1 = vld [vmem:[#allocation6 + $0x3e0] ss:$16 sps:$4 sm:$0xff]   ;;  %v6246_v29 = vld [vmem:[#allocation6 + $0x1c4] ss:$16 sps:$4 sm:$0xff]  }
 0x1f0   :  { %3591 = vmatprep.subr.bf16.mxu1 %v6189_v2  ;;  %v6249_v2 = vld [vmem:[#allocation6 + $0x3c4] ss:$16 sps:$4 sm:$0xff]  }
 0x1f2   :  { %3551 = vmatpush2.bf16.msra.mxu0 %v6184_v3  ;;  %v6244_v3 = vld [vmem:[#allocation6 + $0x1c0] ss:$16 sps:$4 sm:$0xff]  }
 0x1f3   :  { %3592 = vmatpush2.bf16.msra.mxu1 %v6187_v5  ;;  %4242 = vmatprep.subr.bf16.mxu0 %v6192_v10  ;;  %v6247_v5 = vld [vmem:[#allocation6 + $0x3c0] ss:$16 sps:$4 sm:$0xff]   ;;  %v6255_v10 = vld [vmem:[#allocation6 + $0x3a4] ss:$16 sps:$4 sm:$0xff]  }
 0x1f4   :  { %4283 = vmatprep.subr.bf16.mxu1 %v6195_v11  ;;  %v6250_v11 = vld [vmem:[#allocation6 + $0x1a0] ss:$16 sps:$4 sm:$0xff]  }
 0x1f5   :  { %v2723_v21 = vpop.f32.mrf.mxu0  ;;  %3553 = vmatmul.mubr.bf16.vlgmr.msra.gmra.mxu0 %v116_v12 }
 0x1f6   :  { %v2764_v63 = vpop.f32.mrf.mxu1  ;;  %3594 = vmatmul.mubr.bf16.vlgmr.msra.gmra.mxu1 %v116_v12  ;;  %4243 = vmatpush1.bf16.msra.mxu0 %v6190_v15  ;;  %v6253_v12 = vld [vmem:[#allocation6 + $0x3a0] ss:$16 sps:$4 sm:$0xff]   ;;  %v6258_v15 = vld [vmem:[#allocation6 + $0x184] ss:$16 sps:$4 sm:$0xff]  }
 0x1f7   :  { %v2765_v6 = vadd.f32 %v2764_v63, %v2723_v21  ;;  %4284 = vmatpush1.bf16.msra.mxu1 %v6193_v16  ;;  %v2725_v13 = vpop.f32.mrf.mxu0  ;;  %4244 = vmatprep.subr.bf16.mxu0 %v6198_v18  ;;  %v6261_v16 = vld [vmem:[#allocation6 + $0x384] ss:$16 sps:$4 sm:$0xff]   ;;  %v6256_v18 = vld [vmem:[#allocation6 + $0x180] ss:$16 sps:$4 sm:$0xff]  }
 0x1f8   :  { %v2766_v27 = vpop.f32.mrf.mxu1  ;;  %4285 = vmatprep.subr.bf16.mxu1 %v6201_v19  ;;  %v6259_v19 = vld [vmem:[#allocation6 + $0x380] ss:$16 sps:$4 sm:$0xff]   ;;  %v6267_v21 = vld [vmem:[#allocation6 + $0x364] ss:$16 sps:$4 sm:$0xff]  }
 0x1f9   :  { %v2958_v34 = vadd.f32 %v2947_v20, %v2765_v6  ;;  %v2767_v35 = vadd.f32 %v2766_v27, %v2725_v13  ;;  %v2727_v37 = vpop.f32.mrf.mxu0  ;;  %v6264_v20 = vld [vmem:[#allocation6 + $0x164] ss:$16 sps:$4 sm:$0xff]   ;;  %v6262_v63 = vld [vmem:[#allocation6 + $0x160] ss:$16 sps:$4 sm:$0xff]  }
 0x1fa   :  { %v2768_v38 = vpop.f32.mrf.mxu1  ;;  %4245 = vmatpush1.bf16.msra.mxu0 %v6196_v25  ;;  %v6265_v6 = vld [vmem:[#allocation6 + $0x360] ss:$16 sps:$4 sm:$0xff]   ;;  %v6273_v25 = vld [vmem:[#allocation6 + $0x344] ss:$16 sps:$4 sm:$0xff]  }
 0x1fb   :  { %v2959_v39 = vadd.f32 %v2951_v24, %v2767_v35  ;;  %v2987_v8 = vmul.f32 %v2958_v34, %v6754_v41  ;;  %4286 = vmatpush1.bf16.msra.mxu1 %v6199_v26  ;;  %v2728_v36 = vpop.f32.mrf.mxu0  ;;  %4246 = vmatprep.subr.bf16.mxu0 %v6204_v32  ;;  %v6216_v41 = vld [vmem:[#allocation6 + $0x64] ss:$16 sps:$4 sm:$0xff]   ;;  %v6268_v26 = vld [vmem:[#allocation6 + $0x140] ss:$16 sps:$4 sm:$0xff]  }
 0x1fc   :  { %v2769_v40 = vpop.f32.mrf.mxu1  ;;  %4287 = vmatprep.subr.bf16.mxu1 %v6207_v33  ;;  %v6270_v24 = vld [vmem:[#allocation6 + $0x144] ss:$16 sps:$4 sm:$0xff]   ;;  %v6271_v13 = vld [vmem:[#allocation6 + $0x340] ss:$16 sps:$4 sm:$0xff]  }
 0x1fd   :  { %v2988_v44 = vmul.f32 %v2959_v39, %v6758_v48  ;;  %v2990_v45 = vadd.f32 %v6776_v17, %v2987_v8  ;;  %v6225_v48 = vld [vmem:[#allocation6 + $0x244] ss:$16 sps:$4 sm:$0xff]   ;;  %v6220_v17 = vld [vmem:[#allocation6 + $0x40] ss:$16 sps:$4 sm:$0xff]   ;;  %v6288_v8 = vld [vmem:[#allocation6 + $0xec] ss:$16 sps:$4 sm:$0xff]  }
 0x1fe   :  { %4247 = vmatpush1.bf16.msra.mxu0 %v6202_v46  ;;  %v6276_v27 = vld [vmem:[#allocation6 + $0x124] ss:$16 sps:$4 sm:$0xff]   ;;  %v6274_v33 = vld [vmem:[#allocation6 + $0x120] ss:$16 sps:$4 sm:$0xff]   ;;  %v6291_v46 = vld [vmem:[#allocation6 + $0x2ec] ss:$16 sps:$4 sm:$0xff]  }
 0x1ff   :  { %v2991_v47 = vadd.f32 %v2990_v45, %v2988_v44  ;;  %4288 = vmatpush1.bf16.msra.mxu1 %v6205_v9  ;;  %4248 = vmatprep.subr.bf16.mxu0 %v6210_v42  ;;  %v6279_v32 = vld [vmem:[#allocation6 + $0x324] ss:$16 sps:$4 sm:$0xff]   ;;  %v6277_v34 = vld [vmem:[#allocation6 + $0x320] ss:$16 sps:$4 sm:$0xff]  }
 0x200   :  { %4289 = vmatprep.subr.bf16.mxu1 %v6213_v43  ;;  %v6282_v35 = vld [vmem:[#allocation6 + $0x104] ss:$16 sps:$4 sm:$0xff]   ;;  %v6280_v38 = vld [vmem:[#allocation6 + $0x100] ss:$16 sps:$4 sm:$0xff]  }
 0x201   :  { %2992 = vadd.xlane.f32.xlu0 %v2991_v47  ;;  %v6285_v37 = vld [vmem:[#allocation6 + $0x304] ss:$16 sps:$4 sm:$0xff]   ;;  %v6283_v39 = vld [vmem:[#allocation6 + $0x300] ss:$16 sps:$4 sm:$0xff]  }
 0x202   :  { %4249 = vmatpush1.bf16.msra.mxu0 %v6208_v49 }
 0x203   :  { %4290 = vmatpush1.bf16.msra.mxu1 %v6211_v50  ;;  %4250 = vmatprep.subr.bf16.mxu0 %v6216_v41 }
 0x204   :  { %4291 = vmatprep.subr.bf16.mxu1 %v6219_v51 }
 0x206   :  { %4251 = vmatpush1.bf16.msra.mxu0 %v6214_v52 }
 0x207   :  { %4292 = vmatpush1.bf16.msra.mxu1 %v6217_v53  ;;  %4252 = vmatprep.subr.bf16.mxu0 %v6222_v54 }
 0x208   :  { %4293 = vmatprep.subr.bf16.mxu1 %v6225_v48 }
 0x20a   :  { %4253 = vmatpush1.bf16.msra.mxu0 %v6220_v17 }
 0x20b   :  { %4294 = vmatpush1.bf16.msra.mxu1 %v6223_v55  ;;  %4254 = vmatprep.subr.bf16.mxu0 %v6228_v56 }
 0x20c   :  { %4295 = vmatprep.subr.bf16.mxu1 %v6231_v57 }
 0x20e   :  { %4255 = vmatpush1.bf16.msra.mxu0 %v6226_v30 }
 0x20f   :  { %4296 = vmatpush1.bf16.msra.mxu1 %v6229_v31  ;;  %4256 = vmatprep.subr.bf16.mxu0 %v6234_v58  ;;  %v93_v58 = vld [vmem:[%s6905_s9 + $0x8] sm:$0xf] }
 0x210   :  { %4297 = vmatprep.subr.bf16.mxu1 %v6237_v59 }
 0x212   :  { %4257 = vmatpush1.bf16.msra.mxu0 %v6232_v60  ;;  %v2972_v60 = vrot.slane %v93_v58, %v6743_v4 }
 0x213   :  { %4298 = vmatpush1.bf16.msra.mxu1 %v6235_v61  ;;  %4258 = vmatprep.subr.bf16.mxu0 %v6240_v62  ;;  %v2976_v62 = vrot.slane %v93_v58, %v6746_v14 }
 0x214   :  { %4299 = vmatprep.subr.bf16.mxu1 %v6243_v0  ;;  %v2964_v0 = vrot.slane %v93_v58, %v6720_v22 }
 0x216   :  { %4259 = vmatpush2.bf16.msra.mxu0 %v6238_v28  ;;  %v2968_v28 = vrot.slane %v93_v58, %v6723_v23  ;;  %v6334_v58 = vld [vmem:[#allocation6 + $0x1e8] ss:$16 sps:$4 sm:$0xff]  }
 0x217   :  { %4300 = vmatpush2.bf16.msra.mxu1 %v6241_v1  ;;  %4260 = vmatprep.subr.bf16.mxu0 %v6246_v29 }
 0x218   :  { %4301 = vmatprep.subr.bf16.mxu1 %v6249_v2 }
 0x21a   :  { %4261 = vmatpush2.bf16.msra.mxu0 %v6244_v3 }
 0x21b   :  { %4302 = vmatpush2.bf16.msra.mxu1 %v6247_v5  ;;  %4262 = vmatprep.subr.bf16.mxu0 %v6252_v7 }
 0x21c   :  { %4303 = vmatprep.subr.bf16.mxu1 %v6255_v10 }
 0x21e   :  { %4263 = vmatpush2.bf16.msra.mxu0 %v6250_v11 }
 0x21f   :  { %4304 = vmatpush2.bf16.msra.mxu1 %v6253_v12  ;;  %4264 = vmatprep.subr.bf16.mxu0 %v6258_v15 }
 0x220   :  { %4305 = vmatprep.subr.bf16.mxu1 %v6261_v16 }
 0x222   :  { %4265 = vmatpush2.bf16.msra.mxu0 %v6256_v18 }
 0x223   :  { %4306 = vmatpush2.bf16.msra.mxu1 %v6259_v19  ;;  %4266 = vmatprep.subr.bf16.mxu0 %v6264_v20  ;;  %v6286_v19 = vld [vmem:[#allocation6 + $0xe8] ss:$16 sps:$4 sm:$0xff]  }
 0x224   :  { %4307 = vmatprep.subr.bf16.mxu1 %v6267_v21  ;;  %v6289_v20 = vld [vmem:[#allocation6 + $0x2e8] ss:$16 sps:$4 sm:$0xff]  }
 0x226   :  { %4267 = vmatpush2.bf16.msra.mxu0 %v6262_v63  ;;  %v6294_v63 = vld [vmem:[#allocation6 + $0xcc] ss:$16 sps:$4 sm:$0xff]  }
 0x227   :  { %4308 = vmatpush2.bf16.msra.mxu1 %v6265_v6  ;;  %4268 = vmatprep.subr.bf16.mxu0 %v6270_v24  ;;  %v6297_v6 = vld [vmem:[#allocation6 + $0x2cc] ss:$16 sps:$4 sm:$0xff]   ;;  %v6292_v24 = vld [vmem:[#allocation6 + $0xc8] ss:$16 sps:$4 sm:$0xff]  }
 0x228   :  { %4309 = vmatprep.subr.bf16.mxu1 %v6273_v25  ;;  %v6295_v25 = vld [vmem:[#allocation6 + $0x2c8] ss:$16 sps:$4 sm:$0xff]  }
 0x22a   :  { %4269 = vmatpush2.bf16.msra.mxu0 %v6268_v26  ;;  %v6300_v26 = vld [vmem:[#allocation6 + $0xac] ss:$16 sps:$4 sm:$0xff]  }
 0x22b   :  { %4310 = vmatpush2.bf16.msra.mxu1 %v6271_v13  ;;  %4270 = vmatprep.subr.bf16.mxu0 %v6276_v27  ;;  %v6303_v13 = vld [vmem:[#allocation6 + $0x2ac] ss:$16 sps:$4 sm:$0xff]   ;;  %v6298_v27 = vld [vmem:[#allocation6 + $0xa8] ss:$16 sps:$4 sm:$0xff]  }
 0x22c   :  { %4311 = vmatprep.subr.bf16.mxu1 %v6279_v32  ;;  %v6301_v32 = vld [vmem:[#allocation6 + $0x2a8] ss:$16 sps:$4 sm:$0xff]  }
 0x22e   :  { %4271 = vmatpush2.bf16.msra.mxu0 %v6274_v33  ;;  %v6306_v33 = vld [vmem:[#allocation6 + $0x8c] ss:$16 sps:$4 sm:$0xff]  }
 0x22f   :  { %4312 = vmatpush2.bf16.msra.mxu1 %v6277_v34  ;;  %4272 = vmatprep.subr.bf16.mxu0 %v6282_v35  ;;  %v6309_v34 = vld [vmem:[#allocation6 + $0x28c] ss:$16 sps:$4 sm:$0xff]  }
 0x230   :  { %4313 = vmatprep.subr.bf16.mxu1 %v6285_v37 }
 0x232   :  { %4273 = vmatpush2.bf16.msra.mxu0 %v6280_v38 }
 0x233   :  { %4314 = vmatpush2.bf16.msra.mxu1 %v6283_v39  ;;  %4324 = vmatprep.subr.bf16.mxu0 %v6288_v8  ;;  %v6304_v8 = vld [vmem:[#allocation6 + $0x88] ss:$16 sps:$4 sm:$0xff]  }
 0x234   :  { %4365 = vmatprep.subr.bf16.mxu1 %v6291_v46  ;;  %v6307_v46 = vld [vmem:[#allocation6 + $0x288] ss:$16 sps:$4 sm:$0xff]  }
 0x235   :  { %v2805_v9 = vpop.f32.mrf.mxu0 }
 0x236   :  { %v2846_v36 = vpop.f32.mrf.mxu1 }
 0x237   :  { %v2847_v40 = vadd.f32 %v2846_v36, %v2805_v9  ;;  %v2807_v42 = vpop.f32.mrf.mxu0  ;;  %v6312_v9 = vld [vmem:[#allocation6 + $0x6c] ss:$16 sps:$4 sm:$0xff]  }
 0x238   :  { %v2848_v43 = vpop.f32.mrf.mxu1  ;;  %v6315_v36 = vld [vmem:[#allocation6 + $0x26c] ss:$16 sps:$4 sm:$0xff]  }
 0x239   :  { %v2849_v44 = vadd.f32 %v2848_v43, %v2807_v42  ;;  %v2809_v45 = vpop.f32.mrf.mxu0  ;;  %v2981_v2 = vadd.f32 %v2964_v0, %v2847_v40  ;;  %v6343_v0 = vld [vmem:[#allocation6 + $0x3c8] ss:$16 sps:$4 sm:$0xff]  }
 0x23a   :  { %v2850_v47 = vpop.f32.mrf.mxu1  ;;  %v6310_v45 = vld [vmem:[#allocation6 + $0x68] ss:$16 sps:$4 sm:$0xff]  }
 0x23b   :  { %v2810_v49 = vpop.f32.mrf.mxu0  ;;  %v2982_v3 = vadd.f32 %v2968_v28, %v2849_v44  ;;  %v6313_v47 = vld [vmem:[#allocation6 + $0x268] ss:$16 sps:$4 sm:$0xff]   ;;  %v6348_v28 = vld [vmem:[#allocation6 + $0x1ac] ss:$16 sps:$4 sm:$0xff]  }
 0x23c   :  { %v2851_v50 = vpop.f32.mrf.mxu1  ;;  %v6318_v49 = vld [vmem:[#allocation6 + $0x4c] ss:$16 sps:$4 sm:$0xff]  }
 0x23d   :  { %v6321_v50 = vld [vmem:[#allocation6 + $0x24c] ss:$16 sps:$4 sm:$0xff]  }
 0x275   :  { %v2887_v41 = vpop.f32.mrf.mxu0 }
 0x276   :  { %v2928_v51 = vpop.f32.mrf.mxu1 }
 0x277   :  { %v2889_v52 = vpop.f32.mrf.mxu0  ;;  %v2929_v59 = vadd.f32 %v2928_v51, %v2887_v41  ;;  %v6316_v41 = vld [vmem:[#allocation6 + $0x48] ss:$16 sps:$4 sm:$0xff]  }
 0x278   :  { %v2930_v53 = vpop.f32.mrf.mxu1  ;;  %v6319_v51 = vld [vmem:[#allocation6 + $0x248] ss:$16 sps:$4 sm:$0xff]  }
 0x279   :  { %v2891_v54 = vpop.f32.mrf.mxu0  ;;  %v2931_v61 = vadd.f32 %v2930_v53, %v2889_v52  ;;  %v2983_v1 = vadd.f32 %v2972_v60, %v2929_v59  ;;  %v6324_v52 = vld [vmem:[#allocation6 + $0x2c] ss:$16 sps:$4 sm:$0xff]   ;;  %v6337_v59 = vld [vmem:[#allocation6 + $0x3e8] ss:$16 sps:$4 sm:$0xff]  }
 0x27a   :  { %v2932_v48 = vpop.f32.mrf.mxu1  ;;  %v6327_v53 = vld [vmem:[#allocation6 + $0x22c] ss:$16 sps:$4 sm:$0xff]   ;;  %v6322_v54 = vld [vmem:[#allocation6 + $0x28] ss:$16 sps:$4 sm:$0xff]  }
 0x27b   :  { %v2892_v17 = vpop.f32.mrf.mxu0  ;;  %v2984_v29 = vadd.f32 %v2976_v62, %v2931_v61  ;;  %v6325_v48 = vld [vmem:[#allocation6 + $0x228] ss:$16 sps:$4 sm:$0xff]   ;;  %v6342_v60 = vld [vmem:[#allocation6 + $0x1cc] ss:$16 sps:$4 sm:$0xff]  }
 0x27c   :  { %v2933_v55 = vpop.f32.mrf.mxu1  ;;  %v6330_v17 = vld [vmem:[#allocation6 + $0xc] ss:$16 sps:$4 sm:$0xff]   ;;  %v6340_v62 = vld [vmem:[#allocation6 + $0x1c8] ss:$16 sps:$4 sm:$0xff]  }
 0x27d   :  { %v6333_v55 = vld [vmem:[#allocation6 + $0x20c] ss:$16 sps:$4 sm:$0xff]  }
 0x27e   :  { %v6345_v61 = vld [vmem:[#allocation6 + $0x3cc] ss:$16 sps:$4 sm:$0xff]  }
 0x28a   :  { %v2993_v56 = vpop.xlane.xlu0 %2992 }
 0x28b   :  { %v5571_v57 = vmul.f32 -1.442695, %v2993_v56  ;;  %v6328_v56 = vld [vmem:[#allocation6 + $0x8] ss:$16 sps:$4 sm:$0xff]  }
 0x28d   :  { %6498 = vpow2.f32 %v5571_v57  ;;  %v6331_v57 = vld [vmem:[#allocation6 + $0x208] ss:$16 sps:$4 sm:$0xff]  }
 0x29a   :  { %v6499_v30 = vpop.eup %6498 }
 0x29b   :  { %v2997_v31 = vadd.f32 1.0, %v6499_v30  ;;  %v6336_v30 = vld [vmem:[#allocation6 + $0x1ec] ss:$16 sps:$4 sm:$0xff]  }
 0x29d   :  { %6500 = vrcp.f32 %v2997_v31  ;;  %v6339_v31 = vld [vmem:[#allocation6 + $0x3ec] ss:$16 sps:$4 sm:$0xff]  }
 0x2aa   :  { %v6501_v5 = vpop.eup %6500 }
 0x2ab   :  { %v3002_v7 = vmul.f32 %v6501_v5, %v2983_v1  ;;  %v3001_v10 = vmul.f32 %v6501_v5, %v2982_v3  ;;  %v3003_v11 = vmul.f32 %v6501_v5, %v2984_v29  ;;  %v3000_v12 = vmul.f32 %v6501_v5, %v2981_v2  ;;  %v6351_v1 = vld [vmem:[#allocation6 + $0x3ac] ss:$16 sps:$4 sm:$0xff]   ;;  %v6346_v29 = vld [vmem:[#allocation6 + $0x1a8] ss:$16 sps:$4 sm:$0xff]  }
 0x2ac   :  { %v6349_v2 = vld [vmem:[#allocation6 + $0x3a8] ss:$16 sps:$4 sm:$0xff]   ;;  %v6354_v3 = vld [vmem:[#allocation6 + $0x18c] ss:$16 sps:$4 sm:$0xff]  }
 0x2ad   :  { %v6795_v15 = vpack.c.bf16 %v3002_v7, %v3002_v7  ;;  %v3005_v16 = vpack.c.bf16 %v3001_v10, %v3001_v10  ;;  %v3007_v18 = vpack.c.bf16 %v3003_v11, %v3003_v11  ;;  %v6797_v21 = vpack.c.bf16 %v3000_v12, %v3000_v12  ;;  %v6357_v5 = vld [vmem:[#allocation6 + $0x38c] ss:$16 sps:$4 sm:$0xff]   ;;  %v6352_v7 = vld [vmem:[#allocation6 + $0x188] ss:$16 sps:$4 sm:$0xff]  }
 0x2ae   :  { %v6355_v10 = vld [vmem:[#allocation6 + $0x388] ss:$16 sps:$4 sm:$0xff]   ;;  %v6360_v11 = vld [vmem:[#allocation6 + $0x16c] ss:$16 sps:$4 sm:$0xff]  }
 0x2af   :  { %4274 = vmatprep.mubr.bf16.mxu0 %v3005_v16  ;;  %4315 = vmatprep.mubr.bf16.mxu1 %v3007_v18  ;;  %v6363_v12 = vld [vmem:[#allocation6 + $0x36c] ss:$16 sps:$4 sm:$0xff]  }
 0x2b0   :  { %4275 = vmatmul.mubr.bf16.vlgmr.msra.gmra.mxu0 %v6797_v21  ;;  %4316 = vmatmul.mubr.bf16.vlgmr.msra.gmra.mxu1 %v6795_v15 }
 0x2b1   :  { %4325 = vmatpush1.bf16.msra.mxu0 %v6286_v19  ;;  %4366 = vmatpush1.bf16.msra.mxu1 %v6289_v20  ;;  %v6366_v19 = vld [vmem:[#allocation6 + $0x14c] ss:$16 sps:$4 sm:$0xff]  }
 0x2b2   :  { %4356 = vmatprep.mubr.bf16.mxu0 %v3005_v16  ;;  %4397 = vmatprep.mubr.bf16.mxu1 %v3007_v18  ;;  %v6358_v16 = vld [vmem:[#allocation6 + $0x168] ss:$16 sps:$4 sm:$0xff]   ;;  %v6369_v20 = vld [vmem:[#allocation6 + $0x34c] ss:$16 sps:$4 sm:$0xff]  }
 0x2b3   :  { %4326 = vmatprep.subr.bf16.mxu0 %v6294_v63  ;;  %4367 = vmatprep.subr.bf16.mxu1 %v6297_v6  ;;  %v6361_v18 = vld [vmem:[#allocation6 + $0x368] ss:$16 sps:$4 sm:$0xff]  }
 0x2b4   :  { %v6364_v63 = vld [vmem:[#allocation6 + $0x148] ss:$16 sps:$4 sm:$0xff]  }
 0x2b5   :  { %4327 = vmatpush1.bf16.msra.mxu0 %v6292_v24  ;;  %4368 = vmatpush1.bf16.msra.mxu1 %v6295_v25  ;;  %v6801_v35 = vpop.f32.mrf.mxu0  ;;  %v6367_v6 = vld [vmem:[#allocation6 + $0x348] ss:$16 sps:$4 sm:$0xff]   ;;  %v6372_v24 = vld [vmem:[#allocation6 + $0x12c] ss:$16 sps:$4 sm:$0xff]  }
 0x2b6   :  { %4328 = vmatprep.subr.bf16.mxu0 %v6300_v26  ;;  %4369 = vmatprep.subr.bf16.mxu1 %v6303_v13  ;;  %v6803_v37 = vpop.f32.mrf.mxu1  ;;  %v6375_v25 = vld [vmem:[#allocation6 + $0x32c] ss:$16 sps:$4 sm:$0xff]   ;;  %v6370_v26 = vld [vmem:[#allocation6 + $0x128] ss:$16 sps:$4 sm:$0xff]  }
 0x2b7   :  { %v6805_v38 = vpop.f32.mrf.mxu0  ;;  %v6373_v13 = vld [vmem:[#allocation6 + $0x328] ss:$16 sps:$4 sm:$0xff]  }
 0x2b8   :  { %v6807_v39 = vpop.f32.mrf.mxu1 }
 0x2b9   :  { %4329 = vmatpush1.bf16.msra.mxu0 %v6298_v27  ;;  %4370 = vmatpush1.bf16.msra.mxu1 %v6301_v32  ;;  %v3558_v40 = vpop.f32.mrf.mxu0  ;;  %v6378_v27 = vld [vmem:[#allocation6 + $0x10c] ss:$16 sps:$4 sm:$0xff]  }
 0x2ba   :  { %4330 = vmatprep.subr.bf16.mxu0 %v6306_v33  ;;  %4371 = vmatprep.subr.bf16.mxu1 %v6309_v34  ;;  %v3599_v42 = vpop.f32.mrf.mxu1  ;;  %v6381_v32 = vld [vmem:[#allocation6 + $0x30c] ss:$16 sps:$4 sm:$0xff]   ;;  %v6376_v33 = vld [vmem:[#allocation6 + $0x108] ss:$16 sps:$4 sm:$0xff]  }
 0x2bb   :  { %v3559_v43 = vpop.f32.mrf.mxu0  ;;  %v6379_v34 = vld [vmem:[#allocation6 + $0x308] ss:$16 sps:$4 sm:$0xff]   ;;  %v6390_v40 = vld [vmem:[#allocation7 + $0x54] ss:$8 sps:$4 sm:$0xff]  }
 0x2bc   :  { %v3600_v44 = vpop.f32.mrf.mxu1  ;;  %v6388_v42 = vld [vmem:[#allocation7 + $0x50] ss:$8 sps:$4 sm:$0xff]   ;;  %v6393_v43 = vld [vmem:[#allocation7 + $0x44] ss:$8 sps:$4 sm:$0xff]  }
 0x2bd   :  { %4331 = vmatpush1.bf16.msra.mxu0 %v6304_v8  ;;  %4372 = vmatpush1.bf16.msra.mxu1 %v6307_v46  ;;  %v6384_v8 = vld [vmem:[#allocation7 + $0x74] ss:$8 sps:$4 sm:$0xff]   ;;  %v6382_v46 = vld [vmem:[#allocation7 + $0x70] ss:$8 sps:$4 sm:$0xff]   ;;  %v6391_v44 = vld [vmem:[#allocation7 + $0x40] ss:$8 sps:$4 sm:$0xff]  }
 0x2be   :  { %4332 = vmatprep.subr.bf16.mxu0 %v6312_v9  ;;  %4373 = vmatprep.subr.bf16.mxu1 %v6315_v36  ;;  %v6387_v9 = vld [vmem:[#allocation7 + $0x64] ss:$8 sps:$4 sm:$0xff]   ;;  %v6385_v36 = vld [vmem:[#allocation7 + $0x60] ss:$8 sps:$4 sm:$0xff]  }
 0x2c1   :  { %4333 = vmatpush1.bf16.msra.mxu0 %v6310_v45  ;;  %4374 = vmatpush1.bf16.msra.mxu1 %v6313_v47  ;;  %v6396_v45 = vld [vmem:[#allocation7 + $0x34] ss:$8 sps:$4 sm:$0xff]  }
 0x2c2   :  { %4334 = vmatprep.subr.bf16.mxu0 %v6318_v49  ;;  %4375 = vmatprep.subr.bf16.mxu1 %v6321_v50  ;;  %v6432_v47 = vld [vmem:[#allocation7 + $0x174] ss:$8 sps:$4 sm:$0xff]   ;;  %v6394_v49 = vld [vmem:[#allocation7 + $0x30] ss:$8 sps:$4 sm:$0xff]  }
 0x2c3   :  { %v6430_v50 = vld [vmem:[#allocation7 + $0x170] ss:$8 sps:$4 sm:$0xff]  }
 0x2c5   :  { %4335 = vmatpush1.bf16.msra.mxu0 %v6316_v41  ;;  %4376 = vmatpush1.bf16.msra.mxu1 %v6319_v51  ;;  %v6433_v41 = vld [vmem:[#allocation7 + $0x160] ss:$8 sps:$4 sm:$0xff]   ;;  %v6438_v51 = vld [vmem:[#allocation7 + $0x154] ss:$8 sps:$4 sm:$0xff]  }
 0x2c6   :  { %4336 = vmatprep.subr.bf16.mxu0 %v6324_v52  ;;  %4377 = vmatprep.subr.bf16.mxu1 %v6327_v53  ;;  %v6397_v52 = vld [vmem:[#allocation7 + $0x20] ss:$8 sps:$4 sm:$0xff]   ;;  %v6402_v53 = vld [vmem:[#allocation7 + $0x14] ss:$8 sps:$4 sm:$0xff]  }
 0x2c9   :  { %4337 = vmatpush1.bf16.msra.mxu0 %v6322_v54  ;;  %4378 = vmatpush1.bf16.msra.mxu1 %v6325_v48  ;;  %v6436_v54 = vld [vmem:[#allocation7 + $0x150] ss:$8 sps:$4 sm:$0xff]   ;;  %v6441_v48 = vld [vmem:[#allocation7 + $0x144] ss:$8 sps:$4 sm:$0xff]  }
 0x2ca   :  { %4338 = vmatprep.subr.bf16.mxu0 %v6330_v17  ;;  %4379 = vmatprep.subr.bf16.mxu1 %v6333_v55  ;;  %v6400_v17 = vld [vmem:[#allocation7 + $0x10] ss:$8 sps:$4 sm:$0xff]   ;;  %v6405_v55 = vld [vmem:[#allocation7 + $0x4] ss:$8 sps:$4 sm:$0xff]  }
 0x2cd   :  { %4339 = vmatpush1.bf16.msra.mxu0 %v6328_v56  ;;  %4380 = vmatpush1.bf16.msra.mxu1 %v6331_v57  ;;  %v6439_v56 = vld [vmem:[#allocation7 + $0x140] ss:$8 sps:$4 sm:$0xff]   ;;  %v6444_v57 = vld [vmem:[#allocation7 + $0x134] ss:$8 sps:$4 sm:$0xff]  }
 0x2ce   :  { %4340 = vmatprep.subr.bf16.mxu0 %v6336_v30  ;;  %4381 = vmatprep.subr.bf16.mxu1 %v6339_v31  ;;  %v6403_v30 = vld [vmem:[#allocation7] ss:$8 sps:$4 sm:$0xff]   ;;  %v6408_v31 = vld [vmem:[#allocation7 + $0xf4] ss:$8 sps:$4 sm:$0xff]  }
 0x2d1   :  { %4341 = vmatpush2.bf16.msra.mxu0 %v6334_v58  ;;  %4382 = vmatpush2.bf16.msra.mxu1 %v6337_v59  ;;  %v6442_v58 = vld [vmem:[#allocation7 + $0x130] ss:$8 sps:$4 sm:$0xff]   ;;  %v6447_v59 = vld [vmem:[#allocation7 + $0x124] ss:$8 sps:$4 sm:$0xff]  }
 0x2d2   :  { %4342 = vmatprep.subr.bf16.mxu0 %v6342_v60  ;;  %4383 = vmatprep.subr.bf16.mxu1 %v6345_v61  ;;  %v6406_v60 = vld [vmem:[#allocation7 + $0xf0] ss:$8 sps:$4 sm:$0xff]   ;;  %v6411_v61 = vld [vmem:[#allocation7 + $0xe4] ss:$8 sps:$4 sm:$0xff]  }
 0x2d5   :  { %4343 = vmatpush2.bf16.msra.mxu0 %v6340_v62  ;;  %4384 = vmatpush2.bf16.msra.mxu1 %v6343_v0  ;;  %v6445_v62 = vld [vmem:[#allocation7 + $0x120] ss:$8 sps:$4 sm:$0xff]   ;;  %v6450_v0 = vld [vmem:[#allocation7 + $0x114] ss:$8 sps:$4 sm:$0xff]  }
 0x2d6   :  { %4344 = vmatprep.subr.bf16.mxu0 %v6348_v28  ;;  %4385 = vmatprep.subr.bf16.mxu1 %v6351_v1  ;;  %v6409_v28 = vld [vmem:[#allocation7 + $0xe0] ss:$8 sps:$4 sm:$0xff]   ;;  %v6414_v1 = vld [vmem:[#allocation7 + $0xd4] ss:$8 sps:$4 sm:$0xff]  }
 0x2d9   :  { %4345 = vmatpush2.bf16.msra.mxu0 %v6346_v29  ;;  %4386 = vmatpush2.bf16.msra.mxu1 %v6349_v2  ;;  %v6448_v29 = vld [vmem:[#allocation7 + $0x110] ss:$8 sps:$4 sm:$0xff]   ;;  %v6453_v2 = vld [vmem:[#allocation7 + $0x104] ss:$8 sps:$4 sm:$0xff]  }
 0x2da   :  { %4346 = vmatprep.subr.bf16.mxu0 %v6354_v3  ;;  %4387 = vmatprep.subr.bf16.mxu1 %v6357_v5  ;;  %v6412_v3 = vld [vmem:[#allocation7 + $0xd0] ss:$8 sps:$4 sm:$0xff]   ;;  %v6417_v5 = vld [vmem:[#allocation7 + $0xc4] ss:$8 sps:$4 sm:$0xff]  }
 0x2dd   :  { %4347 = vmatpush2.bf16.msra.mxu0 %v6352_v7  ;;  %4388 = vmatpush2.bf16.msra.mxu1 %v6355_v10  ;;  %v6451_v7 = vld [vmem:[#allocation7 + $0x100] ss:$8 sps:$4 sm:$0xff]   ;;  %v6456_v10 = vld [vmem:[#allocation7 + $0x1f4] ss:$8 sps:$4 sm:$0xff]  }
 0x2de   :  { %4348 = vmatprep.subr.bf16.mxu0 %v6360_v11  ;;  %4389 = vmatprep.subr.bf16.mxu1 %v6363_v12  ;;  %v6415_v11 = vld [vmem:[#allocation7 + $0xc0] ss:$8 sps:$4 sm:$0xff]   ;;  %v6420_v12 = vld [vmem:[#allocation7 + $0xb4] ss:$8 sps:$4 sm:$0xff]  }
 0x2e1   :  { %4349 = vmatpush2.bf16.msra.mxu0 %v6358_v16  ;;  %4390 = vmatpush2.bf16.msra.mxu1 %v6361_v18  ;;  %v6454_v16 = vld [vmem:[#allocation7 + $0x1f0] ss:$8 sps:$4 sm:$0xff]   ;;  %v6459_v18 = vld [vmem:[#allocation7 + $0x1e4] ss:$8 sps:$4 sm:$0xff]  }
 0x2e2   :  { %4350 = vmatprep.subr.bf16.mxu0 %v6366_v19  ;;  %4391 = vmatprep.subr.bf16.mxu1 %v6369_v20  ;;  %v6418_v19 = vld [vmem:[#allocation7 + $0xb0] ss:$8 sps:$4 sm:$0xff]   ;;  %v6423_v20 = vld [vmem:[#allocation7 + $0xa4] ss:$8 sps:$4 sm:$0xff]  }
 0x2e5   :  { %4351 = vmatpush2.bf16.msra.mxu0 %v6364_v63  ;;  %4392 = vmatpush2.bf16.msra.mxu1 %v6367_v6  ;;  %v6457_v63 = vld [vmem:[#allocation7 + $0x1e0] ss:$8 sps:$4 sm:$0xff]   ;;  %v6462_v6 = vld [vmem:[#allocation7 + $0x1d4] ss:$8 sps:$4 sm:$0xff]  }
 0x2e6   :  { %4352 = vmatprep.subr.bf16.mxu0 %v6372_v24  ;;  %4393 = vmatprep.subr.bf16.mxu1 %v6375_v25  ;;  %v6421_v24 = vld [vmem:[#allocation7 + $0xa0] ss:$8 sps:$4 sm:$0xff]   ;;  %v6426_v25 = vld [vmem:[#allocation7 + $0x94] ss:$8 sps:$4 sm:$0xff]  }
 0x2e9   :  { %4353 = vmatpush2.bf16.msra.mxu0 %v6370_v26  ;;  %4394 = vmatpush2.bf16.msra.mxu1 %v6373_v13  ;;  %v6460_v26 = vld [vmem:[#allocation7 + $0x1d0] ss:$8 sps:$4 sm:$0xff]   ;;  %v6465_v13 = vld [vmem:[#allocation7 + $0x1c4] ss:$8 sps:$4 sm:$0xff]  }
 0x2ea   :  { %4354 = vmatprep.subr.bf16.mxu0 %v6378_v27  ;;  %4395 = vmatprep.subr.bf16.mxu1 %v6381_v32  ;;  %v6424_v27 = vld [vmem:[#allocation7 + $0x90] ss:$8 sps:$4 sm:$0xff]   ;;  %v6429_v32 = vld [vmem:[#allocation7 + $0x84] ss:$8 sps:$4 sm:$0xff]  }
 0x2ed   :  { %4355 = vmatpush2.bf16.msra.mxu0 %v6376_v33  ;;  %4396 = vmatpush2.bf16.msra.mxu1 %v6379_v34  ;;  %v6463_v33 = vld [vmem:[#allocation7 + $0x1c0] ss:$8 sps:$4 sm:$0xff]   ;;  %v6468_v34 = vld [vmem:[#allocation7 + $0x1b4] ss:$8 sps:$4 sm:$0xff]  }
 0x2ee   :  { %4834 = vmatprep.subr.bf16.mxu0 %v6384_v8  ;;  %4875 = vmatprep.subr.bf16.mxu1 %v6432_v47  ;;  %v6427_v8 = vld [vmem:[#allocation7 + $0x80] ss:$8 sps:$4 sm:$0xff]  }
 0x2f0   :  { %4357 = vmatmul.mubr.bf16.vlgmr.msra.gmra.mxu0 %v6797_v21  ;;  %4398 = vmatmul.mubr.bf16.vlgmr.msra.gmra.mxu1 %v6795_v15  ;;  %v6399_v21 = vld [vmem:[#allocation7 + $0x24] ss:$8 sps:$4 sm:$0xff]  }
 0x2f1   :  { %4835 = vmatpush1.bf16.msra.mxu0 %v6382_v46  ;;  %v6435_v15 = vld [vmem:[#allocation7 + $0x164] ss:$8 sps:$4 sm:$0xff]   ;;  %4876 = vmatpush1.bf16.msra.mxu1 %v6430_v50  ;;  %v6466_v46 = vld [vmem:[#allocation7 + $0x1b0] ss:$8 sps:$4 sm:$0xff]  }
 0x2f2   :  { %4836 = vmatprep.subr.bf16.mxu0 %v6387_v9  ;;  %4877 = vmatprep.subr.bf16.mxu1 %v6435_v15  ;;  %v6471_v9 = vld [vmem:[#allocation7 + $0x1a4] ss:$8 sps:$4 sm:$0xff]  }
 0x2f5   :  { %4837 = vmatpush1.bf16.msra.mxu0 %v6385_v36  ;;  %4878 = vmatpush1.bf16.msra.mxu1 %v6433_v41  ;;  %v6469_v36 = vld [vmem:[#allocation7 + $0x1a0] ss:$8 sps:$4 sm:$0xff]  }
 0x2f6   :  { %4838 = vmatprep.subr.bf16.mxu0 %v6390_v40  ;;  %4879 = vmatprep.subr.bf16.mxu1 %v6438_v51  ;;  %v6474_v40 = vld [vmem:[#allocation7 + $0x194] ss:$8 sps:$4 sm:$0xff]  }
 0x2f9   :  { %4839 = vmatpush1.bf16.msra.mxu0 %v6388_v42  ;;  %4880 = vmatpush1.bf16.msra.mxu1 %v6436_v54  ;;  %v6472_v42 = vld [vmem:[#allocation7 + $0x190] ss:$8 sps:$4 sm:$0xff]  }
 0x2fa   :  { %4840 = vmatprep.subr.bf16.mxu0 %v6393_v43  ;;  %4881 = vmatprep.subr.bf16.mxu1 %v6441_v48  ;;  %v6477_v43 = vld [vmem:[#allocation7 + $0x184] ss:$8 sps:$4 sm:$0xff]  }
 0x2fd   :  { %4841 = vmatpush1.bf16.msra.mxu0 %v6391_v44  ;;  %4882 = vmatpush1.bf16.msra.mxu1 %v6439_v56  ;;  %v6475_v44 = vld [vmem:[#allocation7 + $0x180] ss:$8 sps:$4 sm:$0xff]  }
 0x2fe   :  { %4842 = vmatprep.subr.bf16.mxu0 %v6396_v45  ;;  %4883 = vmatprep.subr.bf16.mxu1 %v6444_v57  ;;  %v94_v45 = vld [vmem:[%s6905_s9 + $0xc] sm:$0xf] }
 0x301   :  { %4843 = vmatpush1.bf16.msra.mxu0 %v6394_v49  ;;  %4884 = vmatpush1.bf16.msra.mxu1 %v6442_v58 }
 0x302   :  { %4844 = vmatprep.subr.bf16.mxu0 %v6399_v21  ;;  %4885 = vmatprep.subr.bf16.mxu1 %v6447_v59  ;;  %v4410_v21 = vrot.slane %v94_v45, %v6720_v22 }
 0x305   :  { %4845 = vmatpush1.bf16.msra.mxu0 %v6397_v52  ;;  %4886 = vmatpush1.bf16.msra.mxu1 %v6445_v62 }
 0x306   :  { %4846 = vmatprep.subr.bf16.mxu0 %v6402_v53  ;;  %4887 = vmatprep.subr.bf16.mxu1 %v6450_v0  ;;  %v4414_v53 = vrot.slane %v94_v45, %v6723_v23 }
 0x309   :  { %4847 = vmatpush1.bf16.msra.mxu0 %v6400_v17  ;;  %4888 = vmatpush1.bf16.msra.mxu1 %v6448_v29 }
 0x30a   :  { %4848 = vmatprep.subr.bf16.mxu0 %v6405_v55  ;;  %4889 = vmatprep.subr.bf16.mxu1 %v6453_v2  ;;  %v4422_v2 = vrot.slane %v94_v45, %v6746_v14  ;;  %v6479_v14 = vld [vmem:[%s6903_s7 + $0x38] sm:$0xff]  }
 0x30d   :  { %4849 = vmatpush1.bf16.msra.mxu0 %v6403_v30  ;;  %4890 = vmatpush1.bf16.msra.mxu1 %v6451_v7 }
 0x30e   :  { %4850 = vmatprep.subr.bf16.mxu0 %v6408_v31  ;;  %4891 = vmatprep.subr.bf16.mxu1 %v6456_v10 }
 0x311   :  { %4851 = vmatpush2.bf16.msra.mxu0 %v6406_v60  ;;  %4892 = vmatpush2.bf16.msra.mxu1 %v6454_v16 }
 0x312   :  { %4852 = vmatprep.subr.bf16.mxu0 %v6411_v61  ;;  %4893 = vmatprep.subr.bf16.mxu1 %v6459_v18 }
 0x315   :  { %4853 = vmatpush2.bf16.msra.mxu0 %v6409_v28  ;;  %4894 = vmatpush2.bf16.msra.mxu1 %v6457_v63  ;;  %v6481_v63 = vld [vmem:[%s6903_s7 + $0x30] sm:$0xff]  }
 0x316   :  { %4854 = vmatprep.subr.bf16.mxu0 %v6414_v1  ;;  %4895 = vmatprep.subr.bf16.mxu1 %v6462_v6  ;;  %v6482_v6 = vld [vmem:[%s6903_s7 + $0x68] sm:$0xff]  }
 0x319   :  { %4855 = vmatpush2.bf16.msra.mxu0 %v6412_v3  ;;  %4896 = vmatpush2.bf16.msra.mxu1 %v6460_v26  ;;  %v6485_v26 = vld [vmem:[%s6903_s7 + $0x20] sm:$0xff]  }
 0x31a   :  { %4856 = vmatprep.subr.bf16.mxu0 %v6417_v5  ;;  %4897 = vmatprep.subr.bf16.mxu1 %v6465_v13  ;;  %v6486_v13 = vld [vmem:[%s6903_s7 + $0x58] sm:$0xff]  }
 0x31d   :  { %4857 = vmatpush2.bf16.msra.mxu0 %v6415_v11  ;;  %4898 = vmatpush2.bf16.msra.mxu1 %v6463_v33  ;;  %v6489_v33 = vld [vmem:[%s6903_s7 + $0x10] sm:$0xff]  }
 0x31e   :  { %4858 = vmatprep.subr.bf16.mxu0 %v6420_v12  ;;  %4899 = vmatprep.subr.bf16.mxu1 %v6468_v34  ;;  %v6490_v34 = vld [vmem:[%s6903_s7 + $0x48] sm:$0xff]  }
 0x321   :  { %4859 = vmatpush2.bf16.msra.mxu0 %v6418_v19  ;;  %4900 = vmatpush2.bf16.msra.mxu1 %v6466_v46  ;;  %v6492_v46 = vld [vmem:[%s6903_s7 + $0x40] sm:$0xff]  }
 0x322   :  { %4860 = vmatprep.subr.bf16.mxu0 %v6423_v20  ;;  %4901 = vmatprep.subr.bf16.mxu1 %v6471_v9  ;;  %v6493_v9 = vld [vmem:[%s6903_s7] sm:$0xff]  }
 0x325   :  { %4861 = vmatpush2.bf16.msra.mxu0 %v6421_v24  ;;  %4902 = vmatpush2.bf16.msra.mxu1 %v6469_v36  ;;  %v6483_v24 = vld [vmem:[%s6903_s7 + $0x28] sm:$0xff]   ;;  %v6494_v36 = vld [vmem:[%s6904_s8 + $0x18] sm:$0xff]  }
 0x326   :  { %4862 = vmatprep.subr.bf16.mxu0 %v6426_v25  ;;  %4903 = vmatprep.subr.bf16.mxu1 %v6474_v40  ;;  %v6484_v25 = vld [vmem:[%s6903_s7 + $0x60] sm:$0xff]   ;;  %v6598_v40 = vmov 0.0  }
 0x329   :  { %4863 = vmatpush2.bf16.msra.mxu0 %v6424_v27  ;;  %4904 = vmatpush2.bf16.msra.mxu1 %v6472_v42  ;;  %v6487_v27 = vld [vmem:[%s6903_s7 + $0x18] sm:$0xff]  }
 0x32a   :  { %4864 = vmatprep.subr.bf16.mxu0 %v6429_v32  ;;  %4905 = vmatprep.subr.bf16.mxu1 %v6477_v43  ;;  %v6488_v32 = vld [vmem:[%s6903_s7 + $0x50] sm:$0xff]  }
 0x32d   :  { %4865 = vmatpush2.bf16.msra.mxu0 %v6427_v8  ;;  %4906 = vmatpush2.bf16.msra.mxu1 %v6475_v44  ;;  %v6491_v8 = vld [vmem:[%s6903_s7 + $0x8] sm:$0xff]  }
 0x32e   :  { %5878 = vmatprep.subr.bf16.mxu1 %v6598_v40 }
 0x370   :  { %v4276_v47 = vpop.f32.mrf.mxu0  ;;  %v4317_v49 = vpop.f32.mrf.mxu1 }
 0x371   :  { %v4277_v50 = vadd.f32 %v4276_v47, %v6801_v35  ;;  %v95_v47 = vld [vmem:[%s6905_s9 + $0x10] sm:$0x3] }
 0x372   :  { %v4278_v15 = vpop.f32.mrf.mxu0  ;;  %v4319_v41 = vpop.f32.mrf.mxu1 }
 0x373   :  { %v4318_v51 = vadd.f32 %v4317_v49, %v4277_v50  ;;  %v4279_v52 = vadd.f32 %v4278_v15, %v6805_v38  ;;  %v4418_v38 = vrot.slane %v94_v45, %v6743_v4  ;;  %v6478_v4 = vld [vmem:[%s6903_s7 + $0x78] sm:$0xff]   ;;  %v4507_v49 = vrot.slane %v95_v47, %v6720_v22  ;;  %v6495_v22 = vld [vmem:[%s6904_s8 + $0x10] sm:$0xff]  }
 0x374   :  { %v4280_v54 = vpop.f32.mrf.mxu0  ;;  %v4321_v48 = vpop.f32.mrf.mxu1  ;;  %5851 = vmatprep.subr.bf16.mxu0 %v6478_v4  ;;  %v4511_v50 = vrot.slane %v95_v47, %v6723_v23  ;;  %v6496_v23 = vld [vmem:[%s6904_s8 + $0x8] sm:$0xff]  }
 0x375   :  { %v4427_v17 = vadd.f32 %v4410_v21, %v4318_v51  ;;  %v4320_v55 = vadd.f32 %v4319_v41, %v4279_v52 }
 0x376   :  { %v4281_v56 = vpop.f32.mrf.mxu0  ;;  %v4322_v57 = vpop.f32.mrf.mxu1 }
 0x377   :  { %v4428_v30 = vadd.f32 %v4414_v53, %v4320_v55  ;;  %v4431_v31 = vmax.f32 %v4427_v17, 0.0 }
 0x379   :  { %v4432_v58 = vmax.f32 %v4428_v30, 0.0  ;;  %v4435_v35 = vpack.c.bf16 %v4431_v31, %v4431_v31  ;;  %v6497_v30 = vld [vmem:[%s6904_s8] sm:$0xff]  }
 0x37b   :  { %v4436_v59 = vpack.c.bf16 %v4432_v58, %v4432_v58  ;;  %v5828_v58 = vld [vmem:[%s6905_s9 + $0x12] ss:$0 sm:$0xff] }
 0x37d   :  { %4866 = vmatprep.mubr.bf16.mxu0 %v4436_v59 }
 0x37e   :  { %4867 = vmatmul.mubr.bf16.vlgmr.msra.gmra.mxu0 %v4435_v35 }
 0x37f   :  { %5852 = vmatpush3.bf16.msra.mxu0 %v6479_v14 }
 0x3b0   :  { %v4358_v60 = vpop.f32.mrf.mxu0  ;;  %v4399_v61 = vpop.f32.mrf.mxu1 }
 0x3b1   :  { %v4359_v62 = vadd.f32 %v4358_v60, %v6803_v37 }
 0x3b2   :  { %v4360_v0 = vpop.f32.mrf.mxu0  ;;  %v4401_v28 = vpop.f32.mrf.mxu1 }
 0x3b3   :  { %v4400_v1 = vadd.f32 %v4399_v61, %v4359_v62  ;;  %v4361_v29 = vadd.f32 %v4360_v0, %v6807_v39  ;;  %v6480_v39 = vld [vmem:[%s6903_s7 + $0x70] sm:$0xff]  }
 0x3b4   :  { %v4362_v3 = vpop.f32.mrf.mxu0  ;;  %v4403_v5 = vpop.f32.mrf.mxu1  ;;  %5853 = vmatprep.subr.bf16.mxu0 %v6480_v39 }
 0x3b5   :  { %v4429_v7 = vadd.f32 %v4418_v38, %v4400_v1  ;;  %v4402_v10 = vadd.f32 %v4401_v28, %v4361_v29  ;;  %5854 = vmatpush3.bf16.msra.mxu0 %v6481_v63  ;;  %v5845_v28 = vld [vmem:[%s6905_s9 + $0x13] ss:$0 sm:$0xff] }
 0x3b6   :  { %v4363_v11 = vpop.f32.mrf.mxu0  ;;  %v4404_v12 = vpop.f32.mrf.mxu1  ;;  %5855 = vmatprep.subr.bf16.mxu0 %v6482_v6 }
 0x3b7   :  { %v4430_v16 = vadd.f32 %v4422_v2, %v4402_v10  ;;  %v4433_v18 = vmax.f32 %v4429_v7, 0.0 }
 0x3b9   :  { %v4434_v19 = vmax.f32 %v4430_v16, 0.0  ;;  %v4437_v37 = vpack.c.bf16 %v4433_v18, %v4433_v18  ;;  %5856 = vmatpush3.bf16.msra.mxu0 %v6483_v24 }
 0x3ba   :  { %5857 = vmatprep.subr.bf16.mxu0 %v6484_v25 }
 0x3bb   :  { %v4438_v20 = vpack.c.bf16 %v4434_v19, %v4434_v19 }
 0x3bd   :  { %4907 = vmatprep.mubr.bf16.mxu1 %v4438_v20  ;;  %5858 = vmatpush3.bf16.msra.mxu0 %v6485_v26 }
 0x3be   :  { %4908 = vmatmul.mubr.bf16.vlgmr.msra.gmra.mxu1 %v4437_v37  ;;  %5859 = vmatprep.subr.bf16.mxu0 %v6486_v13 }
 0x3bf   :  { %5879 = vmatpush3.bf16.msra.mxu1 %v6494_v36  ;;  %5886 = vmatprep.mubr.msk.bf16.mxu1 %vm6599_vm0, %v6598_v40 }
 0x3c0   :  { %5880 = vmatprep.subr.bf16.mxu1 %v6598_v40 }
 0x3c1   :  { %5860 = vmatpush3.bf16.msra.mxu0 %v6487_v27 }
 0x3c2   :  { %5861 = vmatprep.subr.bf16.mxu0 %v6488_v32 }
 0x3c3   :  { %5881 = vmatpush3.bf16.msra.mxu1 %v6495_v22 }
 0x3c4   :  { %5882 = vmatprep.subr.bf16.mxu1 %v6598_v40 }
 0x3c5   :  { %5862 = vmatpush3.bf16.msra.mxu0 %v6489_v33 }
 0x3c6   :  { %5863 = vmatprep.subr.bf16.mxu0 %v6490_v34 }
 0x3c7   :  { %5883 = vmatpush3.bf16.msra.mxu1 %v6496_v23 }
 0x3c8   :  { %5884 = vmatprep.subr.bf16.mxu1 %v6598_v40 }
 0x3c9   :  { %5864 = vmatpush3.bf16.msra.mxu0 %v6491_v8 }
 0x3ca   :  { %5865 = vmatprep.subr.bf16.mxu0 %v6492_v46 }
 0x3cb   :  { %5885 = vmatpush3.bf16.msra.mxu1 %v6497_v30 }
 0x3cd   :  { %5866 = vmatpush3.bf16.msra.mxu0 %v6493_v9 }
 0x43e   :  { %v4868_v42 = vpop.f32.mrf.mxu0 }
 0x43f   :  { %v4869_v21 = vadd.f32 %v4868_v42, %v4507_v49 }
 0x440   :  { %v4870_v43 = vpop.f32.mrf.mxu0 }
 0x441   :  { %v4871_v41 = vadd.f32 %v4870_v43, %v4511_v50 }
 0x442   :  { %v4872_v44 = vpop.f32.mrf.mxu0 }
 0x444   :  { %v4873_v45 = vpop.f32.mrf.mxu0 }
 0x47e   :  { %v4909_v15 = vpop.f32.mrf.mxu1 }
 0x47f   :  { %v4910_v51 = vadd.f32 %v4909_v15, %v4869_v21 }
 0x480   :  { %v4911_v52 = vpop.f32.mrf.mxu1 }
 0x481   :  { %v4912_v53 = vadd.f32 %v4911_v52, %v4871_v41  ;;  %v4916_v54 = vmax.f32 %v4910_v51, 0.0 }
 0x482   :  { %v4913_v48 = vpop.f32.mrf.mxu1 }
 0x483   :  { %v4917_v17 = vmax.f32 %v4912_v53, 0.0  ;;  %v4918_v57 = vpack.c.bf16 %v4916_v54, %v4916_v54 }
 0x484   :  { %v4914_v55 = vpop.f32.mrf.mxu1 }
 0x485   :  { %v4919_v56 = vpack.c.bf16 %v4917_v17, %v4917_v17 }
 0x487   :  { %5086 = vmatprep.mubr.bf16.mxu0 %v4919_v56 }
 0x488   :  { %5087 = vmatmul.mubr.bf16.vlgmr.msra.gmra.mxu0 %v4918_v57 }
 0x548   :  { %v5867_v31 = vpop.f32.mrf.mxu0 }
 0x54a   :  { %v5868_v59 = vpop.f32.mrf.mxu0 }
 0x54b   :  { %v5869_v35 = vadd.f32 %v5868_v59, %v5867_v31 }
 0x54c   :  { %v5870_v60 = vpop.f32.mrf.mxu0 }
 0x54d   :  { %v5089_v61 = vadd.f32 %v5869_v35, %v5828_v58 }
 0x54e   :  { %v5871_v62 = vpop.f32.mrf.mxu0 }
 0x54f   :  { %v5094_v38 = vmax.f32 %v5089_v61, 0.0 }
 0x551   :  { %v5095_v0 = vpack.c.bf16 %v5094_v38, %v5094_v38 }
 0x553   :  { %5887 = vmatmul.mubr.msk.bf16.vlgmr.msra.gmra.mxu1 %vm5134_vm1, %v5095_v0 }
 0x613   :  { %v5172_v1 = vpop.f32.mrf.mxu1 }
 0x614   :  { %v5173_v29 = vadd.f32 %v5845_v28, %v5172_v1 }
 0x615   :  { %v5888_v2 = vpop.f32.mrf.mxu1 }
 0x616   :  { %5179 = vst.msk [vmem:[%s6906_s10] sm:$0xff] %vm5178_vm2, %v5173_v29 }
 0x617   :  { %v5175_v3 = vpop.f32.mrf.mxu1 }
 0x619   :  { %v5889_v5 = vpop.f32.mrf.mxu1 }
 0x61a   :  { %5184 = vsyncpa [#allocation3], 1 }
 0x61b   :  { %5185 = vsyncpa [#allocation5], 1 }
 0x61c   :  { %5186 = vsyncpa [#allocation8], 1 }

</bundles_post_ra>
